<compile_context>
chip_gen: v7x
topology: tpu7x:2x2x1
jax: 0.10.0
libtpu: 0.0.40
codegen_flags: <defaults>
</compile_context>

<pallas_src>
import functools

import numpy as np
import jax
import jax.numpy as jnp
from jax import lax
from jax.experimental import pallas as pl
from jax.experimental.pallas import tpu as pltpu


# ------------------------------ Pallas kernel --------------------------------

def _mobilenet_kernel(Hs, Ws, C0, C1,
                      pat_ref, sw_ref, sb_ref,
                      dw1_ref, db1_ref, pw1_ref, pb1_ref,
                      g2_ref, dw2_ref, db2_ref, pw2_ref, pb2_ref,
                      fcw_ref, fcb_ref,
                      o_ref, pad_scr):
    """stem conv -> dw3x3/s1 -> pw -> dw3x3/s2 -> pw -> GAP -> linear, all in VMEM."""
    M = Hs * Ws
    Ho, Wo = Hs // 2, Ws // 2
    M2 = Ho * Wo

    # ---- stem 3x3/s2 conv as an im2col matmul (BN scale pre-folded) ----------
    y = jnp.dot(pat_ref[0], sw_ref[...], preferred_element_type=jnp.float32)
    y = jnp.clip(y + sb_ref[...], 0.0, 6.0)                         # [M, C0]

    # ---- block-1 depthwise 3x3 / s1: halo scratch + 9 shifted-slice taps -----
    # zero only the 1-wide halo; the interior is fully overwritten every step
    pad_scr[0:1, :, :] = jnp.zeros((1, Ws + 2, C0), jnp.float32)
    pad_scr[Hs + 1:Hs + 2, :, :] = jnp.zeros((1, Ws + 2, C0), jnp.float32)
    pad_scr[:, 0:1, :] = jnp.zeros((Hs + 2, 1, C0), jnp.float32)
    pad_scr[:, Ws + 1:Ws + 2, :] = jnp.zeros((Hs + 2, 1, C0), jnp.float32)
    pad_scr[1:Hs + 1, 1:Ws + 1, :] = y.reshape(Hs, Ws, C0)

    dw1 = dw1_ref[...]                                               # [9, C0]
    acc = pad_scr[0:Hs, 0:Ws, :] * dw1[0:1, :]
    for k in range(1, 9):
        di, dj = k // 3, k % 3
        acc = acc + pad_scr[di:di + Hs, dj:dj + Ws, :] * dw1[k:k + 1, :]
    acc = jnp.clip(acc + db1_ref[...], 0.0, 6.0)                     # [Hs, Ws, C0]

    # ---- block-1 pointwise C0 -> C1 on the MXU --------------------------------
    z1 = jnp.dot(acc.reshape(M, C0).astype(jnp.bfloat16), pw1_ref[...],
                 preferred_element_type=jnp.float32)
    z1 = jnp.clip(z1 + pb1_ref[...], 0.0, 6.0)                       # [M, C1]

    # ---- block-2 depthwise 3x3 / s2: taps via constant 0/1 selection matmul ---
    # g2[k*M2 + o, m] = 1 iff input pixel m is tap k of output pixel o (0 if padded)
    taps = jnp.dot(g2_ref[...], z1.astype(jnp.bfloat16),
                   preferred_element_type=jnp.float32)               # [9*M2, C1]
    taps = taps.reshape(9, M2, C1)
    dw2 = dw2_ref[...]                                               # [9, 1, C1]
    acc2 = taps[0] * dw2[0]
    for k in range(1, 9):
        acc2 = acc2 + taps[k] * dw2[k]
    acc2 = jnp.clip(acc2 + db2_ref[...], 0.0, 6.0)                   # [M2, C1]

    # ---- block-2 pointwise C1 -> C2 on the MXU --------------------------------
    z2 = jnp.dot(acc2.astype(jnp.bfloat16), pw2_ref[...],
                 preferred_element_type=jnp.float32)
    z2 = jnp.clip(z2 + pb2_ref[...], 0.0, 6.0)                       # [M2, C2]

    # ---- global average pool + classifier head (Dropout(0.2) identity at eval) -
    feat = jnp.mean(z2, axis=0, keepdims=True)                       # [1, C2]
    logits = jnp.dot(feat, fcw_ref[...],
                     preferred_element_type=jnp.float32) + fcb_ref[...]
    o_ref[...] = logits.reshape(o_ref.shape)


# ------------------------------- wrapper --------------------------------------

def _const_spec(shape):
    rank = len(shape)
    return pl.BlockSpec(shape, lambda *_: (0,) * rank)   # constant block: DMA'd once


@functools.lru_cache(maxsize=None)
def _dw_s2_gather_matrix(Hs, Ws, Ho, Wo):
    """Constant selection matrix for a 3x3 / stride-2 / pad-1 depthwise gather."""
    G = np.zeros((9, Ho * Wo, Hs * Ws), np.float32)
    for k in range(9):
        di, dj = k // 3, k % 3
        for oi in range(Ho):
            ih = 2 * oi + di - 1
            if not (0 <= ih < Hs):
                continue
            for oj in range(Wo):
                iw = 2 * oj + dj - 1
                if 0 <= iw < Ws:
                    G[k, oi * Wo + oj, ih * Ws + iw] = 1.0
    return jnp.asarray(G.reshape(9 * Ho * Wo, Hs * Ws), jnp.bfloat16)


def fused_mobilenet(pat, hw, g2, p):
    N, M, KF = pat.shape
    Hs, Ws = hw
    assert Hs * Ws == M
    C0 = p["stem_w"].shape[1]
    C1 = p["b1_pw_w"].shape[1]
    n_class = p["fc_w"].shape[1]
    kernel = functools.partial(_mobilenet_kernel, Hs, Ws, C0, C1)
    out = pl.pallas_call(
        kernel,
        out_shape=jax.ShapeDtypeStruct((N, 1, n_class), jnp.float32),
        grid=(N,),
        in_specs=[
            pl.BlockSpec((1, M, KF), lambda n: (n, 0, 0)),
            _const_spec(p["stem_w"].shape), _const_spec(p["stem_b"].shape),
            _const_spec(p["b1_dw_w"].shape), _const_spec(p["b1_dw_b"].shape),
            _const_spec(p["b1_pw_w"].shape), _const_spec(p["b1_pw_b"].shape),
            _const_spec(g2.shape),
            _const_spec(p["b2_dw_w"].shape), _const_spec(p["b2_dw_b"].shape),
            _const_spec(p["b2_pw_w"].shape), _const_spec(p["b2_pw_b"].shape),
            _const_spec(p["fc_w"].shape), _const_spec(p["fc_b"].shape),
        ],
        out_specs=pl.BlockSpec((1, 1, n_class), lambda n: (n, 0, 0)),
        scratch_shapes=[pltpu.VMEM((Hs + 2, Ws + 2, C0), jnp.float32)],
        compiler_params=pltpu.CompilerParams(
            dimension_semantics=("parallel",)),
    )(pat, p["stem_w"], p["stem_b"],
      p["b1_dw_w"], p["b1_dw_b"], p["b1_pw_w"], p["b1_pw_b"],
      g2, p["b2_dw_w"], p["b2_dw_b"], p["b2_pw_w"], p["b2_pw_b"],
      p["fc_w"], p["fc_b"])
    return out[:, 0, :]


# ------------------------- params / full forward ------------------------------

def init_params(key, n_class=2):
    """BN scales are folded into the conv weights here (f32, before bf16 cast)."""
    ks = jax.random.split(key, 20)

    def nrm(k, shape, std=0.1):
        return std * jax.random.normal(k, shape, jnp.float32)

    def scl(k, n):
        return 1.0 + nrm(k, (1, n), 0.05)

    p = {}
    # stem: 3x3/s2 conv 3 -> 16 (im2col row = (3*dh + dw)*3 + cin), K padded 27 -> 32
    sw = nrm(ks[0], (27, 16)) * scl(ks[1], 16)
    p["stem_w"] = jnp.pad(sw, ((0, 5), (0, 0))).astype(jnp.bfloat16)
    p["stem_b"] = nrm(ks[2], (1, 16), 0.05)
    # block1: dw 3x3/s1 on 16, pw 16 -> 32
    p["b1_dw_w"] = nrm(ks[3], (9, 16)) * scl(ks[4], 16)
    p["b1_dw_b"] = nrm(ks[5], (1, 16), 0.05)
    p["b1_pw_w"] = (nrm(ks[6], (16, 32)) * scl(ks[7], 32)).astype(jnp.bfloat16)
    p["b1_pw_b"] = nrm(ks[8], (1, 32), 0.05)
    # block2: dw 3x3/s2 on 32, pw 32 -> 64
    p["b2_dw_w"] = (nrm(ks[9], (9, 32)) * scl(ks[10], 32)).reshape(9, 1, 32)
    p["b2_dw_b"] = nrm(ks[11], (1, 32), 0.05)
    p["b2_pw_w"] = (nrm(ks[12], (32, 64)) * scl(ks[13], 64)).astype(jnp.bfloat16)
    p["b2_pw_b"] = nrm(ks[14], (1, 64), 0.05)
    # head: Dropout(0.2) (identity at eval) + Linear(64 -> n_class)
    p["fc_w"] = nrm(ks[15], (64, n_class))
    p["fc_b"] = nrm(ks[16], (1, n_class), 0.05)
    return p


def mobilenet_forward(params, x_nchw):
    # NCHW (PyTorch) -> NHWC once at the boundary
    x = jnp.transpose(x_nchw, (0, 2, 3, 1)).astype(jnp.float32)
    N, H, W, Cin = x.shape
    assert H % 4 == 0 and W % 4 == 0 and Cin == 3
    Hs, Ws = H // 2, W // 2
    Ho, Wo = Hs // 2, Ws // 2

    # stem im2col (3x3 / stride 2 / pad 1) in the wrapper: Cin=3 so the expansion is
    # tiny; K padded 27 -> 32 for a clean lane layout.  The depthwise convs gather
    # their taps entirely inside the kernel.
    xp = jnp.pad(x, ((0, 0), (1, 1), (1, 1), (0, 0)))
    taps = [xp[:, di:di + 2 * Hs:2, dj:dj + 2 * Ws:2, :]
            for di in range(3) for dj in range(3)]
    pat = jnp.stack(taps, axis=3).reshape(N, Hs * Ws, 9 * Cin)
    pat = jnp.pad(pat, ((0, 0), (0, 0), (0, 32 - 9 * Cin))).astype(jnp.bfloat16)

    g2 = _dw_s2_gather_matrix(Hs, Ws, Ho, Wo)          # constant, built at trace time
    return fused_mobilenet(pat, (Hs, Ws), g2, params)


# ------------------------- pure-XLA reference ---------------------------------

def reference_forward(params, x_nchw):
    """f32 XLA reference using the same (BN-folded) weights, for correctness checks."""
    x = jnp.transpose(x_nchw, (0, 2, 3, 1)).astype(jnp.float32)
    dn = ("NHWC", "HWIO", "NHWC")

    w = params["stem_w"].astype(jnp.float32)[:27].reshape(3, 3, 3, -1)
    y = lax.conv_general_dilated(x, w, (2, 2), [(1, 1), (1, 1)], dimension_numbers=dn)
    y = jnp.clip(y + params["stem_b"][0], 0.0, 6.0)

    C0 = y.shape[-1]
    w = params["b1_dw_w"].reshape(3, 3, 1, C0)
    y = lax.conv_general_dilated(y, w, (1, 1), [(1, 1), (1, 1)],
                                 dimension_numbers=dn, feature_group_count=C0)
    y = jnp.clip(y + params["b1_dw_b"][0], 0.0, 6.0)
    y = jnp.einsum("nhwc,cd->nhwd", y, params["b1_pw_w"].astype(jnp.float32))
    y = jnp.clip(y + params["b1_pw_b"][0], 0.0, 6.0)

    C1 = y.shape[-1]
    w = params["b2_dw_w"].reshape(3, 3, 1, C1)
    y = lax.conv_general_dilated(y, w, (2, 2), [(1, 1), (1, 1)],
                                 dimension_numbers=dn, feature_group_count=C1)
    y = jnp.clip(y + params["b2_dw_b"][0], 0.0, 6.0)
    y = jnp.einsum("nhwc,cd->nhwd", y, params["b2_pw_w"].astype(jnp.float32))
    y = jnp.clip(y + params["b2_pw_b"][0], 0.0, 6.0)

    feat = jnp.mean(y, axis=(1, 2))                    # Dropout(0.2): identity at eval
    return feat @ params["fc_w"] + params["fc_b"]


if __name__ == "__main__":
    key = jax.random.PRNGKey(0)
    pkey, xkey = jax.random.split(key)
    params = init_params(pkey, n_class=2)
    x = jax.random.normal(xkey, (2, 3, 32, 32), jnp.float32)   # NCHW like PyTorch

    fwd = jax.jit(mobilenet_forward)
    logits = jax.block_until_ready(fwd(params, x))
    assert logits.shape == (2, 2), logits.shape
    assert bool(jnp.all(jnp.isfinite(logits)))

    ref = jax.block_until_ready(jax.jit(reference_forward)(params, x))
    # bf16 MXU inputs in the kernel vs f32 reference -> loose tolerance
    assert bool(jnp.allclose(logits, ref, atol=3e-2, rtol=3e-2)), (logits, ref)
    print("KERNEL_OK")
</pallas_src>

<mosaic_0001>
module attributes {stable_mosaic.version = 11 : i64} {
  func.func @_mobilenet_kernel(%arg0: i32, %arg1: memref<1x256x32xbf16, #tpu.memory_space<vmem>>, %arg2: memref<32x16xbf16, #tpu.memory_space<vmem>>, %arg3: memref<1x16xf32, #tpu.memory_space<vmem>>, %arg4: memref<9x16xf32, #tpu.memory_space<vmem>>, %arg5: memref<1x16xf32, #tpu.memory_space<vmem>>, %arg6: memref<16x32xbf16, #tpu.memory_space<vmem>>, %arg7: memref<1x32xf32, #tpu.memory_space<vmem>>, %arg8: memref<576x256xbf16, #tpu.memory_space<vmem>>, %arg9: memref<9x1x32xf32, #tpu.memory_space<vmem>>, %arg10: memref<1x32xf32, #tpu.memory_space<vmem>>, %arg11: memref<32x64xbf16, #tpu.memory_space<vmem>>, %arg12: memref<1x64xf32, #tpu.memory_space<vmem>>, %arg13: memref<64x2xf32, #tpu.memory_space<vmem>>, %arg14: memref<1x2xf32, #tpu.memory_space<vmem>>, %arg15: memref<1x1x2xf32, #tpu.memory_space<vmem>>, %arg16: memref<18x18x16xf32, #tpu.memory_space<vmem>>) attributes {dimension_semantics = [#tpu.dimension_semantics<parallel>], iteration_bounds = array<i64: 2>, scalar_prefetch = 0 : i64, scratch_operands = 1 : i64, tpu.core_type = #tpu.core_type<tc>, window_params = [{transform_indices = @transform_0, window_bounds = array<i64: 1, 256, 32>}, {pipeline_mode = #tpu.pipeline_mode<synchronous>, transform_indices = @transform_1, window_bounds = array<i64: 32, 16>}, {pipeline_mode = #tpu.pipeline_mode<synchronous>, transform_indices = @transform_2, window_bounds = array<i64: 1, 16>}, {pipeline_mode = #tpu.pipeline_mode<synchronous>, transform_indices = @transform_3, window_bounds = array<i64: 9, 16>}, {pipeline_mode = #tpu.pipeline_mode<synchronous>, transform_indices = @transform_4, window_bounds = array<i64: 1, 16>}, {pipeline_mode = #tpu.pipeline_mode<synchronous>, transform_indices = @transform_5, window_bounds = array<i64: 16, 32>}, {pipeline_mode = #tpu.pipeline_mode<synchronous>, transform_indices = @transform_6, window_bounds = array<i64: 1, 32>}, {pipeline_mode = #tpu.pipeline_mode<synchronous>, transform_indices = @transform_7, window_bounds = array<i64: 576, 256>}, {pipeline_mode = #tpu.pipeline_mode<synchronous>, transform_indices = @transform_8, window_bounds = array<i64: 9, 1, 32>}, {pipeline_mode = #tpu.pipeline_mode<synchronous>, transform_indices = @transform_9, window_bounds = array<i64: 1, 32>}, {pipeline_mode = #tpu.pipeline_mode<synchronous>, transform_indices = @transform_10, window_bounds = array<i64: 32, 64>}, {pipeline_mode = #tpu.pipeline_mode<synchronous>, transform_indices = @transform_11, window_bounds = array<i64: 1, 64>}, {pipeline_mode = #tpu.pipeline_mode<synchronous>, transform_indices = @transform_12, window_bounds = array<i64: 64, 2>}, {pipeline_mode = #tpu.pipeline_mode<synchronous>, transform_indices = @transform_13, window_bounds = array<i64: 1, 2>}, {transform_indices = @transform_14, window_bounds = array<i64: 1, 1, 2>}]} {
    %c0 = arith.constant 0 : index
    %c0_0 = arith.constant 0 : index
    %c0_1 = arith.constant 0 : index
    %0 = vector.load %arg1[%c0, %c0_0, %c0_1] : memref<1x256x32xbf16, #tpu.memory_space<vmem>>, vector<1x256x32xbf16>
    %1 = vector.shape_cast %0 : vector<1x256x32xbf16> to vector<256x32xbf16>
    %c0_2 = arith.constant 0 : index
    %c0_3 = arith.constant 0 : index
    %2 = vector.load %arg2[%c0_2, %c0_3] : memref<32x16xbf16, #tpu.memory_space<vmem>>, vector<32x16xbf16>
    %cst = arith.constant dense<0.000000e+00> : vector<256x16xf32>
    %3 = tpu.matmul %1, %2, %cst {dimension_numbers = #tpu.dot_dimension_numbers<[1], [0], [0], [1], [0, 0, 1, 1], [], []>} : vector<256x32xbf16>, vector<32x16xbf16>, vector<256x16xf32> -> vector<256x16xf32>
    %c0_4 = arith.constant 0 : index
    %c0_5 = arith.constant 0 : index
    %4 = vector.load %arg3[%c0_4, %c0_5] : memref<1x16xf32, #tpu.memory_space<vmem>>, vector<1x16xf32>
    %5 = vector.broadcast %4 : vector<1x16xf32> to vector<256x16xf32>
    %6 = arith.addf %3, %5 : vector<256x16xf32>
    %cst_6 = arith.constant 0.000000e+00 : f32
    %cst_7 = arith.constant 6.000000e+00 : f32
    %7 = vector.broadcast %cst_6 : f32 to vector<256x16xf32>
    %8 = arith.maximumf %7, %6 : vector<256x16xf32>
    %9 = vector.broadcast %cst_7 : f32 to vector<256x16xf32>
    %10 = arith.minimumf %9, %8 : vector<256x16xf32>
    %cst_8 = arith.constant 0.000000e+00 : f32
    %11 = vector.broadcast %cst_8 : f32 to vector<1x18x16xf32>
    %c0_9 = arith.constant 0 : index
    %c0_10 = arith.constant 0 : index
    %c0_11 = arith.constant 0 : index
    %12 = vector.load %arg16[%c0_9, %c0_10, %c0_11] : memref<18x18x16xf32, #tpu.memory_space<vmem>>, vector<1x18x16xf32>
    tpu.vector_store %arg16[%c0_9, %c0_10, %c0_11], %11 {strides = array<i32>} : memref<18x18x16xf32, #tpu.memory_space<vmem>>, vector<1x18x16xf32>,
    %cst_12 = arith.constant 0.000000e+00 : f32
    %13 = vector.broadcast %cst_12 : f32 to vector<1x18x16xf32>
    %c17 = arith.constant 17 : index
    %c0_13 = arith.constant 0 : index
    %c0_14 = arith.constant 0 : index
    %14 = vector.load %arg16[%c17, %c0_13, %c0_14] : memref<18x18x16xf32, #tpu.memory_space<vmem>>, vector<1x18x16xf32>
    tpu.vector_store %arg16[%c17, %c0_13, %c0_14], %13 {strides = array<i32>} : memref<18x18x16xf32, #tpu.memory_space<vmem>>, vector<1x18x16xf32>,
    %cst_15 = arith.constant 0.000000e+00 : f32
    %15 = vector.broadcast %cst_15 : f32 to vector<18x1x16xf32>
    %c0_16 = arith.constant 0 : index
    %c0_17 = arith.constant 0 : index
    %c0_18 = arith.constant 0 : index
    %16 = vector.load %arg16[%c0_16, %c0_17, %c0_18] : memref<18x18x16xf32, #tpu.memory_space<vmem>>, vector<18x1x16xf32>
    tpu.vector_store %arg16[%c0_16, %c0_17, %c0_18], %15 {strides = array<i32>} : memref<18x18x16xf32, #tpu.memory_space<vmem>>, vector<18x1x16xf32>,
    %cst_19 = arith.constant 0.000000e+00 : f32
    %17 = vector.broadcast %cst_19 : f32 to vector<18x1x16xf32>
    %c0_20 = arith.constant 0 : index
    %c17_21 = arith.constant 17 : index
    %c0_22 = arith.constant 0 : index
    %18 = vector.load %arg16[%c0_20, %c17_21, %c0_22] : memref<18x18x16xf32, #tpu.memory_space<vmem>>, vector<18x1x16xf32>
    tpu.vector_store %arg16[%c0_20, %c17_21, %c0_22], %17 {strides = array<i32>} : memref<18x18x16xf32, #tpu.memory_space<vmem>>, vector<18x1x16xf32>,
    %19 = vector.shape_cast %10 : vector<256x16xf32> to vector<16x16x16xf32>
    %c1 = arith.constant 1 : index
    %c1_23 = arith.constant 1 : index
    %c0_24 = arith.constant 0 : index
    %20 = vector.load %arg16[%c1, %c1_23, %c0_24] : memref<18x18x16xf32, #tpu.memory_space<vmem>>, vector<16x16x16xf32>
    tpu.vector_store %arg16[%c1, %c1_23, %c0_24], %19 {strides = array<i32>} : memref<18x18x16xf32, #tpu.memory_space<vmem>>, vector<16x16x16xf32>,
    %c0_25 = arith.constant 0 : index
    %c0_26 = arith.constant 0 : index
    %21 = vector.load %arg4[%c0_25, %c0_26] : memref<9x16xf32, #tpu.memory_space<vmem>>, vector<9x16xf32>
    %c0_27 = arith.constant 0 : index
    %c0_28 = arith.constant 0 : index
    %c0_29 = arith.constant 0 : index
    %22 = vector.load %arg16[%c0_27, %c0_28, %c0_29] : memref<18x18x16xf32, #tpu.memory_space<vmem>>, vector<16x16x16xf32>
    %23 = vector.extract_strided_slice %21 {offsets = [0, 0], sizes = [1, 16], strides = [1, 1]} : vector<9x16xf32> to vector<1x16xf32>
    %24 = vector.shape_cast %23 : vector<1x16xf32> to vector<1x1x16xf32>
    %25 = vector.broadcast %24 : vector<1x1x16xf32> to vector<16x16x16xf32>
    %26 = arith.mulf %22, %25 : vector<16x16x16xf32>
    %c0_30 = arith.constant 0 : index
    %c1_31 = arith.constant 1 : index
    %c0_32 = arith.constant 0 : index
    %27 = vector.load %arg16[%c0_30, %c1_31, %c0_32] : memref<18x18x16xf32, #tpu.memory_space<vmem>>, vector<16x16x16xf32>
    %28 = vector.extract_strided_slice %21 {offsets = [1, 0], sizes = [1, 16], strides = [1, 1]} : vector<9x16xf32> to vector<1x16xf32>
    %29 = vector.shape_cast %28 : vector<1x16xf32> to vector<1x1x16xf32>
    %30 = vector.broadcast %29 : vector<1x1x16xf32> to vector<16x16x16xf32>
    %31 = arith.mulf %27, %30 : vector<16x16x16xf32>
    %32 = arith.addf %26, %31 : vector<16x16x16xf32>
    %c0_33 = arith.constant 0 : index
    %c2 = arith.constant 2 : index
    %c0_34 = arith.constant 0 : index
    %33 = vector.load %arg16[%c0_33, %c2, %c0_34] : memref<18x18x16xf32, #tpu.memory_space<vmem>>, vector<16x16x16xf32>
    %34 = vector.extract_strided_slice %21 {offsets = [2, 0], sizes = [1, 16], strides = [1, 1]} : vector<9x16xf32> to vector<1x16xf32>
    %35 = vector.shape_cast %34 : vector<1x16xf32> to vector<1x1x16xf32>
    %36 = vector.broadcast %35 : vector<1x1x16xf32> to vector<16x16x16xf32>
    %37 = arith.mulf %33, %36 : vector<16x16x16xf32>
    %38 = arith.addf %32, %37 : vector<16x16x16xf32>
    %c1_35 = arith.constant 1 : index
    %c0_36 = arith.constant 0 : index
    %c0_37 = arith.constant 0 : index
    %39 = vector.load %arg16[%c1_35, %c0_36, %c0_37] : memref<18x18x16xf32, #tpu.memory_space<vmem>>, vector<16x16x16xf32>
    %40 = vector.extract_strided_slice %21 {offsets = [3, 0], sizes = [1, 16], strides = [1, 1]} : vector<9x16xf32> to vector<1x16xf32>
    %41 = vector.shape_cast %40 : vector<1x16xf32> to vector<1x1x16xf32>
    %42 = vector.broadcast %41 : vector<1x1x16xf32> to vector<16x16x16xf32>
    %43 = arith.mulf %39, %42 : vector<16x16x16xf32>
    %44 = arith.addf %38, %43 : vector<16x16x16xf32>
    %c1_38 = arith.constant 1 : index
    %c1_39 = arith.constant 1 : index
    %c0_40 = arith.constant 0 : index
    %45 = vector.load %arg16[%c1_38, %c1_39, %c0_40] : memref<18x18x16xf32, #tpu.memory_space<vmem>>, vector<16x16x16xf32>
    %46 = vector.extract_strided_slice %21 {offsets = [4, 0], sizes = [1, 16], strides = [1, 1]} : vector<9x16xf32> to vector<1x16xf32>
    %47 = vector.shape_cast %46 : vector<1x16xf32> to vector<1x1x16xf32>
    %48 = vector.broadcast %47 : vector<1x1x16xf32> to vector<16x16x16xf32>
    %49 = arith.mulf %45, %48 : vector<16x16x16xf32>
    %50 = arith.addf %44, %49 : vector<16x16x16xf32>
    %c1_41 = arith.constant 1 : index
    %c2_42 = arith.constant 2 : index
    %c0_43 = arith.constant 0 : index
    %51 = vector.load %arg16[%c1_41, %c2_42, %c0_43] : memref<18x18x16xf32, #tpu.memory_space<vmem>>, vector<16x16x16xf32>
    %52 = vector.extract_strided_slice %21 {offsets = [5, 0], sizes = [1, 16], strides = [1, 1]} : vector<9x16xf32> to vector<1x16xf32>
    %53 = vector.shape_cast %52 : vector<1x16xf32> to vector<1x1x16xf32>
    %54 = vector.broadcast %53 : vector<1x1x16xf32> to vector<16x16x16xf32>
    %55 = arith.mulf %51, %54 : vector<16x16x16xf32>
    %56 = arith.addf %50, %55 : vector<16x16x16xf32>
    %c2_44 = arith.constant 2 : index
    %c0_45 = arith.constant 0 : index
    %c0_46 = arith.constant 0 : index
    %57 = vector.load %arg16[%c2_44, %c0_45, %c0_46] : memref<18x18x16xf32, #tpu.memory_space<vmem>>, vector<16x16x16xf32>
    %58 = vector.extract_strided_slice %21 {offsets = [6, 0], sizes = [1, 16], strides = [1, 1]} : vector<9x16xf32> to vector<1x16xf32>
    %59 = vector.shape_cast %58 : vector<1x16xf32> to vector<1x1x16xf32>
    %60 = vector.broadcast %59 : vector<1x1x16xf32> to vector<16x16x16xf32>
    %61 = arith.mulf %57, %60 : vector<16x16x16xf32>
    %62 = arith.addf %56, %61 : vector<16x16x16xf32>
    %c2_47 = arith.constant 2 : index
    %c1_48 = arith.constant 1 : index
    %c0_49 = arith.constant 0 : index
    %63 = vector.load %arg16[%c2_47, %c1_48, %c0_49] : memref<18x18x16xf32, #tpu.memory_space<vmem>>, vector<16x16x16xf32>
    %64 = vector.extract_strided_slice %21 {offsets = [7, 0], sizes = [1, 16], strides = [1, 1]} : vector<9x16xf32> to vector<1x16xf32>
    %65 = vector.shape_cast %64 : vector<1x16xf32> to vector<1x1x16xf32>
    %66 = vector.broadcast %65 : vector<1x1x16xf32> to vector<16x16x16xf32>
    %67 = arith.mulf %63, %66 : vector<16x16x16xf32>
    %68 = arith.addf %62, %67 : vector<16x16x16xf32>
    %c2_50 = arith.constant 2 : index
    %c2_51 = arith.constant 2 : index
    %c0_52 = arith.constant 0 : index
    %69 = vector.load %arg16[%c2_50, %c2_51, %c0_52] : memref<18x18x16xf32, #tpu.memory_space<vmem>>, vector<16x16x16xf32>
    %70 = vector.extract_strided_slice %21 {offsets = [8, 0], sizes = [1, 16], strides = [1, 1]} : vector<9x16xf32> to vector<1x16xf32>
    %71 = vector.shape_cast %70 : vector<1x16xf32> to vector<1x1x16xf32>
    %72 = vector.broadcast %71 : vector<1x1x16xf32> to vector<16x16x16xf32>
    %73 = arith.mulf %69, %72 : vector<16x16x16xf32>
    %74 = arith.addf %68, %73 : vector<16x16x16xf32>
    %c0_53 = arith.constant 0 : index
    %c0_54 = arith.constant 0 : index
    %75 = vector.load %arg5[%c0_53, %c0_54] : memref<1x16xf32, #tpu.memory_space<vmem>>, vector<1x16xf32>
    %76 = vector.shape_cast %75 : vector<1x16xf32> to vector<1x1x16xf32>
    %77 = vector.broadcast %76 : vector<1x1x16xf32> to vector<16x16x16xf32>
    %78 = arith.addf %74, %77 : vector<16x16x16xf32>
    %cst_55 = arith.constant 0.000000e+00 : f32
    %cst_56 = arith.constant 6.000000e+00 : f32
    %79 = vector.broadcast %cst_55 : f32 to vector<16x16x16xf32>
    %80 = arith.maximumf %79, %78 : vector<16x16x16xf32>
    %81 = vector.broadcast %cst_56 : f32 to vector<16x16x16xf32>
    %82 = arith.minimumf %81, %80 : vector<16x16x16xf32>
    %83 = vector.shape_cast %82 : vector<16x16x16xf32> to vector<256x16xf32>
    %84 = arith.truncf %83 : vector<256x16xf32> to vector<256x16xbf16>
    %c0_57 = arith.constant 0 : index
    %c0_58 = arith.constant 0 : index
    %85 = vector.load %arg6[%c0_57, %c0_58] : memref<16x32xbf16, #tpu.memory_space<vmem>>, vector<16x32xbf16>
    %cst_59 = arith.constant dense<0.000000e+00> : vector<256x32xf32>
    %86 = tpu.matmul %84, %85, %cst_59 {dimension_numbers = #tpu.dot_dimension_numbers<[1], [0], [0], [1], [0, 0, 1, 1], [], []>} : vector<256x16xbf16>, vector<16x32xbf16>, vector<256x32xf32> -> vector<256x32xf32>
    %c0_60 = arith.constant 0 : index
    %c0_61 = arith.constant 0 : index
    %87 = vector.load %arg7[%c0_60, %c0_61] : memref<1x32xf32, #tpu.memory_space<vmem>>, vector<1x32xf32>
    %88 = vector.broadcast %87 : vector<1x32xf32> to vector<256x32xf32>
    %89 = arith.addf %86, %88 : vector<256x32xf32>
    %cst_62 = arith.constant 0.000000e+00 : f32
    %cst_63 = arith.constant 6.000000e+00 : f32
    %90 = vector.broadcast %cst_62 : f32 to vector<256x32xf32>
    %91 = arith.maximumf %90, %89 : vector<256x32xf32>
    %92 = vector.broadcast %cst_63 : f32 to vector<256x32xf32>
    %93 = arith.minimumf %92, %91 : vector<256x32xf32>
    %c0_64 = arith.constant 0 : index
    %c0_65 = arith.constant 0 : index
    %94 = vector.load %arg8[%c0_64, %c0_65] : memref<576x256xbf16, #tpu.memory_space<vmem>>, vector<576x256xbf16>
    %95 = arith.truncf %93 : vector<256x32xf32> to vector<256x32xbf16>
    %cst_66 = arith.constant dense<0.000000e+00> : vector<576x32xf32>
    %96 = tpu.matmul %94, %95, %cst_66 {dimension_numbers = #tpu.dot_dimension_numbers<[1], [0], [0], [1], [0, 0, 1, 1], [], []>} : vector<576x256xbf16>, vector<256x32xbf16>, vector<576x32xf32> -> vector<576x32xf32>
    %97 = vector.shape_cast %96 : vector<576x32xf32> to vector<9x64x32xf32>
    %c0_67 = arith.constant 0 : index
    %c0_68 = arith.constant 0 : index
    %c0_69 = arith.constant 0 : index
    %98 = vector.load %arg9[%c0_67, %c0_68, %c0_69] : memref<9x1x32xf32, #tpu.memory_space<vmem>>, vector<9x1x32xf32>
    %99 = vector.extract_strided_slice %97 {offsets = [0, 0, 0], sizes = [1, 64, 32], strides = [1, 1, 1]} : vector<9x64x32xf32> to vector<1x64x32xf32>
    %100 = vector.shape_cast %99 : vector<1x64x32xf32> to vector<64x32xf32>
    %101 = vector.extract_strided_slice %98 {offsets = [0, 0, 0], sizes = [1, 1, 32], strides = [1, 1, 1]} : vector<9x1x32xf32> to vector<1x1x32xf32>
    %102 = vector.shape_cast %101 : vector<1x1x32xf32> to vector<1x32xf32>
    %103 = vector.broadcast %102 : vector<1x32xf32> to vector<64x32xf32>
    %104 = arith.mulf %100, %103 : vector<64x32xf32>
    %105 = vector.extract_strided_slice %97 {offsets = [1, 0, 0], sizes = [1, 64, 32], strides = [1, 1, 1]} : vector<9x64x32xf32> to vector<1x64x32xf32>
    %106 = vector.shape_cast %105 : vector<1x64x32xf32> to vector<64x32xf32>
    %107 = vector.extract_strided_slice %98 {offsets = [1, 0, 0], sizes = [1, 1, 32], strides = [1, 1, 1]} : vector<9x1x32xf32> to vector<1x1x32xf32>
    %108 = vector.shape_cast %107 : vector<1x1x32xf32> to vector<1x32xf32>
    %109 = vector.broadcast %108 : vector<1x32xf32> to vector<64x32xf32>
    %110 = arith.mulf %106, %109 : vector<64x32xf32>
    %111 = arith.addf %104, %110 : vector<64x32xf32>
    %112 = vector.extract_strided_slice %97 {offsets = [2, 0, 0], sizes = [1, 64, 32], strides = [1, 1, 1]} : vector<9x64x32xf32> to vector<1x64x32xf32>
    %113 = vector.shape_cast %112 : vector<1x64x32xf32> to vector<64x32xf32>
    %114 = vector.extract_strided_slice %98 {offsets = [2, 0, 0], sizes = [1, 1, 32], strides = [1, 1, 1]} : vector<9x1x32xf32> to vector<1x1x32xf32>
    %115 = vector.shape_cast %114 : vector<1x1x32xf32> to vector<1x32xf32>
    %116 = vector.broadcast %115 : vector<1x32xf32> to vector<64x32xf32>
    %117 = arith.mulf %113, %116 : vector<64x32xf32>
    %118 = arith.addf %111, %117 : vector<64x32xf32>
    %119 = vector.extract_strided_slice %97 {offsets = [3, 0, 0], sizes = [1, 64, 32], strides = [1, 1, 1]} : vector<9x64x32xf32> to vector<1x64x32xf32>
    %120 = vector.shape_cast %119 : vector<1x64x32xf32> to vector<64x32xf32>
    %121 = vector.extract_strided_slice %98 {offsets = [3, 0, 0], sizes = [1, 1, 32], strides = [1, 1, 1]} : vector<9x1x32xf32> to vector<1x1x32xf32>
    %122 = vector.shape_cast %121 : vector<1x1x32xf32> to vector<1x32xf32>
    %123 = vector.broadcast %122 : vector<1x32xf32> to vector<64x32xf32>
    %124 = arith.mulf %120, %123 : vector<64x32xf32>
    %125 = arith.addf %118, %124 : vector<64x32xf32>
    %126 = vector.extract_strided_slice %97 {offsets = [4, 0, 0], sizes = [1, 64, 32], strides = [1, 1, 1]} : vector<9x64x32xf32> to vector<1x64x32xf32>
    %127 = vector.shape_cast %126 : vector<1x64x32xf32> to vector<64x32xf32>
    %128 = vector.extract_strided_slice %98 {offsets = [4, 0, 0], sizes = [1, 1, 32], strides = [1, 1, 1]} : vector<9x1x32xf32> to vector<1x1x32xf32>
    %129 = vector.shape_cast %128 : vector<1x1x32xf32> to vector<1x32xf32>
    %130 = vector.broadcast %129 : vector<1x32xf32> to vector<64x32xf32>
    %131 = arith.mulf %127, %130 : vector<64x32xf32>
    %132 = arith.addf %125, %131 : vector<64x32xf32>
    %133 = vector.extract_strided_slice %97 {offsets = [5, 0, 0], sizes = [1, 64, 32], strides = [1, 1, 1]} : vector<9x64x32xf32> to vector<1x64x32xf32>
    %134 = vector.shape_cast %133 : vector<1x64x32xf32> to vector<64x32xf32>
    %135 = vector.extract_strided_slice %98 {offsets = [5, 0, 0], sizes = [1, 1, 32], strides = [1, 1, 1]} : vector<9x1x32xf32> to vector<1x1x32xf32>
    %136 = vector.shape_cast %135 : vector<1x1x32xf32> to vector<1x32xf32>
    %137 = vector.broadcast %136 : vector<1x32xf32> to vector<64x32xf32>
    %138 = arith.mulf %134, %137 : vector<64x32xf32>
    %139 = arith.addf %132, %138 : vector<64x32xf32>
    %140 = vector.extract_strided_slice %97 {offsets = [6, 0, 0], sizes = [1, 64, 32], strides = [1, 1, 1]} : vector<9x64x32xf32> to vector<1x64x32xf32>
    %141 = vector.shape_cast %140 : vector<1x64x32xf32> to vector<64x32xf32>
    %142 = vector.extract_strided_slice %98 {offsets = [6, 0, 0], sizes = [1, 1, 32], strides = [1, 1, 1]} : vector<9x1x32xf32> to vector<1x1x32xf32>
    %143 = vector.shape_cast %142 : vector<1x1x32xf32> to vector<1x32xf32>
    %144 = vector.broadcast %143 : vector<1x32xf32> to vector<64x32xf32>
    %145 = arith.mulf %141, %144 : vector<64x32xf32>
    %146 = arith.addf %139, %145 : vector<64x32xf32>
    %147 = vector.extract_strided_slice %97 {offsets = [7, 0, 0], sizes = [1, 64, 32], strides = [1, 1, 1]} : vector<9x64x32xf32> to vector<1x64x32xf32>
    %148 = vector.shape_cast %147 : vector<1x64x32xf32> to vector<64x32xf32>
    %149 = vector.extract_strided_slice %98 {offsets = [7, 0, 0], sizes = [1, 1, 32], strides = [1, 1, 1]} : vector<9x1x32xf32> to vector<1x1x32xf32>
    %150 = vector.shape_cast %149 : vector<1x1x32xf32> to vector<1x32xf32>
    %151 = vector.broadcast %150 : vector<1x32xf32> to vector<64x32xf32>
    %152 = arith.mulf %148, %151 : vector<64x32xf32>
    %153 = arith.addf %146, %152 : vector<64x32xf32>
    %154 = vector.extract_strided_slice %97 {offsets = [8, 0, 0], sizes = [1, 64, 32], strides = [1, 1, 1]} : vector<9x64x32xf32> to vector<1x64x32xf32>
    %155 = vector.shape_cast %154 : vector<1x64x32xf32> to vector<64x32xf32>
    %156 = vector.extract_strided_slice %98 {offsets = [8, 0, 0], sizes = [1, 1, 32], strides = [1, 1, 1]} : vector<9x1x32xf32> to vector<1x1x32xf32>
    %157 = vector.shape_cast %156 : vector<1x1x32xf32> to vector<1x32xf32>
    %158 = vector.broadcast %157 : vector<1x32xf32> to vector<64x32xf32>
    %159 = arith.mulf %155, %158 : vector<64x32xf32>
    %160 = arith.addf %153, %159 : vector<64x32xf32>
    %c0_70 = arith.constant 0 : index
    %c0_71 = arith.constant 0 : index
    %161 = vector.load %arg10[%c0_70, %c0_71] : memref<1x32xf32, #tpu.memory_space<vmem>>, vector<1x32xf32>
    %162 = vector.broadcast %161 : vector<1x32xf32> to vector<64x32xf32>
    %163 = arith.addf %160, %162 : vector<64x32xf32>
    %cst_72 = arith.constant 0.000000e+00 : f32
    %cst_73 = arith.constant 6.000000e+00 : f32
    %164 = vector.broadcast %cst_72 : f32 to vector<64x32xf32>
    %165 = arith.maximumf %164, %163 : vector<64x32xf32>
    %166 = vector.broadcast %cst_73 : f32 to vector<64x32xf32>
    %167 = arith.minimumf %166, %165 : vector<64x32xf32>
    %168 = arith.truncf %167 : vector<64x32xf32> to vector<64x32xbf16>
    %c0_74 = arith.constant 0 : index
    %c0_75 = arith.constant 0 : index
    %169 = vector.load %arg11[%c0_74, %c0_75] : memref<32x64xbf16, #tpu.memory_space<vmem>>, vector<32x64xbf16>
    %cst_76 = arith.constant dense<0.000000e+00> : vector<64x64xf32>
    %170 = tpu.matmul %168, %169, %cst_76 {dimension_numbers = #tpu.dot_dimension_numbers<[1], [0], [0], [1], [0, 0, 1, 1], [], []>} : vector<64x32xbf16>, vector<32x64xbf16>, vector<64x64xf32> -> vector<64x64xf32>
    %c0_77 = arith.constant 0 : index
    %c0_78 = arith.constant 0 : index
    %171 = vector.load %arg12[%c0_77, %c0_78] : memref<1x64xf32, #tpu.memory_space<vmem>>, vector<1x64xf32>
    %172 = vector.broadcast %171 : vector<1x64xf32> to vector<64x64xf32>
    %173 = arith.addf %170, %172 : vector<64x64xf32>
    %cst_79 = arith.constant 0.000000e+00 : f32
    %cst_80 = arith.constant 6.000000e+00 : f32
    %174 = vector.broadcast %cst_79 : f32 to vector<64x64xf32>
    %175 = arith.maximumf %174, %173 : vector<64x64xf32>
    %176 = vector.broadcast %cst_80 : f32 to vector<64x64xf32>
    %177 = arith.minimumf %176, %175 : vector<64x64xf32>
    %cst_81 = arith.constant dense<0.000000e+00> : vector<64xf32>
    %178 = vector.multi_reduction <add>, %177, %cst_81 [0] : vector<64x64xf32> to vector<64xf32>
    %179 = vector.shape_cast %178 : vector<64xf32> to vector<1x64xf32>
    %cst_82 = arith.constant 6.400000e+01 : f32
    %180 = vector.broadcast %cst_82 : f32 to vector<1x64xf32>
    %181 = arith.divf %179, %180 : vector<1x64xf32>
    %c0_83 = arith.constant 0 : index
    %c0_84 = arith.constant 0 : index
    %182 = vector.load %arg13[%c0_83, %c0_84] : memref<64x2xf32, #tpu.memory_space<vmem>>, vector<64x2xf32>
    %cst_85 = arith.constant dense<0.000000e+00> : vector<1x2xf32>
    %183 = tpu.matmul %181, %182, %cst_85 {dimension_numbers = #tpu.dot_dimension_numbers<[1], [0], [0], [1], [0, 0, 1, 1], [], []>} : vector<1x64xf32>, vector<64x2xf32>, vector<1x2xf32> -> vector<1x2xf32>
    %c0_86 = arith.constant 0 : index
    %c0_87 = arith.constant 0 : index
    %184 = vector.load %arg14[%c0_86, %c0_87] : memref<1x2xf32, #tpu.memory_space<vmem>>, vector<1x2xf32>
    %185 = arith.addf %183, %184 : vector<1x2xf32>
    %186 = vector.shape_cast %185 : vector<1x2xf32> to vector<1x1x2xf32>
    %c0_88 = arith.constant 0 : index
    %c0_89 = arith.constant 0 : index
    %c0_90 = arith.constant 0 : index
    %187 = vector.load %arg15[%c0_88, %c0_89, %c0_90] : memref<1x1x2xf32, #tpu.memory_space<vmem>>, vector<1x1x2xf32>
    tpu.vector_store %arg15[%c0_88, %c0_89, %c0_90], %186 {strides = array<i32>} : memref<1x1x2xf32, #tpu.memory_space<vmem>>, vector<1x1x2xf32>,
    return
  }
  func.func @transform_0(%arg0: i32) -> (i32, i32, i32) {
    %c0_i32 = arith.constant 0 : i32
    %c0_i32_0 = arith.constant 0 : i32
    %c0_i32_1 = arith.constant 0 : i32
    return %arg0, %c0_i32, %c0_i32_0 : i32, i32, i32
  }
  func.func @transform_1(%arg0: i32) -> (i32, i32) {
    %c0_i32 = arith.constant 0 : i32
    %c0_i32_0 = arith.constant 0 : i32
    %c0_i32_1 = arith.constant 0 : i32
    return %c0_i32, %c0_i32_0 : i32, i32
  }
  func.func @transform_2(%arg0: i32) -> (i32, i32) {
    %c0_i32 = arith.constant 0 : i32
    %c0_i32_0 = arith.constant 0 : i32
    %c0_i32_1 = arith.constant 0 : i32
    return %c0_i32, %c0_i32_0 : i32, i32
  }
  func.func @transform_3(%arg0: i32) -> (i32, i32) {
    %c0_i32 = arith.constant 0 : i32
    %c0_i32_0 = arith.constant 0 : i32
    %c0_i32_1 = arith.constant 0 : i32
    return %c0_i32, %c0_i32_0 : i32, i32
  }
  func.func @transform_4(%arg0: i32) -> (i32, i32) {
    %c0_i32 = arith.constant 0 : i32
    %c0_i32_0 = arith.constant 0 : i32
    %c0_i32_1 = arith.constant 0 : i32
    return %c0_i32, %c0_i32_0 : i32, i32
  }
  func.func @transform_5(%arg0: i32) -> (i32, i32) {
    %c0_i32 = arith.constant 0 : i32
    %c0_i32_0 = arith.constant 0 : i32
    %c0_i32_1 = arith.constant 0 : i32
    return %c0_i32, %c0_i32_0 : i32, i32
  }
  func.func @transform_6(%arg0: i32) -> (i32, i32) {
    %c0_i32 = arith.constant 0 : i32
    %c0_i32_0 = arith.constant 0 : i32
    %c0_i32_1 = arith.constant 0 : i32
    return %c0_i32, %c0_i32_0 : i32, i32
  }
  func.func @transform_7(%arg0: i32) -> (i32, i32) {
    %c0_i32 = arith.constant 0 : i32
    %c0_i32_0 = arith.constant 0 : i32
    %c0_i32_1 = arith.constant 0 : i32
    return %c0_i32, %c0_i32_0 : i32, i32
  }
  func.func @transform_8(%arg0: i32) -> (i32, i32, i32) {
    %c0_i32 = arith.constant 0 : i32
    %c0_i32_0 = arith.constant 0 : i32
    %c0_i32_1 = arith.constant 0 : i32
    %c0_i32_2 = arith.constant 0 : i32
    return %c0_i32, %c0_i32_0, %c0_i32_1 : i32, i32, i32
  }
  func.func @transform_9(%arg0: i32) -> (i32, i32) {
    %c0_i32 = arith.constant 0 : i32
    %c0_i32_0 = arith.constant 0 : i32
    %c0_i32_1 = arith.constant 0 : i32
    return %c0_i32, %c0_i32_0 : i32, i32
  }
  func.func @transform_10(%arg0: i32) -> (i32, i32) {
    %c0_i32 = arith.constant 0 : i32
    %c0_i32_0 = arith.constant 0 : i32
    %c0_i32_1 = arith.constant 0 : i32
    return %c0_i32, %c0_i32_0 : i32, i32
  }
  func.func @transform_11(%arg0: i32) -> (i32, i32) {
    %c0_i32 = arith.constant 0 : i32
    %c0_i32_0 = arith.constant 0 : i32
    %c0_i32_1 = arith.constant 0 : i32
    return %c0_i32, %c0_i32_0 : i32, i32
  }
  func.func @transform_12(%arg0: i32) -> (i32, i32) {
    %c0_i32 = arith.constant 0 : i32
    %c0_i32_0 = arith.constant 0 : i32
    %c0_i32_1 = arith.constant 0 : i32
    return %c0_i32, %c0_i32_0 : i32, i32
  }
  func.func @transform_13(%arg0: i32) -> (i32, i32) {
    %c0_i32 = arith.constant 0 : i32
    %c0_i32_0 = arith.constant 0 : i32
    %c0_i32_1 = arith.constant 0 : i32
    return %c0_i32, %c0_i32_0 : i32, i32
  }
  func.func @transform_14(%arg0: i32) -> (i32, i32, i32) {
    %c0_i32 = arith.constant 0 : i32
    %c0_i32_0 = arith.constant 0 : i32
    %c0_i32_1 = arith.constant 0 : i32
    return %arg0, %c0_i32, %c0_i32_0 : i32, i32, i32
  }
}

</mosaic_0001>

<bundles_post_ra>
// kernel: mobilenet_forward.1
= control target key start
LH: loop header
LB: loop body
LE: loop exit
PB: predicated region body
PF: predicated region fallthrough
CT: control target
= control target key end

     0   :  { %s5806_s0 = inlined_call_operand.vmem [shape: bf16[2,256,32], index: 0, kind: input, shape index: {}]   ;;  %s5807_s1 = inlined_call_operand.vmem [shape: bf16[32,16], index: 1, kind: input, shape index: {}]   ;;  %s5808_s2 = inlined_call_operand.vmem [shape: f32[1,16], index: 2, kind: input, shape index: {}]   ;;  %s5809_s3 = inlined_call_operand.vmem [shape: f32[9,16], index: 3, kind: input, shape index: {}]   ;;  %s5810_s4 = inlined_call_operand.vmem [shape: f32[1,16], index: 4, kind: input, shape index: {}]   ;;  %s5811_s5 = inlined_call_operand.vmem [shape: bf16[16,32], index: 5, kind: input, shape index: {}]   ;;  %s5812_s6 = inlined_call_operand.vmem [shape: f32[1,32], index: 6, kind: input, shape index: {}]   ;;  %s5813_s7 = inlined_call_operand.vmem [shape: bf16[576,256], index: 7, kind: input, shape index: {}]   ;;  %s5814_s8 = inlined_call_operand.vmem [shape: f32[9,1,32], index: 8, kind: input, shape index: {}]   ;;  %s5815_s9 = inlined_call_operand.vmem [shape: f32[1,32], index: 9, kind: input, shape index: {}]   ;;  %s5816_s10 = inlined_call_operand.vmem [shape: bf16[32,64], index: 10, kind: input, shape index: {}]   ;;  %s5817_s11 = inlined_call_operand.vmem [shape: f32[1,64], index: 11, kind: input, shape index: {}]   ;;  %s5818_s12 = inlined_call_operand.vmem [shape: f32[64,2], index: 12, kind: input, shape index: {}]   ;;  %s5819_s13 = inlined_call_operand.vmem [shape: f32[1,2], index: 13, kind: input, shape index: {}]   ;;  %s5820_s14 = inlined_call_operand.hbm [shape: f32[2,1,2], index: 14, kind: output, shape index: {}]  }
   0x1   :  { %5822 = sst [smem:[#allocation8_spill]] %s5806_s0 }
   0x2   :  { %5823 = sst [smem:[#allocation9_spill]] %s5807_s1 }
   0x3   :  { %19 = vsyncpa [#allocation4], 0 }
   0x4   :  { %21 = vsyncpa [#allocation4 + $0x1], 0  ;;  %s4195_s29 = smov 0   ;;  %s4197_s30 = smov 0  }
   0x5   :  { %s4199_s15 = smov 0   ;;  %s4201_s16 = smov 0  }
   0x6 LB: > { %5824 = sst [smem:[#allocation6_spill]] %s4109_s15  ;;  %s4216_s17 = sadd.s32 4294967295, %s4113_s16   ;;  %s4113_s16 = sphi %s4201_s16, %s5834_s16   ;;  %s4109_s15 = sphi %s4199_s15, %s5831_s15   ;;  %s4105_s30 = sphi %s4197_s30, %s5833_s30   ;;  %s4101_s29 = sphi %s4195_s29, %s5832_s29  }
   0x7   : > { %s3527_s18 = sadd.s32 4294967294, %s4113_s16   ;;  %s4220_s19 = sadd.s32 1, %s4113_s16  }
   0x8   : > { %s333_s20 = sadd.s32 1, %s4109_s15  ;;  %s330_s21 = ssub.s32 %s4113_s16, %s4220_s19 }
   0x9   : > { %p343_p0 = scmp.ne.s32.totalorder %s4109_s15, %s4105_s30  ;;  %p331_p1 = scmp.eq.s32.totalorder %s330_s21, 0 }
   0xa   : > { %p344_p2 = scmp.eq.s32.totalorder %s4216_s17, 1  ;;  %p349_p3 = scmp.ne.s32.totalorder %s4105_s30, %s4101_s29 }
   0xb   : > { %p350_p4 = scmp.eq.s32.totalorder %s3527_s18, 1  ;;  %p3530_p7 = scmp.ge.s32.totalorder %s4113_s16, 1 }
   0xc   : > { %s4231_s22 = scalar_select %p331_p1, %s4109_s15, %s333_s20  }
   0xd   : > { %p4233_p5 = por %p344_p2, %p343_p0  ;;  %p4237_p6 = por %p350_p4, %p349_p3 }
   0xe   : > { %5825 = sst [smem:[#allocation7_spill]] %s4231_s22  ;;  %p415_p8 = scmp.lt.s32.totalorder %s4113_s16, 3 }
  0x10   : > { %p416_p9 = pnand %p3530_p7, %p415_p8 }
  0x11   : > { %s5828_s1 = sld [smem:[#allocation9_spill]] (!%p416_p9)  ;;  %p460_p10 = scmp.lt.s32.totalorder (!%p416_p9), %s4216_s17, 1  ;;  %vm601_vm0 = vcmask (!%p416_p9), 261120   ;;  %vm875_vm1 = vcmask (!%p416_p9), 130048   ;;  %v4115_v18 = vmov (!%p416_p9), 0.0   ;;  %vm884_vm2 = vcmask (!%p416_p9), 122880  }
  0x12   : > { %419 = sbr.rel (%p416_p9) target bundleno = 1529 (0x5f9), region = 76  ;;  %s5829_s0 = sld [smem:[#allocation8_spill]] (!%p416_p9)  ;;  %876 = vst.msk [vmem:[#allocation2] sm:$0xff] (!%p416_p9), %vm875_vm1, %v4115_v18  ;;  %877 = vst.msk [vmem:[#allocation2 + $0x8] sm:$0xff] (!%p416_p9), %vm875_vm1, %v4115_v18  ;;  %vm878_vm3 = vcmask (!%p416_p9), 123904   ;;  %v3938_v19 = vld [vmem:[%s5811_s5] sm:$0xff] (!%p416_p9)   ;;  %v988_v20 = vlaneseq (!%p416_p9) }
  0x13   : > { %881 = vst.msk [vmem:[#allocation2 + $0x198] sm:$0xff] (!%p416_p9), %vm875_vm1, %v4115_v18  ;;  %882 = vst.msk [vmem:[#allocation2 + $0x1a0] sm:$0xff] (!%p416_p9), %vm875_vm1, %v4115_v18  ;;  %3768 = vmatprep.subr.bf16.mxu1 (!%p416_p9), %v3938_v19  ;;  %v4379_v23 = vld [vmem:[%s5809_s3] sm:$0xff] (!%p416_p9)  ;;  %vm4118_vm4 = vmmov (!%p416_p9), 0   ;;  %vm3351_vm5 = vcmask (!%p416_p9), 523264   ;;  %vm3457_vm6 = vcmask (!%p416_p9), 8192  }
  0x14   : > { %885 = vst.msk [vmem:[#allocation2] sm:$0x1] (!%p416_p9), %vm884_vm2, %v4115_v18  ;;  %886 = vst.msk [vmem:[#allocation2 + $0x18] sm:$0x1] (!%p416_p9), %vm884_vm2, %v4115_v18  ;;  %3769 = vmatpush3.bf16.msra.mxu1 (!%p416_p9), %v3938_v19  ;;  %v4373_v21 = vshrl.u32 (!%p416_p9), %v988_v20, 7 }
  0x15   : > { %887 = vst.msk [vmem:[#allocation2 + $0x30] sm:$0x1] (!%p416_p9), %vm884_vm2, %v4115_v18  ;;  %904 = vst.msk [vmem:[#allocation2 + $0x29] sm:$0x1] (!%p416_p9), %vm884_vm2, %v4115_v18  ;;  %v4385_v25 = vld [vmem:[%s5808_s2] ss:$0 sm:$0xff] (!%p416_p9) }
  0x16   : > { %905 = vst.msk [vmem:[#allocation2 + $0x41] sm:$0x1] (!%p416_p9), %vm884_vm2, %v4115_v18  ;;  %888 = vst.msk [vmem:[#allocation2 + $0x48] sm:$0x1] (!%p416_p9), %vm884_vm2, %v4115_v18  ;;  %v990_v22 = vsub.s32 (!%p416_p9), 0, %v4373_v21  ;;  %v1058_v24 = vsub.s32 (!%p416_p9), 1, %v4373_v21 }
  0x17   : > { %v3920_v0 = vld [vmem:[%s5828_s1] sm:$0xff] (!%p416_p9)   ;;  %v3921_v1 = vld [vmem:[%s5828_s1 + $0x8] sm:$0xff] (!%p416_p9)   ;;  %889 = vst.msk [vmem:[#allocation2 + $0x60] sm:$0x1] (!%p416_p9), %vm884_vm2, %v4115_v18  ;;  %890 = vst.msk [vmem:[#allocation2 + $0x78] sm:$0x1] (!%p416_p9), %vm884_vm2, %v4115_v18 }
  0x18   : > { %3732 = vmatprep.subr.bf16.mxu0 (!%p416_p9), %v3920_v0  ;;  %891 = vst.msk [vmem:[#allocation2 + $0x90] sm:$0x1] (!%p416_p9), %vm884_vm2, %v4115_v18  ;;  %892 = vst.msk [vmem:[#allocation2 + $0xa8] sm:$0x1] (!%p416_p9), %vm884_vm2, %v4115_v18  ;;  %v4388_v27 = vrot.slane (!%p416_p9), %v4379_v23, %v990_v22  ;;  %v4392_v31 = vrot.slane (!%p416_p9), %v4379_v23, %v1058_v24  ;;  %v1158_v32 = vsub.s32 (!%p416_p9), 2, %v4373_v21  ;;  %v1258_v44 = vsub.s32 (!%p416_p9), 3, %v4373_v21 }
  0x19   : > { %s461_s18 = scalar_select %p460_p10, %s4216_s17, 1  ;;  %3733 = vmatpush3.bf16.msra.mxu0 %v3920_v0  ;;  %893 = vst.msk [vmem:[#allocation2 + $0xc0] sm:$0x1] %vm884_vm2, %v4115_v18  ;;  %894 = vst.msk [vmem:[#allocation2 + $0xd8] sm:$0x1] %vm884_vm2, %v4115_v18  ;;  %v1024_v35 = vld [vmem:[#allocation2 + $0x1] sm:$0xff] }
  0x1a   : > { %3734 = vmatprep.subr.bf16.mxu0 %v3921_v1  ;;  %895 = vst.msk [vmem:[#allocation2 + $0xf0] sm:$0x1] %vm884_vm2, %v4115_v18  ;;  %896 = vst.msk [vmem:[#allocation2 + $0x108] sm:$0x1] %vm884_vm2, %v4115_v18  ;;  %v957_v39 = vld [vmem:[#allocation2 + $0x8] sm:$0xff]  ;;  %v1060_v47 = vmul.f32 %v4392_v31, %v1024_v35  ;;  %v4402_v48 = vrot.slane %v4379_v23, %v1158_v32  ;;  %v1559_v56 = vsub.s32 6, %v4373_v21 }
  0x1b   : > { %s3681_s20 = sshll.u32 %s461_s18, 7  ;;  %897 = vst.msk [vmem:[#allocation2 + $0x120] sm:$0x1] %vm884_vm2, %v4115_v18  ;;  %898 = vst.msk [vmem:[#allocation2 + $0x138] sm:$0x1] %vm884_vm2, %v4115_v18  ;;  %v956_v30 = vld [vmem:[#allocation2] sm:$0xff]  ;;  %v993_v51 = vmul.f32 %v4388_v27, %v957_v39 }
  0x1c   : > { %s4254_s15 = scalar_lea.vmem %s5829_s0, %s3681_s20  ;;  %899 = vst.msk [vmem:[#allocation2 + $0x150] sm:$0x1] %vm884_vm2, %v4115_v18  ;;  %900 = vst.msk [vmem:[#allocation2 + $0x168] sm:$0x1] %vm884_vm2, %v4115_v18  ;;  %v992_v43 = vmul.f32 %v4388_v27, %v956_v30  ;;  %v1124_v53 = vld [vmem:[#allocation2 + $0x2] sm:$0xff]  ;;  %v1659_v57 = vsub.s32 7, %v4373_v21 }
  0x1d   : > { %v3922_v2 = vld [vmem:[%s4254_s15] sm:$0xff]   ;;  %3735 = vmatpush3.bf16.msra.mxu0 %v3921_v1  ;;  %v3923_v3 = vld [vmem:[%s4254_s15 + $0x8] sm:$0xff]   ;;  %v3924_v4 = vld [vmem:[%s4254_s15 + $0x10] sm:$0xff]   ;;  %901 = vst.msk [vmem:[#allocation2 + $0x180] sm:$0x1] %vm884_vm2, %v4115_v18  ;;  %v1358_v60 = vsub.s32 4, %v4373_v21  ;;  %v1160_v0 = vmul.f32 %v4402_v48, %v1124_v53  ;;  %v4415_v1 = vrot.slane %v4379_v23, %v1258_v44 }
  0x1e   : > { %3736 = vmatprep.mubr.msk.bf16.mxu0 %vm601_vm0, %v3922_v2  ;;  %v3925_v5 = vld [vmem:[%s4254_s15 + $0x18] sm:$0xff]   ;;  %v3926_v6 = vld [vmem:[%s4254_s15 + $0x20] sm:$0xff]   ;;  %v3927_v7 = vld [vmem:[%s4254_s15 + $0x28] sm:$0xff]   ;;  %906 = vst.msk [vmem:[#allocation2 + $0x59] sm:$0x1] %vm884_vm2, %v4115_v18  ;;  %v1092_v63 = vadd.f32 %v1060_v47, %v992_v43  ;;  %s458_s0 = sand.u32 1, %s4105_s30  }
  0x1f   : > { %v3928_v8 = vld [vmem:[%s4254_s15 + $0x30] sm:$0xff]   ;;  %v3929_v9 = vld [vmem:[%s4254_s15 + $0x38] sm:$0xff]   ;;  %v3930_v10 = vld [vmem:[%s4254_s15 + $0x40] sm:$0xff]   ;;  %907 = vst.msk [vmem:[#allocation2 + $0x71] sm:$0x1] %vm884_vm2, %v4115_v18  ;;  %s3678_s20 = sshll.u32 %s4216_s17, 4 }
  0x20   : > { %3737 = vmatmul.mubr.msk.bf16.vlgmr.msra.gmra.mrb[0].mxu0 %vm601_vm0, %v3923_v3  ;;  %v3931_v11 = vld [vmem:[%s4254_s15 + $0x48] sm:$0xff]   ;;  %v3932_v12 = vld [vmem:[%s4254_s15 + $0x50] sm:$0xff]   ;;  %v3933_v13 = vld [vmem:[%s4254_s15 + $0x58] sm:$0xff]   ;;  %908 = vst.msk [vmem:[#allocation2 + $0x89] sm:$0x1] %vm884_vm2, %v4115_v18  ;;  %s459_s21 = scalar_lea.vmem [#allocation3], %s458_s0  ;;  %s5764_s26 = scalar_lea.hbm %s5820_s14, %s3678_s20 }
  0x21   : > { %3740 = vmatprep.mubr.msk.bf16.mxu0 %vm601_vm0, %v3924_v4  ;;  %v3934_v14 = vld [vmem:[%s4254_s15 + $0x60] sm:$0xff]   ;;  %v3935_v15 = vld [vmem:[%s4254_s15 + $0x68] sm:$0xff]   ;;  %v3936_v16 = vld [vmem:[%s4254_s15 + $0x70] sm:$0xff]   ;;  %909 = vst.msk [vmem:[#allocation2 + $0xa1] sm:$0x1] %vm884_vm2, %v4115_v18  ;;  %s3460_s27 = scalar_lea.sflag [#allocation4], %s458_s0 }
  0x22   : > { %v3937_v17 = vld [vmem:[%s4254_s15 + $0x78] sm:$0xff]   ;;  %910 = vst.msk [vmem:[#allocation2 + $0xb9] sm:$0x1] %vm884_vm2, %v4115_v18  ;;  %911 = vst.msk [vmem:[#allocation2 + $0xd1] sm:$0x1] %vm884_vm2, %v4115_v18  ;;  %s3472_s15 = sshll.u32 %s459_s21, 4  ;;  %s5766_s15 = int_to_ptr.vmem [resolvable:$true] %s3472_s15 }
  0x23   : > { %912 = vst.msk [vmem:[#allocation2 + $0xe9] sm:$0x1] %vm884_vm2, %v4115_v18  ;;  %913 = vst.msk [vmem:[#allocation2 + $0x101] sm:$0x1] %vm884_vm2, %v4115_v18  ;;  %s4051_s28 = scalar_lea.vmem %s5766_s15, 16  ;;  %s4119_s17 = smov [#allocation3]  }
  0x24   : > { %914 = vst.msk [vmem:[#allocation2 + $0x119] sm:$0x1] %vm884_vm2, %v4115_v18  ;;  %915 = vst.msk [vmem:[#allocation2 + $0x131] sm:$0x1] %vm884_vm2, %v4115_v18  ;;  %p4052_p11 = scmp.ne.s32.totalorder %s5766_s15, %s4051_s28  ;;  %s4055_s18 = sshll.u32 %s4119_s17, 4  ;;  %s4056_s18 = int_to_ptr.vmem [resolvable:$false] %s4055_s18 }
  0x25   : > { %916 = vst.msk [vmem:[#allocation2 + $0x149] sm:$0x1] %vm884_vm2, %v4115_v18  ;;  %917 = vst.msk [vmem:[#allocation2 + $0x161] sm:$0x1] %vm884_vm2, %v4115_v18  ;;  %s4057_s1 = scalar_lea.vmem %s4056_s18, 32  ;;  %p4058_p0 = scmp.lt.s32.totalorder %s5766_s15, %s4056_s18 }
  0x26   : > { %918 = vst.msk [vmem:[#allocation2 + $0x179] sm:$0x1] %vm884_vm2, %v4115_v18  ;;  %919 = vst.msk [vmem:[#allocation2 + $0x191] sm:$0x1] %vm884_vm2, %v4115_v18  ;;  %p4053_p12 = pnand %p4052_p11, %p4233_p5  ;;  %p4059_p1 = scmp.lt.s32.totalorder %s4057_s1, %s4051_s28 }
  0x27   : > { %902 = vst.msk [vmem:[#allocation2 + $0x198] sm:$0x1] %vm884_vm2, %v4115_v18 }
  0x28   : > { %3741 = vmatmul.mubr.msk.bf16.gmra.mrb[4].mxu0 %vm601_vm0, %v3925_v5  ;;  %879 = vst.msk [vmem:[#allocation2 + $0x10] sm:$0x3] %vm878_vm3, %v4115_v18  ;;  %883 = vst.msk [vmem:[#allocation2 + $0x1a8] sm:$0x3] %vm878_vm3, %v4115_v18  ;;  %p4054_p13 = pneg %p4053_p12  ;;  %p4060_p2 = por %p4059_p1, %p4058_p0 }
  0x29   : > { %3744 = vmatprep.mubr.msk.bf16.mxu0 %vm601_vm0, %v3926_v6  ;;  %903 = vst.msk [vmem:[#allocation2 + $0x11] sm:$0x1] %vm884_vm2, %v4115_v18  ;;  %920 = vst.msk [vmem:[#allocation2 + $0x1a9] sm:$0x1] %vm884_vm2, %v4115_v18  ;;  %v1458_v6 = vsub.s32 5, %v4373_v21 }
  0x2a   : > { %v4435_v21 = vld [vmem:[%s5809_s3 + $0x8] ss:$0 sm:$0xff]  ;;  %p4061_p3 = pnand %p4060_p2, %p4054_p13 }
  0x2b   : > { %v4438_v24 = vrot.slane %v4379_v23, %v1458_v6 }
  0x2f   : > { %v1025_v40 = vld [vmem:[#allocation2 + $0x9] sm:$0xff] }
  0x30   : > { %3745 = vmatmul.mubr.msk.bf16.gmra.mrb[8].mxu0 %vm601_vm0, %v3927_v7  ;;  %v1061_v52 = vmul.f32 %v4392_v31, %v1025_v40  ;;  %v1125_v55 = vld [vmem:[#allocation2 + $0xa] sm:$0xff] }
  0x31   : > { %3748 = vmatprep.mubr.msk.bf16.mxu0 %vm601_vm0, %v3928_v8  ;;  %v1161_v5 = vmul.f32 %v4402_v48, %v1125_v55 }
  0x32   : > { %v1093_v4 = vadd.f32 %v1061_v52, %v993_v51 }
  0x34   : > { %v1193_v22 = vadd.f32 %v1161_v5, %v1093_v4 }
  0x38   : > { %3749 = vmatmul.mubr.msk.bf16.gmra.mrb[12].mxu0 %vm601_vm0, %v3929_v9 }
  0x39   : > { %3752 = vmatprep.mubr.msk.bf16.mxu0 %vm601_vm0, %v3930_v10  ;;  %v4423_v10 = vrot.slane %v4379_v23, %v1559_v56 }
  0x40   : > { %3753 = vmatmul.mubr.msk.bf16.gmra.mrb[16].mxu0 %vm601_vm0, %v3931_v11  ;;  %v4426_v11 = vrot.slane %v4379_v23, %v1659_v57 }
  0x41   : > { %3756 = vmatprep.mubr.msk.bf16.mxu0 %vm601_vm0, %v3932_v12 }
  0x48   : > { %3757 = vmatmul.mubr.msk.bf16.gmra.mrb[20].mxu0 %vm601_vm0, %v3933_v13 }
  0x49   : > { %3760 = vmatprep.mubr.msk.bf16.mxu0 %vm601_vm0, %v3934_v14  ;;  %v4430_v14 = vrot.slane %v4379_v23, %v1358_v60 }
  0x50   : > { %3761 = vmatmul.mubr.msk.bf16.gmra.mrb[24].mxu0 %vm601_vm0, %v3935_v15 }
  0x51   : > { %3764 = vmatprep.mubr.msk.bf16.mxu0 %vm601_vm0, %v3936_v16 }
  0x58   : > { %3765 = vmatmul.mubr.msk.bf16.gmra.mrb[28].mxu0 %vm601_vm0, %v3937_v17  ;;  %v1192_v17 = vadd.f32 %v1160_v0, %v1092_v63 }
  0xf3   : > { %v3738_v26 = vpop.f32.mrb[0].mxu0 }
  0xf4   : > { %v693_v28 = vadd.f32 %v3738_v26, %v4385_v25  ;;  %v684_v29 = vpop.f32.mrb[1].mxu0 }
  0xf5   : > { %v685_v33 = vadd.f32 %v4385_v25, %v684_v29  ;;  %v3739_v34 = vpop.f32.mrb[2].mxu0 }
  0xf6   : > { %v813_v36 = vmax.f32 %v693_v28, 0.0  ;;  %v696_v37 = vadd.f32 %v3739_v34, %v4385_v25  ;;  %v687_v38 = vpop.f32.mrb[3].mxu0 }
  0xf7   : > { %v811_v41 = vmax.f32 %v685_v33, 0.0  ;;  %v688_v42 = vadd.f32 %v4385_v25, %v687_v38 }
  0xf8   : > { %v845_v45 = vmin.f32 %v813_v36, 6.0  ;;  %v814_v46 = vmax.f32 %v696_v37, 0.0 }
  0xf9   : > { %v843_v49 = vmin.f32 %v811_v41, 6.0  ;;  %v812_v50 = vmax.f32 %v688_v42, 0.0 }
  0xfa   : > { %924 = vst.msk [vmem:[#allocation2 + $0x31] sm:$0xff] %vm875_vm1, %v845_v45  ;;  %v846_v54 = vmin.f32 %v814_v46, 6.0 }
  0xfb   : > { %922 = vst.msk [vmem:[#allocation2 + $0x19] sm:$0xff] %vm875_vm1, %v843_v49  ;;  %v844_v58 = vmin.f32 %v812_v50, 6.0  ;;  %v3742_v59 = vpop.f32.mrb[4].mxu0 }
  0xfc   : > { %925 = vst.msk [vmem:[#allocation2 + $0x39] sm:$0xff] %vm875_vm1, %v846_v54  ;;  %v709_v61 = vadd.f32 %v3742_v59, %v4385_v25  ;;  %v700_v62 = vpop.f32.mrb[5].mxu0 }
  0xfd   : > { %923 = vst.msk [vmem:[#allocation2 + $0x21] sm:$0xff] %vm875_vm1, %v844_v58  ;;  %v701_v2 = vadd.f32 %v4385_v25, %v700_v62  ;;  %v3743_v3 = vpop.f32.mrb[6].mxu0 }
  0xfe   : > { %v817_v7 = vmax.f32 %v709_v61, 0.0  ;;  %v712_v8 = vadd.f32 %v3743_v3, %v4385_v25  ;;  %v703_v9 = vpop.f32.mrb[7].mxu0 }
  0xff   : > { %v815_v12 = vmax.f32 %v701_v2, 0.0  ;;  %v704_v13 = vadd.f32 %v4385_v25, %v703_v9 }
 0x100   : > { %v849_v15 = vmin.f32 %v817_v7, 6.0  ;;  %v818_v16 = vmax.f32 %v712_v8, 0.0 }
 0x101   : > { %v847_v19 = vmin.f32 %v815_v12, 6.0  ;;  %v816_v20 = vmax.f32 %v704_v13, 0.0  ;;  %v4440_v26 = vld [vmem:[#allocation2 + $0x30] sm:$0xff] }
 0x102   : > { %v4442_v28 = vld [vmem:[#allocation2 + $0x31] sm:$0xff]  ;;  %928 = vst.msk [vmem:[#allocation2 + $0x61] sm:$0xff] %vm875_vm1, %v849_v15  ;;  %v850_v29 = vmin.f32 %v818_v16, 6.0  ;;  %v1324_v32 = vld [vmem:[#allocation2 + $0x19] sm:$0xff]  ;;  %v1561_v33 = vmul.f32 %v4423_v10, %v4440_v26  ;;  %v4453_v23 = vmul.f32 %v4440_v26, %v4415_v1 }
 0x103   : > { %v1224_v30 = vld [vmem:[#allocation2 + $0x18] sm:$0xff]  ;;  %v4449_v34 = vmul.f32 %v4426_v11, %v4442_v28  ;;  %926 = vst.msk [vmem:[#allocation2 + $0x49] sm:$0xff] %vm875_vm1, %v847_v19  ;;  %v848_v35 = vmin.f32 %v816_v20, 6.0  ;;  %v3746_v36 = vpop.f32.mrb[8].mxu0  ;;  %v1360_v38 = vmul.f32 %v4430_v14, %v1324_v32 }
 0x104   : > { %v1260_v37 = vmul.f32 %v4415_v1, %v1224_v30  ;;  %v4458_v39 = vld [vmem:[#allocation2 + $0x38] sm:$0xff]  ;;  %v994_v42 = vmul.f32 %v1224_v30, %v4388_v27  ;;  %929 = vst.msk [vmem:[#allocation2 + $0x69] sm:$0xff] %vm875_vm1, %v850_v29  ;;  %v725_v43 = vadd.f32 %v3746_v36, %v4385_v25  ;;  %v716_v44 = vpop.f32.mrb[9].mxu0  ;;  %v1225_v45 = vld [vmem:[#allocation2 + $0x20] sm:$0xff] }
 0x105   : > { %v4460_v40 = vld [vmem:[#allocation2 + $0x39] sm:$0xff]  ;;  %v1325_v46 = vld [vmem:[#allocation2 + $0x21] sm:$0xff]  ;;  %v1562_v49 = vmul.f32 %v4423_v10, %v4458_v39  ;;  %927 = vst.msk [vmem:[#allocation2 + $0x51] sm:$0xff] %vm875_vm1, %v848_v35  ;;  %v717_v52 = vadd.f32 %v4385_v25, %v716_v44  ;;  %v3747_v53 = vpop.f32.mrb[10].mxu0  ;;  %v1261_v54 = vmul.f32 %v4415_v1, %v1225_v45  ;;  %v995_v8 = vmul.f32 %v1225_v45, %v4388_v27 }
 0x106   : > { %v4462_v41 = vld [vmem:[#allocation2 + $0x32] sm:$0xff]  ;;  %v1424_v47 = vld [vmem:[#allocation2 + $0x1a] sm:$0xff]  ;;  %v1662_v50 = vmul.f32 %v4426_v11, %v4460_v40  ;;  %v1292_v55 = vadd.f32 %v1260_v37, %v1192_v17  ;;  %v1361_v56 = vmul.f32 %v4430_v14, %v1325_v46  ;;  %v1425_v57 = vld [vmem:[#allocation2 + $0x22] sm:$0xff]  ;;  %v821_v59 = vmax.f32 %v725_v43, 0.0  ;;  %v719_v61 = vpop.f32.mrb[11].mxu0 }
 0x107   : > { %v1761_v51 = vmul.f32 %v4435_v21, %v4462_v41  ;;  %v4477_v58 = vld [vmem:[#allocation2 + $0x3a] sm:$0xff]  ;;  %v728_v60 = vadd.f32 %v3747_v53, %v4385_v25  ;;  %v1460_v62 = vmul.f32 %v4438_v24, %v1424_v47  ;;  %v1461_v63 = vmul.f32 %v4438_v24, %v1425_v57 }
 0x108   : > { %v819_v0 = vmax.f32 %v717_v52, 0.0  ;;  %v720_v2 = vadd.f32 %v4385_v25, %v719_v61  ;;  %v1293_v3 = vadd.f32 %v1261_v54, %v1193_v22  ;;  %v1392_v4 = vadd.f32 %v1360_v38, %v1292_v55 }
 0x109   : > { %v853_v5 = vmin.f32 %v821_v59, 6.0  ;;  %v822_v6 = vmax.f32 %v728_v60, 0.0  ;;  %v1762_v7 = vmul.f32 %v4435_v21, %v4477_v58  ;;  %v1062_v17 = vmul.f32 %v1324_v32, %v4392_v31 }
 0x10a   : > { %v851_v9 = vmin.f32 %v819_v0, 6.0  ;;  %v820_v12 = vmax.f32 %v720_v2, 0.0  ;;  %v1393_v13 = vadd.f32 %v1361_v56, %v1293_v3  ;;  %v1492_v15 = vadd.f32 %v1460_v62, %v1392_v4 }
 0x10b   : > { %932 = vst.msk [vmem:[#allocation2 + $0x91] sm:$0xff] %vm875_vm1, %v853_v5  ;;  %v854_v16 = vmin.f32 %v822_v6, 6.0  ;;  %v1063_v19 = vmul.f32 %v1325_v46, %v4392_v31  ;;  %v1162_v20 = vmul.f32 %v1424_v47, %v4402_v48  ;;  %v3750_v29 = vpop.f32.mrb[12].mxu0  ;;  %v1163_v36 = vmul.f32 %v1425_v57, %v4402_v48  ;;  %v4510_v6 = vld [vmem:[#allocation2 + $0x48] sm:$0xff] }
 0x10c   : > { %930 = vst.msk [vmem:[#allocation2 + $0x79] sm:$0xff] %vm875_vm1, %v851_v9  ;;  %v852_v22 = vmin.f32 %v820_v12, 6.0  ;;  %v1493_v30 = vadd.f32 %v1461_v63, %v1393_v13  ;;  %v1593_v35 = vadd.f32 %v1561_v33, %v1492_v15  ;;  %v741_v37 = vadd.f32 %v3750_v29, %v4385_v25  ;;  %v732_v38 = vpop.f32.mrb[13].mxu0  ;;  %v4517_v12 = vld [vmem:[#allocation2 + $0x50] sm:$0xff] }
 0x10d   : > { %933 = vst.msk [vmem:[#allocation2 + $0x99] sm:$0xff] %vm875_vm1, %v854_v16  ;;  %v1094_v43 = vadd.f32 %v1062_v17, %v994_v42  ;;  %v1095_v44 = vadd.f32 %v1063_v19, %v995_v8  ;;  %v1263_v32 = vmul.f32 %v4458_v39, %v4415_v1  ;;  %v733_v45 = vadd.f32 %v4385_v25, %v732_v38  ;;  %v3751_v46 = vpop.f32.mrb[14].mxu0  ;;  %v4505_v42 = vld [vmem:[%s5810_s4] ss:$0 sm:$0xff] }
 0x10e   : > { %931 = vst.msk [vmem:[#allocation2 + $0x81] sm:$0xff] %vm875_vm1, %v852_v22  ;;  %v1594_v47 = vadd.f32 %v1562_v49, %v1493_v30  ;;  %v1693_v33 = vadd.f32 %v4449_v34, %v1593_v35  ;;  %v1362_v52 = vmul.f32 %v4442_v28, %v4430_v14  ;;  %v825_v53 = vmax.f32 %v741_v37, 0.0  ;;  %v735_v55 = vpop.f32.mrb[15].mxu0  ;;  %v4527_v30 = vld [vmem:[#allocation2 + $0x49] sm:$0xff] }
 0x10f   : > { %v744_v54 = vadd.f32 %v3751_v46, %v4385_v25  ;;  %v1194_v56 = vadd.f32 %v1162_v20, %v1094_v43  ;;  %v1195_v57 = vadd.f32 %v1163_v36, %v1095_v44  ;;  %v823_v59 = vmax.f32 %v733_v45, 0.0  ;;  %v4533_v44 = vld [vmem:[#allocation2 + $0x51] sm:$0xff] }
 0x110   : > { %v736_v60 = vadd.f32 %v4385_v25, %v735_v55  ;;  %v1694_v49 = vadd.f32 %v1662_v50, %v1594_v47  ;;  %v1793_v61 = vadd.f32 %v1761_v51, %v1693_v33  ;;  %v857_v34 = vmin.f32 %v825_v53, 6.0 }
 0x111   : > { %v826_v62 = vmax.f32 %v744_v54, 0.0  ;;  %v1294_v63 = vadd.f32 %v4453_v23, %v1194_v56  ;;  %v1295_v0 = vadd.f32 %v1263_v32, %v1195_v57  ;;  %v855_v2 = vmin.f32 %v823_v59, 6.0  ;;  %v4539_v56 = vld [vmem:[#allocation2 + $0x4a] sm:$0xff]  ;;  %v4541_v57 = vld [vmem:[#allocation2 + $0x52] sm:$0xff] }
 0x112   : > { %v824_v3 = vmax.f32 %v736_v60, 0.0  ;;  %v1794_v4 = vadd.f32 %v1762_v7, %v1694_v49  ;;  %v1832_v5 = vadd.f32 %v4505_v42, %v1793_v61  ;;  %936 = vst.msk [vmem:[#allocation2 + $0xc1] sm:$0xff] %vm875_vm1, %v857_v34  ;;  %v1363_v9 = vmul.f32 %v4460_v40, %v4430_v14 }
 0x113   : > { %v858_v8 = vmin.f32 %v826_v62, 6.0  ;;  %v1394_v50 = vadd.f32 %v1362_v52, %v1294_v63  ;;  %v1462_v51 = vmul.f32 %v4462_v41, %v4438_v24  ;;  %934 = vst.msk [vmem:[#allocation2 + $0xa9] sm:$0xff] %vm875_vm1, %v855_v2  ;;  %v3754_v7 = vpop.f32.mrb[16].mxu0  ;;  %v1463_v16 = vmul.f32 %v4477_v58, %v4438_v24 }
 0x114   : > { %v856_v23 = vmin.f32 %v824_v3, 6.0  ;;  %v1833_v13 = vadd.f32 %v4505_v42, %v1794_v4  ;;  %v1864_v15 = vmax.f32 %v1832_v5, 0.0  ;;  %v757_v17 = vadd.f32 %v3754_v7, %v4385_v25  ;;  %v748_v19 = vpop.f32.mrb[17].mxu0 }
 0x115   : > { %937 = vst.msk [vmem:[#allocation2 + $0xc9] sm:$0xff] %vm875_vm1, %v858_v8  ;;  %v1395_v20 = vadd.f32 %v1363_v9, %v1295_v0  ;;  %v1494_v22 = vadd.f32 %v1462_v51, %v1394_v50  ;;  %v1563_v29 = vmul.f32 %v4423_v10, %v4510_v6  ;;  %v749_v35 = vadd.f32 %v4385_v25, %v748_v19  ;;  %v3755_v36 = vpop.f32.mrb[18].mxu0 }
 0x116   : > { %935 = vst.msk [vmem:[#allocation2 + $0xb1] sm:$0xff] %vm875_vm1, %v856_v23  ;;  %v1865_v37 = vmax.f32 %v1833_v13, 0.0  ;;  %v1896_v38 = vmin.f32 %v1864_v15, 6.0  ;;  %v1564_v43 = vmul.f32 %v4423_v10, %v4517_v12  ;;  %v829_v32 = vmax.f32 %v757_v17, 0.0  ;;  %v751_v46 = vpop.f32.mrb[19].mxu0 }
 0x117   : > { %v760_v45 = vadd.f32 %v3755_v36, %v4385_v25  ;;  %v1495_v47 = vadd.f32 %v1463_v16, %v1395_v20  ;;  %v1595_v33 = vadd.f32 %v1563_v29, %v1494_v22  ;;  %v827_v52 = vmax.f32 %v749_v35, 0.0 }
 0x118   : > { %v752_v53 = vadd.f32 %v4385_v25, %v751_v46  ;;  %v1897_v54 = vmin.f32 %v1865_v37, 6.0  ;;  %v1663_v55 = vmul.f32 %v4426_v11, %v4527_v30  ;;  %v861_v59 = vmin.f32 %v829_v32, 6.0 }
 0x119   : > { %v830_v60 = vmax.f32 %v760_v45, 0.0  ;;  %v1596_v49 = vadd.f32 %v1564_v43, %v1495_v47  ;;  %v1664_v61 = vmul.f32 %v4426_v11, %v4533_v44  ;;  %v859_v34 = vmin.f32 %v827_v52, 6.0 }
 0x11a   : > { %v828_v62 = vmax.f32 %v752_v53, 0.0  ;;  %v1928_v63 = vpack.c.bf16 %v1897_v54, %v1896_v38  ;;  %v1695_v0 = vadd.f32 %v1663_v55, %v1595_v33  ;;  %940 = vst.msk [vmem:[#allocation2 + $0xf1] sm:$0xff] %vm875_vm1, %v861_v59  ;;  %v1763_v4 = vmul.f32 %v4435_v21, %v4539_v56 }
 0x11b   : > { %v862_v2 = vmin.f32 %v830_v60, 6.0  ;;  %v1696_v3 = vadd.f32 %v1664_v61, %v1596_v49  ;;  %v1764_v5 = vmul.f32 %v4435_v21, %v4541_v57  ;;  %938 = vst.msk [vmem:[#allocation2 + $0xd9] sm:$0xff] %vm875_vm1, %v859_v34  ;;  %v3758_v9 = vpop.f32.mrb[20].mxu0  ;;  %v996_v50 = vmul.f32 %v4440_v26, %v4388_v27  ;;  %v4577_v49 = vld [vmem:[#allocation2 + $0x60] sm:$0xff]  ;;  %v4579_v61 = vld [vmem:[#allocation2 + $0x68] sm:$0xff] }
 0x11c   : > { %v860_v8 = vmin.f32 %v828_v62, 6.0  ;;  %3770 = vmatprep.mubr.msk.bf16.mxu1 %vm875_vm1, %v1928_v63  ;;  %v997_v51 = vmul.f32 %v4458_v39, %v4388_v27  ;;  %v1064_v23 = vmul.f32 %v4442_v28, %v4392_v31  ;;  %v773_v7 = vadd.f32 %v3758_v9, %v4385_v25  ;;  %v764_v13 = vpop.f32.mrb[21].mxu0 }
 0x11d   : > { %941 = vst.msk [vmem:[#allocation2 + $0xf9] sm:$0xff] %vm875_vm1, %v862_v2  ;;  %v1795_v15 = vadd.f32 %v1763_v4, %v1695_v0  ;;  %v1796_v16 = vadd.f32 %v1764_v5, %v1696_v3  ;;  %v1065_v17 = vmul.f32 %v4460_v40, %v4392_v31  ;;  %v765_v26 = vadd.f32 %v4385_v25, %v764_v13  ;;  %v3759_v19 = vpop.f32.mrb[22].mxu0  ;;  %v4586_v3 = vld [vmem:[#allocation2 + $0x61] sm:$0xff]  ;;  %v4588_v4 = vld [vmem:[#allocation2 + $0x69] sm:$0xff] }
 0x11e   : > { %939 = vst.msk [vmem:[#allocation2 + $0xe1] sm:$0xff] %vm875_vm1, %v860_v8  ;;  %v1096_v20 = vadd.f32 %v1064_v23, %v996_v50  ;;  %v1164_v39 = vmul.f32 %v4462_v41, %v4402_v48  ;;  %v1165_v28 = vmul.f32 %v4477_v58, %v4402_v48  ;;  %v833_v22 = vmax.f32 %v773_v7, 0.0  ;;  %v767_v35 = vpop.f32.mrb[23].mxu0  ;;  %v4596_v23 = vld [vmem:[#allocation2 + $0x6a] sm:$0xff] }
 0x11f   : > { %v776_v29 = vadd.f32 %v3759_v19, %v4385_v25  ;;  %v1834_v36 = vadd.f32 %v4505_v42, %v1795_v15  ;;  %v1835_v40 = vadd.f32 %v4505_v42, %v1796_v16  ;;  %v831_v37 = vmax.f32 %v765_v26, 0.0 }
 0x120   : > { %v768_v38 = vadd.f32 %v4385_v25, %v767_v35  ;;  %v1097_v43 = vadd.f32 %v1065_v17, %v997_v51  ;;  %v1196_v32 = vadd.f32 %v1164_v39, %v1096_v20  ;;  %v865_v45 = vmin.f32 %v833_v22, 6.0  ;;  %v4594_v51 = vld [vmem:[#allocation2 + $0x62] sm:$0xff] }
 0x121   : > { %v834_v46 = vmax.f32 %v776_v29, 0.0  ;;  %v1866_v47 = vmax.f32 %v1834_v36, 0.0  ;;  %v1867_v41 = vmax.f32 %v1835_v40, 0.0  ;;  %v863_v33 = vmin.f32 %v831_v37, 6.0 }
 0x122   : > { %v832_v52 = vmax.f32 %v768_v38, 0.0  ;;  %v1197_v58 = vadd.f32 %v1165_v28, %v1097_v43  ;;  %v1264_v53 = vmul.f32 %v4510_v6, %v4415_v1  ;;  %944 = vst.msk [vmem:[#allocation2 + $0x121] sm:$0xff] %vm875_vm1, %v865_v45  ;;  %v1265_v60 = vmul.f32 %v4517_v12, %v4415_v1 }
 0x123   : > { %v866_v54 = vmin.f32 %v834_v46, 6.0  ;;  %v1898_v55 = vmin.f32 %v1866_v47, 6.0  ;;  %v1899_v59 = vmin.f32 %v1867_v41, 6.0  ;;  %942 = vst.msk [vmem:[#allocation2 + $0x109] sm:$0xff] %vm875_vm1, %v863_v33  ;;  %v3762_v62 = vpop.f32.mrb[24].mxu0  ;;  %v1364_v0 = vmul.f32 %v4527_v30, %v4430_v14 }
 0x124   : > { %v864_v34 = vmin.f32 %v832_v52, 6.0  ;;  %v1296_v63 = vadd.f32 %v1264_v53, %v1196_v32  ;;  %v1365_v2 = vmul.f32 %v4533_v44, %v4430_v14  ;;  %v789_v8 = vadd.f32 %v3762_v62, %v4385_v25  ;;  %v780_v7 = vpop.f32.mrb[25].mxu0 }
 0x125   : > { %945 = vst.msk [vmem:[#allocation2 + $0x129] sm:$0xff] %vm875_vm1, %v866_v54  ;;  %v1929_v5 = vpack.c.bf16 %v1899_v59, %v1898_v55  ;;  %v1297_v9 = vadd.f32 %v1265_v60, %v1197_v58  ;;  %v1464_v50 = vmul.f32 %v4539_v56, %v4438_v24  ;;  %v1465_v15 = vmul.f32 %v4541_v57, %v4438_v24  ;;  %v3763_v26 = vpop.f32.mrb[26].mxu0 }
 0x126   : > { %943 = vst.msk [vmem:[#allocation2 + $0x111] sm:$0xff] %vm875_vm1, %v864_v34  ;;  %v1396_v13 = vadd.f32 %v1364_v0, %v1296_v63  ;;  %v1565_v16 = vmul.f32 %v4423_v10, %v4577_v49  ;;  %v1566_v17 = vmul.f32 %v4423_v10, %v4579_v61  ;;  %v837_v19 = vmax.f32 %v789_v8, 0.0  ;;  %v783_v22 = vpop.f32.mrb[27].mxu0  ;;  %v4635_v8 = vld [vmem:[#allocation2 + $0x78] sm:$0xff] }
 0x127   : > { %3771 = vmatmul.mubr.msk.bf16.vlgmr.msra.gmra.mrb[0].mxu1 %vm875_vm1, %v1929_v5  ;;  %v1397_v20 = vadd.f32 %v1365_v2, %v1297_v9  ;;  %v1665_v39 = vmul.f32 %v4426_v11, %v4586_v3  ;;  %v1666_v28 = vmul.f32 %v4426_v11, %v4588_v4  ;;  %v1765_v35 = vmul.f32 %v4435_v21, %v4594_v51 }
 0x128   : > { %v1496_v29 = vadd.f32 %v1464_v50, %v1396_v13  ;;  %v1766_v36 = vmul.f32 %v4435_v21, %v4596_v23  ;;  %v781_v40 = vadd.f32 %v4385_v25, %v780_v7  ;;  %v869_v37 = vmin.f32 %v837_v19, 6.0 }
 0x129   : > { %v1497_v38 = vadd.f32 %v1465_v15, %v1397_v20  ;;  %v792_v43 = vadd.f32 %v3763_v26, %v4385_v25  ;;  %v784_v32 = vadd.f32 %v4385_v25, %v783_v22  ;;  %v998_v47 = vmul.f32 %v4510_v6, %v4388_v27  ;;  %v4647_v15 = vld [vmem:[#allocation2 + $0x79] sm:$0xff] }
 0x12a   : > { %v1597_v45 = vadd.f32 %v1565_v16, %v1496_v29  ;;  %v835_v46 = vmax.f32 %v781_v40, 0.0  ;;  %v999_v41 = vmul.f32 %v4517_v12, %v4388_v27  ;;  %948 = vst.msk [vmem:[#allocation2 + $0x151] sm:$0xff] %vm875_vm1, %v869_v37  ;;  %v1066_v53 = vmul.f32 %v4527_v30, %v4392_v31  ;;  %v4665_v40 = vld [vmem:[#allocation2 + $0x82] sm:$0xff] }
 0x12b   : > { %v1598_v33 = vadd.f32 %v1566_v17, %v1497_v38  ;;  %v838_v52 = vmax.f32 %v792_v43, 0.0  ;;  %v836_v58 = vmax.f32 %v784_v32, 0.0  ;;  %v1067_v59 = vmul.f32 %v4533_v44, %v4392_v31  ;;  %v3766_v6 = vpop.f32.mrb[28].mxu0 }
 0x12c   : > { %v1697_v54 = vadd.f32 %v1665_v39, %v1597_v45  ;;  %v867_v55 = vmin.f32 %v835_v46, 6.0  ;;  %v1166_v60 = vmul.f32 %v4539_v56, %v4402_v48  ;;  %v1098_v63 = vadd.f32 %v1066_v53, %v998_v47  ;;  %v4628_v0 = vpop.f32.mrb[29].mxu0  ;;  %v4656_v39 = vld [vmem:[#allocation2 + $0x81] sm:$0xff] }
 0x12d   : > { %v1698_v34 = vadd.f32 %v1666_v28, %v1598_v33  ;;  %v870_v62 = vmin.f32 %v838_v52, 6.0  ;;  %v868_v12 = vmin.f32 %v836_v58, 6.0  ;;  %v1099_v5 = vadd.f32 %v1067_v59, %v999_v41  ;;  %v4637_v56 = vpop.f32.mrb[30].mxu0  ;;  %v4658_v28 = vld [vmem:[#allocation2 + $0x7a] sm:$0xff] }
 0x12e   : > { %v1797_v2 = vadd.f32 %v1765_v35, %v1697_v54  ;;  %946 = vst.msk [vmem:[#allocation2 + $0x139] sm:$0xff] %vm875_vm1, %v867_v55  ;;  %v1167_v30 = vmul.f32 %v4541_v57, %v4402_v48  ;;  %v1266_v44 = vmul.f32 %v4577_v49, %v4415_v1  ;;  %v1198_v50 = vadd.f32 %v1166_v60, %v1098_v63  ;;  %v4645_v57 = vld [vmem:[#allocation2 + $0x80] sm:$0xff]  ;;  %v4649_v16 = vpop.f32.mrb[31].mxu0 }
 0x12f   : > { %v1798_v9 = vadd.f32 %v1766_v36, %v1698_v34  ;;  %949 = vst.msk [vmem:[#allocation2 + $0x159] sm:$0xff] %vm875_vm1, %v870_v62  ;;  %947 = vst.msk [vmem:[#allocation2 + $0x141] sm:$0xff] %vm875_vm1, %v868_v12  ;;  %v1267_v7 = vmul.f32 %v4579_v61, %v4415_v1  ;;  %v1366_v13 = vmul.f32 %v4586_v3, %v4430_v14 }
 0x130   : > { %v1836_v17 = vadd.f32 %v4505_v42, %v1797_v2  ;;  %v1199_v26 = vadd.f32 %v1167_v30, %v1099_v5  ;;  %v1367_v19 = vmul.f32 %v4588_v4, %v4430_v14  ;;  %v1466_v20 = vmul.f32 %v4594_v51, %v4438_v24 }
 0x131   : > { %v1837_v22 = vadd.f32 %v4505_v42, %v1798_v9  ;;  %v1298_v29 = vadd.f32 %v1266_v44, %v1198_v50  ;;  %v1467_v35 = vmul.f32 %v4596_v23, %v4438_v24  ;;  %v1567_v36 = vmul.f32 %v4423_v10, %v4635_v8  ;;  %v4690_v50 = vld [vmem:[#allocation2 + $0x90] sm:$0xff] }
 0x132   : > { %v1868_v37 = vmax.f32 %v1836_v17, 0.0  ;;  %v1299_v38 = vadd.f32 %v1267_v7, %v1199_v26  ;;  %v1568_v43 = vmul.f32 %v4423_v10, %v4645_v57  ;;  %v1667_v32 = vmul.f32 %v4426_v11, %v4647_v15 }
 0x133   : > { %v1869_v45 = vmax.f32 %v1837_v22, 0.0  ;;  %v1398_v46 = vadd.f32 %v1366_v13, %v1298_v29  ;;  %v1668_v47 = vmul.f32 %v4426_v11, %v4656_v39  ;;  %v1767_v41 = vmul.f32 %v4435_v21, %v4658_v28  ;;  %v4699_v13 = vld [vmem:[#allocation2 + $0x98] sm:$0xff] }
 0x134   : > { %v1900_v33 = vmin.f32 %v1868_v37, 6.0  ;;  %v1399_v52 = vadd.f32 %v1367_v19, %v1299_v38  ;;  %v1768_v58 = vmul.f32 %v4435_v21, %v4665_v40  ;;  %v805_v53 = vadd.f32 %v3766_v6, %v4385_v25  ;;  %v4706_v22 = vld [vmem:[#allocation2 + $0x99] sm:$0xff] }
 0x135   : > { %v1901_v54 = vmin.f32 %v1869_v45, 6.0  ;;  %v1498_v55 = vadd.f32 %v1466_v20, %v1398_v46  ;;  %v1000_v59 = vmul.f32 %v4577_v49, %v4388_v27  ;;  %v1001_v60 = vmul.f32 %v4579_v61, %v4388_v27  ;;  %v4704_v20 = vld [vmem:[#allocation2 + $0x91] sm:$0xff] }
 0x136   : > { %v1499_v34 = vadd.f32 %v1467_v35, %v1399_v52  ;;  %v841_v62 = vmax.f32 %v805_v53, 0.0  ;;  %v1068_v12 = vmul.f32 %v4586_v3, %v4392_v31  ;;  %v1069_v63 = vmul.f32 %v4588_v4, %v4392_v31  ;;  %v4708_v29 = vld [vmem:[#allocation2 + $0x92] sm:$0xff] }
 0x137   : > { %v1930_v2 = vpack.c.bf16 %v1901_v54, %v1900_v33  ;;  %v1599_v5 = vadd.f32 %v1567_v36, %v1498_v55  ;;  %v1168_v6 = vmul.f32 %v4594_v51, %v4402_v48  ;;  %v1169_v30 = vmul.f32 %v4596_v23, %v4402_v48 }
 0x138   : > { %v1600_v49 = vadd.f32 %v1568_v43, %v1499_v34  ;;  %v873_v44 = vmin.f32 %v841_v62, 6.0  ;;  %v1100_v9 = vadd.f32 %v1068_v12, %v1000_v59  ;;  %v1101_v61 = vadd.f32 %v1069_v63, %v1001_v60  ;;  %v4716_v43 = vld [vmem:[#allocation2 + $0x9a] sm:$0xff] }
 0x139   : > { %3774 = vmatprep.mubr.msk.bf16.mxu1 %vm875_vm1, %v1930_v2  ;;  %v1699_v3 = vadd.f32 %v1667_v32, %v1599_v5  ;;  %v1268_v4 = vmul.f32 %v4635_v8, %v4415_v1  ;;  %v1269_v7 = vmul.f32 %v4645_v57, %v4415_v1  ;;  %v1368_v51 = vmul.f32 %v4647_v15, %v4430_v14 }
 0x13a   : > { %v1700_v23 = vadd.f32 %v1668_v47, %v1600_v49  ;;  %952 = vst.msk [vmem:[#allocation2 + $0x181] sm:$0xff] %vm875_vm1, %v873_v44  ;;  %v1200_v17 = vadd.f32 %v1168_v6, %v1100_v9  ;;  %v1201_v26 = vadd.f32 %v1169_v30, %v1101_v61  ;;  %v1369_v19 = vmul.f32 %v4656_v39, %v4430_v14 }
 0x13b   : > { %v1799_v35 = vadd.f32 %v1767_v41, %v1699_v3  ;;  %v1468_v36 = vmul.f32 %v4658_v28, %v4438_v24  ;;  %v1469_v37 = vmul.f32 %v4665_v40, %v4438_v24  ;;  %v1569_v38 = vmul.f32 %v4423_v10, %v4690_v50 }
 0x13c   : > { %v1800_v32 = vadd.f32 %v1768_v58, %v1700_v23  ;;  %v1300_v45 = vadd.f32 %v1268_v4, %v1200_v17  ;;  %v1301_v46 = vadd.f32 %v1269_v7, %v1201_v26  ;;  %v1570_v47 = vmul.f32 %v4423_v10, %v4699_v13 }
 0x13d   : > { %v1838_v33 = vadd.f32 %v4505_v42, %v1799_v35  ;;  %v1669_v41 = vmul.f32 %v4426_v11, %v4704_v20  ;;  %v1670_v52 = vmul.f32 %v4426_v11, %v4706_v22  ;;  %v1769_v53 = vmul.f32 %v4435_v21, %v4708_v29 }
 0x13e   : > { %v1839_v54 = vadd.f32 %v4505_v42, %v1800_v32  ;;  %v1400_v55 = vadd.f32 %v1368_v51, %v1300_v45  ;;  %v1401_v58 = vadd.f32 %v1369_v19, %v1301_v46  ;;  %v1770_v59 = vmul.f32 %v4435_v21, %v4716_v43  ;;  %v4758_v32 = vld [vmem:[#allocation2 + $0xb0] sm:$0xff] }
 0x13f   : > { %v1870_v60 = vmax.f32 %v1838_v33, 0.0  ;;  %v797_v34 = vadd.f32 %v4385_v25, %v4628_v0  ;;  %v808_v62 = vadd.f32 %v4637_v56, %v4385_v25  ;;  %v800_v12 = vadd.f32 %v4385_v25, %v4649_v16  ;;  %v4760_v45 = vld [vmem:[#allocation2 + $0xa9] sm:$0xff]  ;;  %v4768_v33 = vld [vmem:[#allocation2 + $0xb1] sm:$0xff] }
 0x140   : > { %v1871_v63 = vmax.f32 %v1839_v54, 0.0  ;;  %v1500_v2 = vadd.f32 %v1468_v36, %v1400_v55  ;;  %v1501_v5 = vadd.f32 %v1469_v37, %v1401_v58  ;;  %v1002_v6 = vmul.f32 %v4635_v8, %v4388_v27  ;;  %v4774_v55 = vld [vmem:[#allocation2 + $0xaa] sm:$0xff]  ;;  %v4776_v58 = vld [vmem:[#allocation2 + $0xb2] sm:$0xff] }
 0x141   : > { %v1902_v30 = vmin.f32 %v1870_v60, 6.0  ;;  %v839_v49 = vmax.f32 %v797_v34, 0.0  ;;  %v842_v44 = vmax.f32 %v808_v62, 0.0  ;;  %v840_v9 = vmax.f32 %v800_v12, 0.0 }
 0x142   : > { %v1903_v61 = vmin.f32 %v1871_v63, 6.0  ;;  %v1601_v3 = vadd.f32 %v1569_v38, %v1500_v2  ;;  %v1602_v4 = vadd.f32 %v1570_v47, %v1501_v5  ;;  %v1003_v0 = vmul.f32 %v4645_v57, %v4388_v27  ;;  %v4756_v38 = vld [vmem:[#allocation2 + $0xa8] sm:$0xff] }
 0x143   : > { %v871_v56 = vmin.f32 %v839_v49, 6.0  ;;  %v874_v7 = vmin.f32 %v842_v44, 6.0  ;;  %v872_v51 = vmin.f32 %v840_v9, 6.0  ;;  %v1070_v25 = vmul.f32 %v4647_v15, %v4392_v31 }
 0x144   : > { %v1931_v16 = vpack.c.bf16 %v1903_v61, %v1902_v30  ;;  %v1701_v23 = vadd.f32 %v1669_v41, %v1601_v3  ;;  %v1702_v17 = vadd.f32 %v1670_v52, %v1602_v4  ;;  %v1071_v8 = vmul.f32 %v4656_v39, %v4392_v31 }
 0x145   : > { %950 = vst.msk [vmem:[#allocation2 + $0x169] sm:$0xff] %vm875_vm1, %v871_v56  ;;  %953 = vst.msk [vmem:[#allocation2 + $0x189] sm:$0xff] %vm875_vm1, %v874_v7  ;;  %v1102_v26 = vadd.f32 %v1070_v25, %v1002_v6  ;;  %v1170_v57 = vmul.f32 %v4658_v28, %v4402_v48  ;;  %v1171_v19 = vmul.f32 %v4665_v40, %v4402_v48 }
 0x146   : > { %951 = vst.msk [vmem:[#allocation2 + $0x171] sm:$0xff] %vm875_vm1, %v872_v51  ;;  %v1270_v15 = vmul.f32 %v4690_v50, %v4415_v1  ;;  %3775 = vmatmul.mubr.msk.bf16.gmra.mrb[4].mxu1 %vm875_vm1, %v1931_v16  ;;  %v1801_v35 = vadd.f32 %v1769_v53, %v1701_v23  ;;  %v1802_v39 = vadd.f32 %v1770_v59, %v1702_v17 }
 0x147   : > { %v1103_v36 = vadd.f32 %v1071_v8, %v1003_v0  ;;  %v1271_v37 = vmul.f32 %v4699_v13, %v4415_v1  ;;  %v1202_v28 = vadd.f32 %v1170_v57, %v1102_v26  ;;  %v1370_v40 = vmul.f32 %v4704_v20, %v4430_v14  ;;  %v4806_v26 = vld [vmem:[#allocation2 + $0xc0] sm:$0xff] }
 0x148   : > { %v1371_v46 = vmul.f32 %v4706_v22, %v4430_v14  ;;  %v1470_v47 = vmul.f32 %v4708_v29, %v4438_v24  ;;  %v1840_v41 = vadd.f32 %v4505_v42, %v1801_v35  ;;  %v1841_v52 = vadd.f32 %v4505_v42, %v1802_v39  ;;  %v4810_v57 = vld [vmem:[#allocation2 + $0xc1] sm:$0xff]  ;;  %v4819_v35 = vld [vmem:[#allocation2 + $0xc9] sm:$0xff] }
 0x149   : > { %v1203_v53 = vadd.f32 %v1171_v19, %v1103_v36  ;;  %v1471_v54 = vmul.f32 %v4716_v43, %v4438_v24  ;;  %v1302_v59 = vadd.f32 %v1270_v15, %v1202_v28  ;;  %v1571_v60 = vmul.f32 %v4423_v10, %v4756_v38 }
 0x14a   : > { %v1572_v34 = vmul.f32 %v4423_v10, %v4758_v32  ;;  %v1671_v62 = vmul.f32 %v4426_v11, %v4760_v45  ;;  %v1872_v12 = vmax.f32 %v1840_v41, 0.0  ;;  %v1873_v63 = vmax.f32 %v1841_v52, 0.0 }
 0x14b   : > { %v1303_v2 = vadd.f32 %v1271_v37, %v1203_v53  ;;  %v1672_v5 = vmul.f32 %v4426_v11, %v4768_v33  ;;  %v1402_v6 = vadd.f32 %v1370_v40, %v1302_v59  ;;  %v1771_v30 = vmul.f32 %v4435_v21, %v4774_v55  ;;  %v4823_v40 = vld [vmem:[#allocation2 + $0xc2] sm:$0xff] }
 0x14c   : > { %v1772_v49 = vmul.f32 %v4435_v21, %v4776_v58  ;;  %v1004_v44 = vmul.f32 %v4690_v50, %v4388_v27  ;;  %v1904_v9 = vmin.f32 %v1872_v12, 6.0  ;;  %v1905_v61 = vmin.f32 %v1873_v63, 6.0 }
 0x14d   : > { %v1403_v3 = vadd.f32 %v1371_v46, %v1303_v2  ;;  %v1005_v4 = vmul.f32 %v4699_v13, %v4388_v27  ;;  %v1502_v0 = vadd.f32 %v1470_v47, %v1402_v6  ;;  %v1072_v56 = vmul.f32 %v4704_v20, %v4392_v31  ;;  %v4825_v46 = vld [vmem:[#allocation2 + $0xca] sm:$0xff] }
 0x14e   : > { %v1073_v7 = vmul.f32 %v4706_v22, %v4392_v31  ;;  %v1172_v51 = vmul.f32 %v4708_v29, %v4402_v48  ;;  %v1932_v25 = vpack.c.bf16 %v1905_v61, %v1904_v9  ;;  %v1173_v50 = vmul.f32 %v4716_v43, %v4402_v48  ;;  %v4808_v22 = vld [vmem:[#allocation2 + $0xc8] sm:$0xff] }
 0x14f   : > { %v1503_v16 = vadd.f32 %v1471_v54, %v1403_v3  ;;  %v1272_v23 = vmul.f32 %v4756_v38, %v4415_v1  ;;  %v1603_v17 = vadd.f32 %v1571_v60, %v1502_v0  ;;  %v1104_v13 = vadd.f32 %v1072_v56, %v1004_v44 }
 0x150   : > { %v1105_v8 = vadd.f32 %v1073_v7, %v1005_v4  ;;  %v1273_v20 = vmul.f32 %v4758_v32, %v4415_v1  ;;  %3778 = vmatprep.mubr.msk.bf16.mxu1 %vm875_vm1, %v1932_v25  ;;  %v1372_v43 = vmul.f32 %v4760_v45, %v4430_v14  ;;  %v1373_v19 = vmul.f32 %v4768_v33, %v4430_v14 }
 0x151   : > { %v1604_v29 = vadd.f32 %v1572_v34, %v1503_v16  ;;  %v1472_v15 = vmul.f32 %v4774_v55, %v4438_v24  ;;  %v1703_v39 = vadd.f32 %v1671_v62, %v1603_v17  ;;  %v1204_v36 = vadd.f32 %v1172_v51, %v1104_v13 }
 0x152   : > { %v1205_v37 = vadd.f32 %v1173_v50, %v1105_v8  ;;  %v1473_v28 = vmul.f32 %v4776_v58, %v4438_v24  ;;  %v1573_v41 = vmul.f32 %v4423_v10, %v4806_v26  ;;  %v1574_v52 = vmul.f32 %v4423_v10, %v4808_v22  ;;  %v4859_v8 = vld [vmem:[#allocation2 + $0xd8] sm:$0xff] }
 0x153   : > { %v1704_v47 = vadd.f32 %v1672_v5, %v1604_v29  ;;  %v1673_v53 = vmul.f32 %v4426_v11, %v4810_v57  ;;  %v1803_v54 = vadd.f32 %v1771_v30, %v1703_v39  ;;  %v1304_v59 = vadd.f32 %v1272_v23, %v1204_v36  ;;  %v4869_v39 = vld [vmem:[#allocation2 + $0xe1] sm:$0xff] }
 0x154   : > { %v1305_v60 = vadd.f32 %v1273_v20, %v1205_v37  ;;  %v1674_v34 = vmul.f32 %v4426_v11, %v4819_v35  ;;  %v1773_v12 = vmul.f32 %v4435_v21, %v4823_v40  ;;  %v1774_v63 = vmul.f32 %v4435_v21, %v4825_v46 }
 0x155   : > { %v1804_v62 = vadd.f32 %v1772_v49, %v1704_v47  ;;  %v1006_v2 = vmul.f32 %v4756_v38, %v4388_v27  ;;  %v1842_v5 = vadd.f32 %v4505_v42, %v1803_v54  ;;  %v1404_v6 = vadd.f32 %v1372_v43, %v1304_v59 }
 0x156   : > { %v1405_v44 = vadd.f32 %v1373_v19, %v1305_v60  ;;  %v1007_v30 = vmul.f32 %v4758_v32, %v4388_v27  ;;  %v1074_v49 = vmul.f32 %v4760_v45, %v4392_v31  ;;  %v1075_v61 = vmul.f32 %v4768_v33, %v4392_v31 }
 0x157   : > { %v1843_v9 = vadd.f32 %v4505_v42, %v1804_v62  ;;  %v1174_v3 = vmul.f32 %v4774_v55, %v4402_v48  ;;  %v1874_v4 = vmax.f32 %v1842_v5, 0.0  ;;  %v1504_v38 = vadd.f32 %v1472_v15, %v1404_v6  ;;  %v4867_v15 = vld [vmem:[#allocation2 + $0xd9] sm:$0xff] }
 0x158   : > { %v1505_v0 = vadd.f32 %v1473_v28, %v1405_v44  ;;  %v1175_v56 = vmul.f32 %v4776_v58, %v4402_v48  ;;  %v1106_v51 = vadd.f32 %v1074_v49, %v1006_v2  ;;  %v1107_v32 = vadd.f32 %v1075_v61, %v1007_v30  ;;  %v4861_v58 = vld [vmem:[#allocation2 + $0xe0] sm:$0xff] }
 0x159   : > { %v1875_v7 = vmax.f32 %v1843_v9, 0.0  ;;  %v1274_v25 = vmul.f32 %v4806_v26, %v4415_v1  ;;  %v1906_v16 = vmin.f32 %v1874_v4, 6.0  ;;  %v1605_v45 = vadd.f32 %v1573_v41, %v1504_v38  ;;  %v4873_v41 = vld [vmem:[#allocation2 + $0xda] sm:$0xff] }
 0x15a   : > { %v1606_v50 = vadd.f32 %v1574_v52, %v1505_v0  ;;  %v1275_v33 = vmul.f32 %v4808_v22, %v4415_v1  ;;  %v1206_v55 = vadd.f32 %v1174_v3, %v1106_v51  ;;  %v1207_v17 = vadd.f32 %v1175_v56, %v1107_v32  ;;  %v4875_v52 = vld [vmem:[#allocation2 + $0xe2] sm:$0xff] }
 0x15b   : > { %v1907_v23 = vmin.f32 %v1875_v7, 6.0  ;;  %v1374_v13 = vmul.f32 %v4810_v57, %v4430_v14  ;;  %v1705_v20 = vadd.f32 %v1673_v53, %v1605_v45  ;;  %v1375_v43 = vmul.f32 %v4819_v35, %v4430_v14 }
 0x15c   : > { %v1706_v29 = vadd.f32 %v1674_v34, %v1606_v50  ;;  %v1474_v19 = vmul.f32 %v4823_v40, %v4438_v24  ;;  %v1306_v37 = vadd.f32 %v1274_v25, %v1206_v55  ;;  %v1307_v28 = vadd.f32 %v1275_v33, %v1207_v17  ;;  %v4908_v55 = vld [vmem:[#allocation2 + $0xf0] sm:$0xff] }
 0x15d   : > { %v1933_v36 = vpack.c.bf16 %v1907_v23, %v1906_v16  ;;  %v1475_v47 = vmul.f32 %v4825_v46, %v4438_v24  ;;  %v1805_v53 = vadd.f32 %v1773_v12, %v1705_v20  ;;  %v1575_v59 = vmul.f32 %v4423_v10, %v4859_v8 }
 0x15e   : > { %v1806_v54 = vadd.f32 %v1774_v63, %v1706_v29  ;;  %v1576_v60 = vmul.f32 %v4423_v10, %v4861_v58  ;;  %v1406_v34 = vadd.f32 %v1374_v13, %v1306_v37  ;;  %v1407_v62 = vadd.f32 %v1375_v43, %v1307_v28  ;;  %v4916_v29 = vld [vmem:[#allocation2 + $0xf1] sm:$0xff]  ;;  %v4918_v43 = vld [vmem:[#allocation2 + $0xf9] sm:$0xff] }
 0x15f   : > { %3779 = vmatmul.mubr.msk.bf16.gmra.mrb[8].mxu1 %vm875_vm1, %v1933_v36  ;;  %v1675_v2 = vmul.f32 %v4426_v11, %v4867_v15  ;;  %v1676_v5 = vmul.f32 %v4426_v11, %v4869_v39  ;;  %v1844_v6 = vadd.f32 %v4505_v42, %v1805_v53  ;;  %v1775_v63 = vmul.f32 %v4435_v21, %v4873_v41 }
 0x160   : > { %v1845_v12 = vadd.f32 %v4505_v42, %v1806_v54  ;;  %v1776_v44 = vmul.f32 %v4435_v21, %v4875_v52  ;;  %v1506_v30 = vadd.f32 %v1474_v19, %v1406_v34  ;;  %v1507_v9 = vadd.f32 %v1475_v47, %v1407_v62  ;;  %v4925_v47 = vld [vmem:[#allocation2 + $0xf2] sm:$0xff] }
 0x161   : > { %v1008_v49 = vmul.f32 %v4806_v26, %v4388_v27  ;;  %v1009_v61 = vmul.f32 %v4808_v22, %v4388_v27  ;;  %v1876_v3 = vmax.f32 %v1844_v6, 0.0  ;;  %v1076_v38 = vmul.f32 %v4810_v57, %v4392_v31 }
 0x162   : > { %v1877_v4 = vmax.f32 %v1845_v12, 0.0  ;;  %v1077_v0 = vmul.f32 %v4819_v35, %v4392_v31  ;;  %v1607_v56 = vadd.f32 %v1575_v59, %v1506_v30  ;;  %v1608_v7 = vadd.f32 %v1576_v60, %v1507_v9 }
 0x163   : > { %v1176_v21 = vmul.f32 %v4823_v40, %v4402_v48  ;;  %v1177_v51 = vmul.f32 %v4825_v46, %v4402_v48  ;;  %v1908_v26 = vmin.f32 %v1876_v3, 6.0  ;;  %v1108_v25 = vadd.f32 %v1076_v38, %v1008_v49  ;;  %v4910_v40 = vld [vmem:[#allocation2 + $0xf8] sm:$0xff] }
 0x164   : > { %v1909_v32 = vmin.f32 %v1877_v4, 6.0  ;;  %v1109_v22 = vadd.f32 %v1077_v0, %v1009_v61  ;;  %v1707_v16 = vadd.f32 %v1675_v2, %v1607_v56  ;;  %v1708_v45 = vadd.f32 %v1676_v5, %v1608_v7 }
 0x165   : > { %v1276_v57 = vmul.f32 %v4859_v8, %v4415_v1  ;;  %v1277_v35 = vmul.f32 %v4861_v58, %v4415_v1  ;;  %v1208_v33 = vadd.f32 %v1176_v21, %v1108_v25  ;;  %v1376_v13 = vmul.f32 %v4867_v15, %v4430_v14 }
 0x166   : > { %v1934_v50 = vpack.c.bf16 %v1909_v32, %v1908_v26  ;;  %v1209_v23 = vadd.f32 %v1177_v51, %v1109_v22  ;;  %v1807_v46 = vadd.f32 %v1775_v63, %v1707_v16  ;;  %v1808_v17 = vadd.f32 %v1776_v44, %v1708_v45  ;;  %v1742_v63 = vld [vmem:[#allocation2 + $0xfa] sm:$0xff]  ;;  %v4940_v44 = vld [vmem:[%s5809_s3 + $0x8] ss:$0 sm:$0xff] }
 0x167   : > { %v1377_v20 = vmul.f32 %v4869_v39, %v4430_v14  ;;  %v1308_v19 = vadd.f32 %v1276_v57, %v1208_v33  ;;  %v1476_v37 = vmul.f32 %v4873_v41, %v4438_v24  ;;  %v1477_v28 = vmul.f32 %v4875_v52, %v4438_v24  ;;  %v4963_v57 = vld [vmem:[#allocation2 + $0x110] sm:$0xff] }
 0x168   : > { %3782 = vmatprep.mubr.msk.bf16.mxu1 %vm875_vm1, %v1934_v50  ;;  %v1309_v36 = vadd.f32 %v1277_v35, %v1209_v23  ;;  %v1846_v53 = vadd.f32 %v4505_v42, %v1807_v46  ;;  %v1847_v54 = vadd.f32 %v4505_v42, %v1808_v17  ;;  %v1577_v59 = vmul.f32 %v4423_v10, %v4908_v55  ;;  %v4965_v35 = vld [vmem:[#allocation2 + $0x109] sm:$0xff]  ;;  %v4974_v46 = vld [vmem:[#allocation2 + $0x111] sm:$0xff] }
 0x169   : > { %v1578_v60 = vmul.f32 %v4423_v10, %v4910_v40  ;;  %v1408_v34 = vadd.f32 %v1376_v13, %v1308_v19  ;;  %v1677_v2 = vmul.f32 %v4426_v11, %v4916_v29  ;;  %v1678_v5 = vmul.f32 %v4426_v11, %v4918_v43 }
 0x16a   : > { %v1409_v62 = vadd.f32 %v1377_v20, %v1309_v36  ;;  %v1878_v6 = vmax.f32 %v1846_v53, 0.0  ;;  %v1879_v12 = vmax.f32 %v1847_v54, 0.0  ;;  %v1777_v30 = vmul.f32 %v4940_v44, %v4925_v47  ;;  %v4977_v36 = vld [vmem:[#allocation2 + $0x10a] sm:$0xff] }
 0x16b   : > { %v1010_v9 = vmul.f32 %v4859_v8, %v4388_v27  ;;  %v1508_v49 = vadd.f32 %v1476_v37, %v1408_v34  ;;  %v1011_v3 = vmul.f32 %v4861_v58, %v4388_v27  ;;  %v1078_v4 = vmul.f32 %v4867_v15, %v4392_v31 }
 0x16c   : > { %v1509_v61 = vadd.f32 %v1477_v28, %v1409_v62  ;;  %v1910_v38 = vmin.f32 %v1878_v6, 6.0  ;;  %v1911_v0 = vmin.f32 %v1879_v12, 6.0  ;;  %v1079_v56 = vmul.f32 %v4869_v39, %v4392_v31 }
 0x16d   : > { %v1178_v7 = vmul.f32 %v4873_v41, %v4402_v48  ;;  %v1609_v21 = vadd.f32 %v1577_v59, %v1508_v49  ;;  %v1778_v8 = vmul.f32 %v4940_v44, %v1742_v63  ;;  %v1110_v26 = vadd.f32 %v1078_v4, %v1010_v9  ;;  %v4961_v41 = vld [vmem:[#allocation2 + $0x108] sm:$0xff] }
 0x16e   : > { %v1610_v51 = vadd.f32 %v1578_v60, %v1509_v61  ;;  %v1935_v32 = vpack.c.bf16 %v1911_v0, %v1910_v38  ;;  %v1111_v25 = vadd.f32 %v1079_v56, %v1011_v3  ;;  %v1179_v58 = vmul.f32 %v4875_v52, %v4402_v48  ;;  %v1744_v3 = vld [vmem:[#allocation2 + $0x112] sm:$0xff] }
 0x16f   : > { %v1278_v15 = vmul.f32 %v4908_v55, %v4415_v1  ;;  %v1709_v22 = vadd.f32 %v1677_v2, %v1609_v21  ;;  %v1210_v45 = vadd.f32 %v1178_v7, %v1110_v26  ;;  %v1279_v39 = vmul.f32 %v4910_v40, %v4415_v1 }
 0x170   : > { %v1710_v16 = vadd.f32 %v1678_v5, %v1610_v51  ;;  %3783 = vmatmul.mubr.msk.bf16.gmra.mrb[12].mxu1 %vm875_vm1, %v1935_v32  ;;  %v1211_v50 = vadd.f32 %v1179_v58, %v1111_v25  ;;  %v1378_v52 = vmul.f32 %v4916_v29, %v4430_v14  ;;  %v1379_v33 = vmul.f32 %v4918_v43, %v4430_v14 }
 0x171   : > { %v1478_v23 = vmul.f32 %v4925_v47, %v4438_v24  ;;  %v1809_v17 = vadd.f32 %v1777_v30, %v1709_v22  ;;  %v1310_v20 = vadd.f32 %v1278_v15, %v1210_v45  ;;  %v1479_v19 = vmul.f32 %v1742_v63, %v4438_v24  ;;  %v5015_v45 = vld [vmem:[#allocation2 + $0x121] sm:$0xff] }
 0x172   : > { %v1810_v13 = vadd.f32 %v1778_v8, %v1710_v16  ;;  %v1311_v37 = vadd.f32 %v1279_v39, %v1211_v50  ;;  %v1579_v28 = vmul.f32 %v4423_v10, %v4961_v41  ;;  %v1580_v53 = vmul.f32 %v4423_v10, %v4963_v57  ;;  %v5017_v39 = vld [vmem:[#allocation2 + $0x129] sm:$0xff] }
 0x173   : > { %v1679_v54 = vmul.f32 %v4426_v11, %v4965_v35  ;;  %v1848_v59 = vadd.f32 %v4505_v42, %v1809_v17  ;;  %v1410_v34 = vadd.f32 %v1378_v52, %v1310_v20  ;;  %v1680_v62 = vmul.f32 %v4426_v11, %v4974_v46  ;;  %v5023_v17 = vld [vmem:[#allocation2 + $0x122] sm:$0xff] }
 0x174   : > { %v1849_v60 = vadd.f32 %v4505_v42, %v1810_v13  ;;  %v1411_v2 = vadd.f32 %v1379_v33, %v1311_v37  ;;  %v1779_v5 = vmul.f32 %v4940_v44, %v4977_v36  ;;  %v1012_v6 = vmul.f32 %v4908_v55, %v4388_v27 }
 0x175   : > { %v1013_v12 = vmul.f32 %v4910_v40, %v4388_v27  ;;  %v1880_v30 = vmax.f32 %v1848_v59, 0.0  ;;  %v1510_v49 = vadd.f32 %v1478_v23, %v1410_v34  ;;  %v1080_v42 = vmul.f32 %v4916_v29, %v4392_v31 }
 0x176   : > { %v1881_v9 = vmax.f32 %v1849_v60, 0.0  ;;  %v1511_v61 = vadd.f32 %v1479_v19, %v1411_v2  ;;  %v1081_v4 = vmul.f32 %v4918_v43, %v4392_v31  ;;  %v1180_v38 = vmul.f32 %v4925_v47, %v4402_v48  ;;  %v5007_v47 = vld [vmem:[#allocation2 + $0x120] sm:$0xff]  ;;  %v1746_v2 = vld [vmem:[#allocation2 + $0x12a] sm:$0xff] }
 0x177   : > { %v1181_v0 = vmul.f32 %v1742_v63, %v4402_v48  ;;  %v1912_v55 = vmin.f32 %v1880_v30, 6.0  ;;  %v1611_v7 = vadd.f32 %v1579_v28, %v1510_v49  ;;  %v1112_v40 = vadd.f32 %v1080_v42, %v1012_v6  ;;  %v5009_v63 = vld [vmem:[#allocation2 + $0x128] sm:$0xff]  ;;  %v5032_v28 = vld [vmem:[%s5810_s4] ss:$0 sm:$0xff] }
 0x178   : > { %v1913_v56 = vmin.f32 %v1881_v9, 6.0  ;;  %v1612_v21 = vadd.f32 %v1580_v53, %v1511_v61  ;;  %v1113_v51 = vadd.f32 %v1081_v4, %v1013_v12  ;;  %v1280_v8 = vmul.f32 %v4961_v41, %v4415_v1 }
 0x179   : > { %v1281_v29 = vmul.f32 %v4963_v57, %v4415_v1  ;;  %v1711_v32 = vadd.f32 %v1679_v54, %v1611_v7  ;;  %v1780_v43 = vmul.f32 %v4940_v44, %v1744_v3  ;;  %v1212_v25 = vadd.f32 %v1180_v38, %v1112_v40 }
 0x17a   : > { %v1936_v26 = vpack.c.bf16 %v1913_v56, %v1912_v55  ;;  %v1712_v58 = vadd.f32 %v1680_v62, %v1612_v21  ;;  %v1213_v15 = vadd.f32 %v1181_v0, %v1113_v51  ;;  %v1380_v22 = vmul.f32 %v4965_v35, %v4430_v14 }
 0x17b   : > { %v1381_v16 = vmul.f32 %v4974_v46, %v4430_v14  ;;  %v1811_v50 = vadd.f32 %v1779_v5, %v1711_v32  ;;  %v1312_v52 = vadd.f32 %v1280_v8, %v1212_v25  ;;  %v1480_v33 = vmul.f32 %v4977_v36, %v4438_v24  ;;  %v5062_v25 = vld [vmem:[#allocation2 + $0x140] sm:$0xff] }
 0x17c   : > { %3786 = vmatprep.mubr.msk.bf16.mxu1 %vm875_vm1, %v1936_v26  ;;  %v1481_v23 = vmul.f32 %v1744_v3, %v4438_v24  ;;  %v1812_v13 = vadd.f32 %v1780_v43, %v1712_v58  ;;  %v1313_v20 = vadd.f32 %v1281_v29, %v1213_v15  ;;  %v1581_v19 = vmul.f32 %v4423_v10, %v5007_v47  ;;  %v5058_v29 = vld [vmem:[#allocation2 + $0x138] sm:$0xff] }
 0x17d   : > { %v1582_v37 = vmul.f32 %v4423_v10, %v5009_v63  ;;  %v1850_v53 = vadd.f32 %v5032_v28, %v1811_v50  ;;  %v1412_v54 = vadd.f32 %v1380_v22, %v1312_v52  ;;  %v1681_v59 = vmul.f32 %v4426_v11, %v5015_v45  ;;  %v5064_v58 = vld [vmem:[#allocation2 + $0x139] sm:$0xff]  ;;  %v5070_v50 = vld [vmem:[#allocation2 + $0x141] sm:$0xff] }
 0x17e   : > { %v1682_v60 = vmul.f32 %v4426_v11, %v5017_v39  ;;  %v1851_v34 = vadd.f32 %v5032_v28, %v1812_v13  ;;  %v1413_v62 = vadd.f32 %v1381_v16, %v1313_v20  ;;  %v1781_v5 = vmul.f32 %v4940_v44, %v5023_v17  ;;  %v5072_v52 = vld [vmem:[#allocation2 + $0x13a] sm:$0xff] }
 0x17f   : > { %v1014_v6 = vmul.f32 %v4961_v41, %v4388_v27  ;;  %v1882_v12 = vmax.f32 %v1850_v53, 0.0  ;;  %v1512_v30 = vadd.f32 %v1480_v33, %v1412_v54  ;;  %v1015_v9 = vmul.f32 %v4963_v57, %v4388_v27 }
 0x180   : > { %v1082_v49 = vmul.f32 %v4965_v35, %v4392_v31  ;;  %v1883_v42 = vmax.f32 %v1851_v34, 0.0  ;;  %v1513_v61 = vadd.f32 %v1481_v23, %v1413_v62  ;;  %v1083_v4 = vmul.f32 %v4974_v46, %v4392_v31 }
 0x181   : > { %v1182_v38 = vmul.f32 %v4977_v36, %v4402_v48  ;;  %v1914_v0 = vmin.f32 %v1882_v12, 6.0  ;;  %v1613_v55 = vadd.f32 %v1581_v19, %v1512_v30  ;;  %v1782_v41 = vmul.f32 %v4940_v44, %v1746_v2 }
 0x182   : > { %v1114_v56 = vadd.f32 %v1082_v49, %v1014_v6  ;;  %v1915_v7 = vmin.f32 %v1883_v42, 6.0  ;;  %v1614_v40 = vadd.f32 %v1582_v37, %v1513_v61  ;;  %v1115_v21 = vadd.f32 %v1083_v4, %v1015_v9  ;;  %v1748_v42 = vld [vmem:[#allocation2 + $0x142] sm:$0xff] }
 0x183   : > { %v1183_v57 = vmul.f32 %v1744_v3, %v4402_v48  ;;  %v1713_v51 = vadd.f32 %v1681_v59, %v1613_v55  ;;  %v1282_v8 = vmul.f32 %v5007_v47, %v4415_v1  ;;  %v1283_v46 = vmul.f32 %v5009_v63, %v4415_v1 }
 0x184   : > { %v1214_v35 = vadd.f32 %v1182_v38, %v1114_v56  ;;  %v1937_v36 = vpack.c.bf16 %v1915_v7, %v1914_v0  ;;  %v1714_v26 = vadd.f32 %v1682_v60, %v1614_v40  ;;  %v1382_v43 = vmul.f32 %v5015_v45, %v4430_v14 }
 0x185   : > { %v1215_v32 = vadd.f32 %v1183_v57, %v1115_v21  ;;  %v1813_v3 = vadd.f32 %v1781_v5, %v1713_v51  ;;  %v1383_v22 = vmul.f32 %v5017_v39, %v4430_v14  ;;  %v1482_v16 = vmul.f32 %v5023_v17, %v4438_v24 }
 0x186   : > { %v1314_v15 = vadd.f32 %v1282_v8, %v1214_v35  ;;  %3787 = vmatmul.mubr.msk.bf16.gmra.mrb[16].mxu1 %vm875_vm1, %v1937_v36  ;;  %v1814_v33 = vadd.f32 %v1782_v41, %v1714_v26  ;;  %v1483_v13 = vmul.f32 %v1746_v2, %v4438_v24  ;;  %v1583_v20 = vmul.f32 %v4423_v10, %v5058_v29 }
 0x187   : > { %v1315_v23 = vadd.f32 %v1283_v46, %v1215_v32  ;;  %v1852_v19 = vadd.f32 %v5032_v28, %v1813_v3  ;;  %v1584_v53 = vmul.f32 %v4423_v10, %v5062_v25  ;;  %v1683_v54 = vmul.f32 %v4426_v11, %v5064_v58  ;;  %v5112_v32 = vld [vmem:[#allocation2 + $0x151] sm:$0xff] }
 0x188   : > { %v1414_v37 = vadd.f32 %v1382_v43, %v1314_v15  ;;  %v1853_v59 = vadd.f32 %v5032_v28, %v1814_v33  ;;  %v1684_v34 = vmul.f32 %v4426_v11, %v5070_v50  ;;  %v1783_v62 = vmul.f32 %v4940_v44, %v5072_v52 }
 0x189   : > { %v1415_v60 = vadd.f32 %v1383_v22, %v1315_v23  ;;  %v1884_v5 = vmax.f32 %v1852_v19, 0.0  ;;  %v1016_v12 = vmul.f32 %v5007_v47, %v4388_v27  ;;  %v1017_v30 = vmul.f32 %v5009_v63, %v4388_v27 }
 0x18a   : > { %v1514_v6 = vadd.f32 %v1482_v16, %v1414_v37  ;;  %v1885_v9 = vmax.f32 %v1853_v59, 0.0  ;;  %v1084_v61 = vmul.f32 %v5015_v45, %v4392_v31  ;;  %v1085_v4 = vmul.f32 %v5017_v39, %v4392_v31  ;;  %v5117_v16 = vld [vmem:[#allocation2 + $0x159] sm:$0xff] }
 0x18b   : > { %v1515_v49 = vadd.f32 %v1483_v13, %v1415_v60  ;;  %v1916_v38 = vmin.f32 %v1884_v5, 6.0  ;;  %v1184_v55 = vmul.f32 %v5023_v17, %v4402_v48  ;;  %v1185_v41 = vmul.f32 %v1746_v2, %v4402_v48  ;;  %v5104_v17 = vld [vmem:[#allocation2 + $0x150] sm:$0xff]  ;;  %v5106_v2 = vld [vmem:[#allocation2 + $0x158] sm:$0xff] }
 0x18c   : > { %v1615_v0 = vadd.f32 %v1583_v20, %v1514_v6  ;;  %v1917_v47 = vmin.f32 %v1885_v9, 6.0  ;;  %v1116_v7 = vadd.f32 %v1084_v61, %v1016_v12  ;;  %v1117_v63 = vadd.f32 %v1085_v4, %v1017_v30  ;;  %v1749_v59 = vld [vmem:[#allocation2 + $0x152] sm:$0xff]  ;;  %v1750_v9 = vld [vmem:[#allocation2 + $0x15a] sm:$0xff] }
 0x18d   : > { %v1616_v56 = vadd.f32 %v1584_v53, %v1515_v49  ;;  %v1784_v21 = vmul.f32 %v4940_v44, %v1748_v42  ;;  %v1284_v45 = vmul.f32 %v5058_v29, %v4415_v1  ;;  %v1285_v39 = vmul.f32 %v5062_v25, %v4415_v1 }
 0x18e   : > { %v1715_v40 = vadd.f32 %v1683_v54, %v1615_v0  ;;  %v1938_v57 = vpack.c.bf16 %v1917_v47, %v1916_v38  ;;  %v1216_v35 = vadd.f32 %v1184_v55, %v1116_v7  ;;  %v1217_v8 = vadd.f32 %v1185_v41, %v1117_v63 }
 0x18f   : > { %v1716_v51 = vadd.f32 %v1684_v34, %v1616_v56  ;;  %v1384_v36 = vmul.f32 %v5064_v58, %v4430_v14  ;;  %v1385_v26 = vmul.f32 %v5070_v50, %v4430_v14  ;;  %v1484_v22 = vmul.f32 %v5072_v52, %v4438_v24 }
 0x190   : > { %v1815_v46 = vadd.f32 %v1783_v62, %v1715_v40  ;;  %3790 = vmatprep.mubr.msk.bf16.mxu1 %vm875_vm1, %v1938_v57  ;;  %v1316_v3 = vadd.f32 %v1284_v45, %v1216_v35  ;;  %v1317_v15 = vadd.f32 %v1285_v39, %v1217_v8  ;;  %v1485_v23 = vmul.f32 %v1748_v42, %v4438_v24  ;;  %v5147_v39 = vld [vmem:[#allocation2 + $0x170] sm:$0xff] }
 0x191   : > { %v1816_v43 = vadd.f32 %v1784_v21, %v1716_v51  ;;  %v1585_v13 = vmul.f32 %v4423_v10, %v5104_v17  ;;  %v1586_v20 = vmul.f32 %v4423_v10, %v5106_v2  ;;  %v1685_v54 = vmul.f32 %v4426_v11, %v5112_v32  ;;  %v5155_v35 = vld [vmem:[#allocation2 + $0x169] sm:$0xff] }
 0x192   : > { %v1854_v33 = vadd.f32 %v5032_v28, %v1815_v46  ;;  %v1416_v37 = vadd.f32 %v1384_v36, %v1316_v3  ;;  %v1417_v53 = vadd.f32 %v1385_v26, %v1317_v15  ;;  %v1686_v34 = vmul.f32 %v4426_v11, %v5117_v16 }
 0x193   : > { %v1855_v19 = vadd.f32 %v5032_v28, %v1816_v43  ;;  %v1018_v62 = vmul.f32 %v5058_v29, %v4388_v27  ;;  %v1019_v5 = vmul.f32 %v5062_v25, %v4388_v27  ;;  %v1086_v49 = vmul.f32 %v5064_v58, %v4392_v31  ;;  %v5159_v43 = vld [vmem:[#allocation2 + $0x171] sm:$0xff] }
 0x194   : > { %v1886_v60 = vmax.f32 %v1854_v33, 0.0  ;;  %v1516_v12 = vadd.f32 %v1484_v22, %v1416_v37  ;;  %v1517_v30 = vadd.f32 %v1485_v23, %v1417_v53  ;;  %v1785_v4 = vmul.f32 %v4940_v44, %v1749_v59 }
 0x195   : > { %v1887_v6 = vmax.f32 %v1855_v19, 0.0  ;;  %v1087_v38 = vmul.f32 %v5070_v50, %v4392_v31  ;;  %v1186_v0 = vmul.f32 %v5072_v52, %v4402_v48  ;;  %v1118_v25 = vadd.f32 %v1086_v49, %v1018_v62  ;;  %v5145_v50 = vld [vmem:[#allocation2 + $0x168] sm:$0xff] }
 0x196   : > { %v1918_v61 = vmin.f32 %v1886_v60, 6.0  ;;  %v1617_v55 = vadd.f32 %v1585_v13, %v1516_v12  ;;  %v1618_v41 = vadd.f32 %v1586_v20, %v1517_v30  ;;  %v1786_v47 = vmul.f32 %v4940_v44, %v1750_v9  ;;  %v1751_v30 = vld [vmem:[#allocation2 + $0x16a] sm:$0xff] }
 0x197   : > { %v1919_v29 = vmin.f32 %v1887_v6, 6.0  ;;  %v1119_v56 = vadd.f32 %v1087_v38, %v1019_v5  ;;  %v1187_v7 = vmul.f32 %v1748_v42, %v4402_v48  ;;  %v1286_v58 = vmul.f32 %v5104_v17, %v4415_v1 }
 0x198   : > { %v1717_v40 = vadd.f32 %v1685_v54, %v1617_v55  ;;  %v1718_v21 = vadd.f32 %v1686_v34, %v1618_v41  ;;  %v1218_v45 = vadd.f32 %v1186_v0, %v1118_v25  ;;  %v1287_v57 = vmul.f32 %v5106_v2, %v4415_v1 }
 0x199   : > { %v1939_v63 = vpack.c.bf16 %v1919_v29, %v1918_v61  ;;  %v1219_v52 = vadd.f32 %v1187_v7, %v1119_v56  ;;  %v1386_v51 = vmul.f32 %v5112_v32, %v4430_v14  ;;  %v1387_v42 = vmul.f32 %v5117_v16, %v4430_v14  ;;  %v1752_v29 = vld [vmem:[#allocation2 + $0x172] sm:$0xff]  ;;  %v1553_v7 = vld [vmem:[#allocation2 + $0x180] sm:$0xff] }
 0x19a   : > { %v1817_v8 = vadd.f32 %v1785_v4, %v1717_v40  ;;  %v1818_v46 = vadd.f32 %v1786_v47, %v1718_v21  ;;  %v1318_v36 = vadd.f32 %v1286_v58, %v1218_v45  ;;  %v1486_v26 = vmul.f32 %v1749_v59, %v4438_v24  ;;  %v1554_v21 = vld [vmem:[#allocation2 + $0x188] sm:$0xff] }
 0x19b   : > { %3791 = vmatmul.mubr.msk.bf16.gmra.mrb[20].mxu1 %vm875_vm1, %v1939_v63  ;;  %v1319_v3 = vadd.f32 %v1287_v57, %v1219_v52  ;;  %v1487_v15 = vmul.f32 %v1750_v9, %v4438_v24  ;;  %v1587_v22 = vmul.f32 %v4423_v10, %v5145_v50  ;;  %v1588_v33 = vmul.f32 %v4423_v10, %v5147_v39  ;;  %v1653_v45 = vld [vmem:[#allocation2 + $0x181] sm:$0xff] }
 0x19c   : > { %v1856_v23 = vadd.f32 %v5032_v28, %v1817_v8  ;;  %v1857_v13 = vadd.f32 %v5032_v28, %v1818_v46  ;;  %v1418_v20 = vadd.f32 %v1386_v51, %v1318_v36  ;;  %v1687_v19 = vmul.f32 %v4426_v11, %v5155_v35  ;;  %v1654_v8 = vld [vmem:[#allocation2 + $0x189] sm:$0xff] }
 0x19d   : > { %v1419_v37 = vadd.f32 %v1387_v42, %v1319_v3  ;;  %v1688_v53 = vmul.f32 %v4426_v11, %v5159_v43  ;;  %v1020_v54 = vmul.f32 %v5104_v17, %v4388_v27  ;;  %v1021_v60 = vmul.f32 %v5106_v2, %v4388_v27 }
 0x19e   : > { %v1888_v34 = vmax.f32 %v1856_v23, 0.0  ;;  %v1889_v62 = vmax.f32 %v1857_v13, 0.0  ;;  %v1518_v5 = vadd.f32 %v1486_v26, %v1418_v20  ;;  %v1088_v6 = vmul.f32 %v5112_v32, %v4392_v31 }
 0x19f   : > { %v1519_v12 = vadd.f32 %v1487_v15, %v1419_v37  ;;  %v1089_v49 = vmul.f32 %v5117_v16, %v4392_v31  ;;  %v1188_v61 = vmul.f32 %v1749_v59, %v4402_v48  ;;  %v1189_v4 = vmul.f32 %v1750_v9, %v4402_v48  ;;  %v1753_v37 = vld [vmem:[#allocation2 + $0x182] sm:$0xff] }
 0x1a0   : > { %v1920_v38 = vmin.f32 %v1888_v34, 6.0  ;;  %v1921_v17 = vmin.f32 %v1889_v62, 6.0  ;;  %v1619_v0 = vadd.f32 %v1587_v22, %v1518_v5  ;;  %v1120_v2 = vadd.f32 %v1088_v6, %v1020_v54 }
 0x1a1   : > { %v1620_v55 = vadd.f32 %v1588_v33, %v1519_v12  ;;  %v1121_v41 = vadd.f32 %v1089_v49, %v1021_v60  ;;  %v1288_v25 = vmul.f32 %v5145_v50, %v4415_v1  ;;  %v1289_v32 = vmul.f32 %v5147_v39, %v4415_v1  ;;  %v1754_v12 = vld [vmem:[#allocation2 + $0x18a] sm:$0xff] }
 0x1a2   : > { %v1940_v47 = vpack.c.bf16 %v1921_v17, %v1920_v38  ;;  %v1719_v56 = vadd.f32 %v1687_v19, %v1619_v0  ;;  %v1787_v16 = vmul.f32 %v4940_v44, %v1751_v30  ;;  %v1220_v59 = vadd.f32 %v1188_v61, %v1120_v2 }
 0x1a3   : > { %v1720_v9 = vadd.f32 %v1688_v53, %v1620_v55  ;;  %v1788_v58 = vmul.f32 %v4940_v44, %v1752_v29  ;;  %v1221_v63 = vadd.f32 %v1189_v4, %v1121_v41  ;;  %v1388_v40 = vmul.f32 %v5155_v35, %v4430_v14 }
 0x1a4   : > { %3794 = vmatprep.mubr.msk.bf16.mxu1 %vm875_vm1, %v1940_v47  ;;  %v1819_v52 = vadd.f32 %v1787_v16, %v1719_v56  ;;  %v1320_v57 = vadd.f32 %v1288_v25, %v1220_v59  ;;  %v1389_v51 = vmul.f32 %v5159_v43, %v4430_v14  ;;  %v1488_v42 = vmul.f32 %v1751_v30, %v4438_v24  ;;  %v1555_v47 = vld [vmem:[#allocation2 + $0x198] sm:$0xff] }
 0x1a5   : > { %v1820_v46 = vadd.f32 %v1788_v58, %v1720_v9  ;;  %v1321_v36 = vadd.f32 %v1289_v32, %v1221_v63  ;;  %v1489_v26 = vmul.f32 %v1752_v29, %v4438_v24  ;;  %v1589_v3 = vmul.f32 %v4423_v10, %v1553_v7  ;;  %v1556_v9 = vld [vmem:[#allocation2 + $0x1a0] sm:$0xff] }
 0x1a6   : > { %v1858_v15 = vadd.f32 %v5032_v28, %v1819_v52  ;;  %v1420_v22 = vadd.f32 %v1388_v40, %v1320_v57  ;;  %v1590_v33 = vmul.f32 %v4423_v10, %v1554_v21  ;;  %v1689_v23 = vmul.f32 %v4426_v11, %v1653_v45  ;;  %v1655_v63 = vld [vmem:[#allocation2 + $0x199] sm:$0xff] }
 0x1a7   : > { %v1859_v13 = vadd.f32 %v5032_v28, %v1820_v46  ;;  %v1421_v20 = vadd.f32 %v1389_v51, %v1321_v36  ;;  %v1690_v19 = vmul.f32 %v4426_v11, %v1654_v8  ;;  %v1022_v53 = vmul.f32 %v5145_v50, %v4388_v27  ;;  %v1755_v46 = vld [vmem:[#allocation2 + $0x19a] sm:$0xff] }
 0x1a8   : > { %v1890_v54 = vmax.f32 %v1858_v15, 0.0  ;;  %v1520_v60 = vadd.f32 %v1488_v42, %v1420_v22  ;;  %v1023_v34 = vmul.f32 %v5147_v39, %v4388_v27  ;;  %v1090_v62 = vmul.f32 %v5155_v35, %v4392_v31 }
 0x1a9   : > { %v1891_v5 = vmax.f32 %v1859_v13, 0.0  ;;  %v1521_v6 = vadd.f32 %v1489_v26, %v1421_v20  ;;  %v1091_v49 = vmul.f32 %v5159_v43, %v4392_v31  ;;  %v1190_v61 = vmul.f32 %v1751_v30, %v4402_v48 }
 0x1aa   : > { %v1922_v4 = vmin.f32 %v1890_v54, 6.0  ;;  %v1621_v38 = vadd.f32 %v1589_v3, %v1520_v60  ;;  %v1789_v50 = vmul.f32 %v4940_v44, %v1753_v37  ;;  %v1122_v17 = vadd.f32 %v1090_v62, %v1022_v53 }
 0x1ab   : > { %v1923_v0 = vmin.f32 %v1891_v5, 6.0  ;;  %v1622_v2 = vadd.f32 %v1590_v33, %v1521_v6  ;;  %v1123_v55 = vadd.f32 %v1091_v49, %v1023_v34  ;;  %v1191_v27 = vmul.f32 %v1752_v29, %v4402_v48 }
 0x1ac   : > { %v1721_v39 = vadd.f32 %v1689_v23, %v1621_v38  ;;  %v1790_v35 = vmul.f32 %v4940_v44, %v1754_v12  ;;  %v1222_v41 = vadd.f32 %v1190_v61, %v1122_v17  ;;  %v1290_v25 = vmul.f32 %v1553_v7, %v4415_v1 }
 0x1ad   : > { %v1941_v32 = vpack.c.bf16 %v1923_v0, %v1922_v4  ;;  %v1722_v31 = vadd.f32 %v1690_v19, %v1622_v2  ;;  %v1223_v43 = vadd.f32 %v1191_v27, %v1123_v55  ;;  %v1291_v30 = vmul.f32 %v1554_v21, %v4415_v1  ;;  %v1656_v21 = vld [vmem:[#allocation2 + $0x1a1] sm:$0xff] }
 0x1ae   : > { %v1821_v56 = vadd.f32 %v1789_v50, %v1721_v39  ;;  %v1322_v16 = vadd.f32 %v1290_v25, %v1222_v41  ;;  %v1390_v59 = vmul.f32 %v1653_v45, %v4430_v14  ;;  %v1391_v58 = vmul.f32 %v1654_v8, %v4430_v14  ;;  %v1756_v8 = vld [vmem:[#allocation2 + $0x1a2] sm:$0xff] }
 0x1af   : > { %3795 = vmatmul.mubr.msk.bf16.gmra.mrb[24].mxu1 %vm875_vm1, %v1941_v32  ;;  %v1822_v48 = vadd.f32 %v1790_v35, %v1722_v31  ;;  %v1323_v29 = vadd.f32 %v1291_v30, %v1223_v43  ;;  %v1490_v52 = vmul.f32 %v1753_v37, %v4438_v24  ;;  %v1591_v1 = vmul.f32 %v4423_v10, %v1555_v47 }
 0x1b0   : > { %v1860_v7 = vadd.f32 %v5032_v28, %v1821_v56  ;;  %v1422_v40 = vadd.f32 %v1390_v59, %v1322_v16  ;;  %v1491_v45 = vmul.f32 %v1754_v12, %v4438_v24  ;;  %v1592_v42 = vmul.f32 %v4423_v10, %v1556_v9 }
 0x1b1   : > { %v1861_v57 = vadd.f32 %v5032_v28, %v1822_v48  ;;  %v1423_v51 = vadd.f32 %v1391_v58, %v1323_v29  ;;  %v1691_v14 = vmul.f32 %v4426_v11, %v1655_v63  ;;  %v1692_v22 = vmul.f32 %v4426_v11, %v1656_v21 }
 0x1b2   : > { %v1892_v36 = vmax.f32 %v1860_v7, 0.0  ;;  %v1522_v26 = vadd.f32 %v1490_v52, %v1422_v40  ;;  %v4116_v33 = vmov 0   ;;  %v1791_v24 = vmul.f32 %v4940_v44, %v1755_v46 }
 0x1b3   : > { %v1893_v3 = vmax.f32 %v1861_v57, 0.0  ;;  %v1523_v15 = vadd.f32 %v1491_v45, %v1423_v51  ;;  %2680 = vmatprep.subr.bf16.mxu0 %v4116_v33  ;;  %3845 = vmatprep.subr.bf16.mxu1 %v4116_v33  ;;  %v1792_v19 = vmul.f32 %v4940_v44, %v1756_v8  ;;  %v5237_v44 = vld [vmem:[%s5812_s6] ss:$0 sm:$0xff] }
 0x1b4   : > { %v1623_v23 = vadd.f32 %v1591_v1, %v1522_v26  ;;  %v1924_v13 = vmin.f32 %v1892_v36, 6.0  ;;  %v3941_v36 = vld [vmem:[%s5813_s7 + $0x4] ss:$8 sps:$4 sm:$0xff]  }
 0x1b5   : > { %v1925_v10 = vmin.f32 %v1893_v3, 6.0  ;;  %v1624_v20 = vadd.f32 %v1592_v42, %v1523_v15  ;;  %v3944_v26 = vld [vmem:[%s5813_s7 + $0x104] ss:$8 sps:$4 sm:$0xff]   ;;  %2712 = vmatprep.mubr.bf16.mxu0 %v3941_v36 }
 0x1b6   : > { %v1723_v37 = vadd.f32 %v1691_v14, %v1623_v23 }
 0x1b7   : > { %v1942_v53 = vpack.c.bf16 %v1925_v10, %v1924_v13  ;;  %v1724_v54 = vadd.f32 %v1692_v22, %v1624_v20 }
 0x1b8   : > { %v1823_v60 = vadd.f32 %v1791_v24, %v1723_v37 }
 0x1b9   : > { %3798 = vmatprep.mubr.msk.bf16.mxu1 %vm875_vm1, %v1942_v53  ;;  %v1824_v11 = vadd.f32 %v1792_v19, %v1724_v54 }
 0x1ba   : > { %v1862_v34 = vadd.f32 %v5032_v28, %v1823_v60 }
 0x1bb   : > { %v1863_v62 = vadd.f32 %v5032_v28, %v1824_v11 }
 0x1bc   : > { %v1894_v5 = vmax.f32 %v1862_v34, 0.0 }
 0x1bd   : > { %v1895_v6 = vmax.f32 %v1863_v62, 0.0 }
 0x1be   : > { %v1926_v12 = vmin.f32 %v1894_v5, 6.0 }
 0x1bf   : > { %v1927_v49 = vmin.f32 %v1895_v6, 6.0 }
 0x1c1   : > { %v1943_v61 = vpack.c.bf16 %v1927_v49, %v1926_v12 }
 0x1c3   : > { %3799 = vmatmul.mubr.msk.bf16.gmra.mrb[28].mxu1 %vm875_vm1, %v1943_v61 }
 0x1c4   : > { %2840 = vmatprep.mubr.bf16.mxu1 %v3944_v26 }
 0x1fa   : > { %v3772_v4 = vpop.f32.mrb[0].mxu1 }
 0x1fb   : > { %v2050_v38 = vadd.f32 %v3772_v4, %v5237_v44  ;;  %v2041_v50 = vpop.f32.mrb[1].mxu1 }
 0x1fc   : > { %v2042_v17 = vadd.f32 %v5237_v44, %v2041_v50  ;;  %v3773_v0 = vpop.f32.mrb[2].mxu1 }
 0x1fd   : > { %v2170_v28 = vmax.f32 %v2050_v38, 0.0  ;;  %v2053_v2 = vadd.f32 %v3773_v0, %v5237_v44  ;;  %v2044_v55 = vpop.f32.mrb[3].mxu1 }
 0x1fe   : > { %v2168_v27 = vmax.f32 %v2042_v17, 0.0  ;;  %v2045_v39 = vadd.f32 %v5237_v44, %v2044_v55 }
 0x1ff   : > { %v2171_v35 = vmax.f32 %v2053_v2, 0.0  ;;  %v2202_v25 = vmin.f32 %v2170_v28, 6.0 }
 0x200   : > { %v2169_v41 = vmax.f32 %v2045_v39, 0.0  ;;  %v2200_v31 = vmin.f32 %v2168_v27, 6.0 }
 0x201   : > { %v2203_v32 = vmin.f32 %v2171_v35, 6.0 }
 0x202   : > { %v2201_v43 = vmin.f32 %v2169_v41, 6.0 }
 0x203   : > { %v2305_v30 = vpack.c.bf16 %v2203_v32, %v2202_v25 }
 0x204   : > { %v2304_v47 = vpack.c.bf16 %v2201_v43, %v2200_v31 }
 0x206   : > { %2681 = vmatpush1.bf16.msra.mxu0 %v2304_v47  ;;  %3861 = vmatpush1.bf16.msra.mxu1 %v2304_v47 }
 0x207   : > { %2682 = vmatprep.subr.bf16.mxu0 %v4116_v33  ;;  %3846 = vmatprep.subr.bf16.mxu1 %v4116_v33 }
 0x20a   : > { %2683 = vmatpush1.bf16.msra.mxu0 %v2305_v30  ;;  %3862 = vmatpush1.bf16.msra.mxu1 %v2305_v30 }
 0x20b   : > { %2684 = vmatprep.subr.bf16.mxu0 %v4116_v33  ;;  %3847 = vmatprep.subr.bf16.mxu1 %v4116_v33 }
 0x219   : > { %v3776_v56 = vpop.f32.mrb[4].mxu1 }
 0x21a   : > { %v2066_v16 = vadd.f32 %v3776_v56, %v5237_v44  ;;  %v2057_v59 = vpop.f32.mrb[5].mxu1 }
 0x21b   : > { %v2058_v9 = vadd.f32 %v5237_v44, %v2057_v59  ;;  %v3777_v48 = vpop.f32.mrb[6].mxu1 }
 0x21c   : > { %v2174_v29 = vmax.f32 %v2066_v16, 0.0  ;;  %v2069_v58 = vadd.f32 %v3777_v48, %v5237_v44  ;;  %v2060_v63 = vpop.f32.mrb[7].mxu1 }
 0x21d   : > { %v2172_v7 = vmax.f32 %v2058_v9, 0.0  ;;  %v2061_v40 = vadd.f32 %v5237_v44, %v2060_v63 }
 0x21e   : > { %v2175_v52 = vmax.f32 %v2069_v58, 0.0  ;;  %v2206_v21 = vmin.f32 %v2174_v29, 6.0 }
 0x21f   : > { %v2173_v1 = vmax.f32 %v2061_v40, 0.0  ;;  %v2204_v51 = vmin.f32 %v2172_v7, 6.0 }
 0x220   : > { %v2207_v57 = vmin.f32 %v2175_v52, 6.0 }
 0x221   : > { %v2205_v45 = vmin.f32 %v2173_v1, 6.0 }
 0x222   : > { %v2307_v42 = vpack.c.bf16 %v2207_v57, %v2206_v21 }
 0x223   : > { %v2306_v46 = vpack.c.bf16 %v2205_v45, %v2204_v51 }
 0x225   : > { %2685 = vmatpush1.bf16.msra.mxu0 %v2306_v46  ;;  %3863 = vmatpush1.bf16.msra.mxu1 %v2306_v46 }
 0x226   : > { %2686 = vmatprep.subr.bf16.mxu0 %v4116_v33  ;;  %3848 = vmatprep.subr.bf16.mxu1 %v4116_v33 }
 0x229   : > { %2687 = vmatpush1.bf16.msra.mxu0 %v2307_v42  ;;  %3864 = vmatpush1.bf16.msra.mxu1 %v2307_v42 }
 0x22a   : > { %2688 = vmatprep.subr.bf16.mxu0 %v4116_v33  ;;  %3849 = vmatprep.subr.bf16.mxu1 %v4116_v33 }
 0x232   : > { %v3780_v14 = vpop.f32.mrb[8].mxu1 }
 0x233   : > { %v2082_v8 = vadd.f32 %v3780_v14, %v5237_v44  ;;  %v2073_v3 = vpop.f32.mrb[9].mxu1 }
 0x234   : > { %v2074_v15 = vadd.f32 %v5237_v44, %v2073_v3  ;;  %v3781_v22 = vpop.f32.mrb[10].mxu1 }
 0x235   : > { %v2178_v23 = vmax.f32 %v2082_v8, 0.0  ;;  %v2085_v24 = vadd.f32 %v3781_v22, %v5237_v44  ;;  %v2076_v13 = vpop.f32.mrb[11].mxu1 }
 0x236   : > { %v2176_v10 = vmax.f32 %v2074_v15, 0.0  ;;  %v2077_v20 = vadd.f32 %v5237_v44, %v2076_v13 }
 0x237   : > { %v2179_v19 = vmax.f32 %v2085_v24, 0.0  ;;  %v2210_v53 = vmin.f32 %v2178_v23, 6.0 }
 0x238   : > { %v2177_v37 = vmax.f32 %v2077_v20, 0.0  ;;  %v2208_v60 = vmin.f32 %v2176_v10, 6.0 }
 0x239   : > { %v2211_v54 = vmin.f32 %v2179_v19, 6.0 }
 0x23a   : > { %v2209_v11 = vmin.f32 %v2177_v37, 6.0 }
 0x23b   : > { %v2309_v34 = vpack.c.bf16 %v2211_v54, %v2210_v53 }
 0x23c   : > { %v2308_v62 = vpack.c.bf16 %v2209_v11, %v2208_v60 }
 0x23e   : > { %2689 = vmatpush1.bf16.msra.mxu0 %v2308_v62  ;;  %3865 = vmatpush1.bf16.msra.mxu1 %v2308_v62 }
 0x23f   : > { %2690 = vmatprep.subr.bf16.mxu0 %v4116_v33  ;;  %3850 = vmatprep.subr.bf16.mxu1 %v4116_v33 }
 0x242   : > { %2691 = vmatpush1.bf16.msra.mxu0 %v2309_v34  ;;  %3866 = vmatpush1.bf16.msra.mxu1 %v2309_v34 }
 0x243   : > { %2692 = vmatprep.subr.bf16.mxu0 %v4116_v33  ;;  %3851 = vmatprep.subr.bf16.mxu1 %v4116_v33  ;;  %v3784_v5 = vpop.f32.mrb[12].mxu1 }
 0x244   : > { %v2098_v6 = vadd.f32 %v3784_v5, %v5237_v44  ;;  %v2089_v12 = vpop.f32.mrb[13].mxu1 }
 0x245   : > { %v2090_v49 = vadd.f32 %v5237_v44, %v2089_v12  ;;  %v3785_v61 = vpop.f32.mrb[14].mxu1 }
 0x246   : > { %v2182_v4 = vmax.f32 %v2098_v6, 0.0  ;;  %v2101_v38 = vadd.f32 %v3785_v61, %v5237_v44  ;;  %v2092_v50 = vpop.f32.mrb[15].mxu1 }
 0x247   : > { %v2180_v17 = vmax.f32 %v2090_v49, 0.0  ;;  %v2093_v0 = vadd.f32 %v5237_v44, %v2092_v50 }
 0x248   : > { %v2183_v28 = vmax.f32 %v2101_v38, 0.0  ;;  %v2214_v55 = vmin.f32 %v2182_v4, 6.0 }
 0x249   : > { %v2181_v2 = vmax.f32 %v2093_v0, 0.0  ;;  %v2212_v39 = vmin.f32 %v2180_v17, 6.0 }
 0x24a   : > { %v2215_v27 = vmin.f32 %v2183_v28, 6.0 }
 0x24b   : > { %v2213_v35 = vmin.f32 %v2181_v2, 6.0 }
 0x24c   : > { %v2311_v41 = vpack.c.bf16 %v2215_v27, %v2214_v55 }
 0x24d   : > { %v2310_v25 = vpack.c.bf16 %v2213_v35, %v2212_v39 }
 0x24f   : > { %2693 = vmatpush1.bf16.msra.mxu0 %v2310_v25  ;;  %3867 = vmatpush1.bf16.msra.mxu1 %v2310_v25 }
 0x250   : > { %2694 = vmatprep.subr.bf16.mxu0 %v4116_v33  ;;  %3852 = vmatprep.subr.bf16.mxu1 %v4116_v33 }
 0x253   : > { %2695 = vmatpush1.bf16.msra.mxu0 %v2311_v41  ;;  %3868 = vmatpush1.bf16.msra.mxu1 %v2311_v41 }
 0x254   : > { %2696 = vmatprep.subr.bf16.mxu0 %v4116_v33  ;;  %3853 = vmatprep.subr.bf16.mxu1 %v4116_v33 }
 0x259   : > { %v3788_v32 = vpop.f32.mrb[16].mxu1 }
 0x25a   : > { %v2114_v31 = vadd.f32 %v3788_v32, %v5237_v44  ;;  %v2105_v43 = vpop.f32.mrb[17].mxu1 }
 0x25b   : > { %v2106_v30 = vadd.f32 %v5237_v44, %v2105_v43  ;;  %v3789_v47 = vpop.f32.mrb[18].mxu1 }
 0x25c   : > { %v2186_v56 = vmax.f32 %v2114_v31, 0.0  ;;  %v2117_v16 = vadd.f32 %v3789_v47, %v5237_v44  ;;  %v2108_v59 = vpop.f32.mrb[19].mxu1 }
 0x25d   : > { %v2184_v9 = vmax.f32 %v2106_v30, 0.0  ;;  %v2109_v48 = vadd.f32 %v5237_v44, %v2108_v59 }
 0x25e   : > { %v2187_v29 = vmax.f32 %v2117_v16, 0.0  ;;  %v2218_v63 = vmin.f32 %v2186_v56, 6.0 }
 0x25f   : > { %v2185_v58 = vmax.f32 %v2109_v48, 0.0  ;;  %v2216_v40 = vmin.f32 %v2184_v9, 6.0 }
 0x260   : > { %v2219_v7 = vmin.f32 %v2187_v29, 6.0 }
 0x261   : > { %v2217_v52 = vmin.f32 %v2185_v58, 6.0  ;;  %v3939_v58 = vld [vmem:[%s5813_s7] ss:$8 sps:$4 sm:$0xff]  }
 0x262   : > { %v2313_v1 = vpack.c.bf16 %v2219_v7, %v2218_v63  ;;  %v3945_v63 = vld [vmem:[%s5813_s7 + $0x14] ss:$8 sps:$4 sm:$0xff]  }
 0x263   : > { %v2312_v21 = vpack.c.bf16 %v2217_v52, %v2216_v40  ;;  %v3947_v7 = vld [vmem:[%s5813_s7 + $0x114] ss:$8 sps:$4 sm:$0xff]   ;;  %v3950_v40 = vld [vmem:[%s5813_s7 + $0x110] ss:$8 sps:$4 sm:$0xff]   ;;  %v3951_v52 = vld [vmem:[%s5813_s7 + $0x24] ss:$8 sps:$4 sm:$0xff]  }
 0x265   : > { %2697 = vmatpush1.bf16.msra.mxu0 %v2312_v21  ;;  %3869 = vmatpush1.bf16.msra.mxu1 %v2312_v21  ;;  %v3955_v21 = vld [vmem:[%s5813_s7 + $0x20] ss:$8 sps:$4 sm:$0xff]  }
 0x266   : > { %2698 = vmatprep.subr.bf16.mxu0 %v4116_v33  ;;  %3854 = vmatprep.subr.bf16.mxu1 %v4116_v33 }
 0x269   : > { %2699 = vmatpush1.bf16.msra.mxu0 %v2313_v1  ;;  %3870 = vmatpush1.bf16.msra.mxu1 %v2313_v1  ;;  %v3953_v1 = vld [vmem:[%s5813_s7 + $0x124] ss:$8 sps:$4 sm:$0xff]  }
 0x26a   : > { %2700 = vmatprep.subr.bf16.mxu0 %v4116_v33  ;;  %3855 = vmatprep.subr.bf16.mxu1 %v4116_v33 }
 0x26e   : > { %v3792_v57 = vpop.f32.mrb[20].mxu1 }
 0x26f   : > { %v2130_v51 = vadd.f32 %v3792_v57, %v5237_v44  ;;  %v2121_v45 = vpop.f32.mrb[21].mxu1  ;;  %v3956_v57 = vld [vmem:[%s5813_s7 + $0x120] ss:$8 sps:$4 sm:$0xff]  }
 0x270   : > { %v2122_v42 = vadd.f32 %v5237_v44, %v2121_v45  ;;  %v3793_v46 = vpop.f32.mrb[22].mxu1  ;;  %v3959_v45 = vld [vmem:[%s5813_s7 + $0x134] ss:$8 sps:$4 sm:$0xff]  }
 0x271   : > { %v2190_v36 = vmax.f32 %v2130_v51, 0.0  ;;  %v2133_v26 = vadd.f32 %v3793_v46, %v5237_v44  ;;  %v2124_v14 = vpop.f32.mrb[23].mxu1  ;;  %v3957_v51 = vld [vmem:[%s5813_s7 + $0x34] ss:$8 sps:$4 sm:$0xff]   ;;  %v3962_v46 = vld [vmem:[%s5813_s7 + $0x130] ss:$8 sps:$4 sm:$0xff]  }
 0x272   : > { %v2188_v8 = vmax.f32 %v2122_v42, 0.0  ;;  %v2125_v3 = vadd.f32 %v5237_v44, %v2124_v14  ;;  %v3961_v42 = vld [vmem:[%s5813_s7 + $0x30] ss:$8 sps:$4 sm:$0xff]   ;;  %v3967_v14 = vld [vmem:[%s5813_s7 + $0x40] ss:$8 sps:$4 sm:$0xff]  }
 0x273   : > { %v2191_v15 = vmax.f32 %v2133_v26, 0.0  ;;  %v2222_v23 = vmin.f32 %v2190_v36, 6.0  ;;  %v3963_v36 = vld [vmem:[%s5813_s7 + $0x44] ss:$8 sps:$4 sm:$0xff]  }
 0x274   : > { %v2189_v22 = vmax.f32 %v2125_v3, 0.0  ;;  %v2220_v13 = vmin.f32 %v2188_v8, 6.0  ;;  %v3965_v26 = vld [vmem:[%s5813_s7 + $0x144] ss:$8 sps:$4 sm:$0xff]   ;;  %v3968_v8 = vld [vmem:[%s5813_s7 + $0x140] ss:$8 sps:$4 sm:$0xff]  }
 0x275   : > { %v2223_v24 = vmin.f32 %v2191_v15, 6.0  ;;  %v3969_v3 = vld [vmem:[%s5813_s7 + $0x54] ss:$8 sps:$4 sm:$0xff]  }
 0x276   : > { %v2221_v10 = vmin.f32 %v2189_v22, 6.0  ;;  %v3971_v15 = vld [vmem:[%s5813_s7 + $0x154] ss:$8 sps:$4 sm:$0xff]   ;;  %v3973_v22 = vld [vmem:[%s5813_s7 + $0x50] ss:$8 sps:$4 sm:$0xff]  }
 0x277   : > { %v2315_v20 = vpack.c.bf16 %v2223_v24, %v2222_v23  ;;  %v3974_v23 = vld [vmem:[%s5813_s7 + $0x150] ss:$8 sps:$4 sm:$0xff]   ;;  %v3975_v24 = vld [vmem:[%s5813_s7 + $0x64] ss:$8 sps:$4 sm:$0xff]  }
 0x278   : > { %v2314_v19 = vpack.c.bf16 %v2221_v10, %v2220_v13  ;;  %v3977_v13 = vld [vmem:[%s5813_s7 + $0x164] ss:$8 sps:$4 sm:$0xff]   ;;  %v3979_v10 = vld [vmem:[%s5813_s7 + $0x60] ss:$8 sps:$4 sm:$0xff]  }
 0x27a   : > { %2701 = vmatpush1.bf16.msra.mxu0 %v2314_v19  ;;  %3871 = vmatpush1.bf16.msra.mxu1 %v2314_v19  ;;  %v3981_v19 = vld [vmem:[%s5813_s7 + $0x74] ss:$8 sps:$4 sm:$0xff]  }
 0x27b   : > { %2702 = vmatprep.subr.bf16.mxu0 %v4116_v33  ;;  %3856 = vmatprep.subr.bf16.mxu1 %v4116_v33 }
 0x27e   : > { %2703 = vmatpush1.bf16.msra.mxu0 %v2315_v20  ;;  %3872 = vmatpush1.bf16.msra.mxu1 %v2315_v20  ;;  %v3980_v20 = vld [vmem:[%s5813_s7 + $0x160] ss:$8 sps:$4 sm:$0xff]  }
 0x27f   : > { %2704 = vmatprep.subr.bf16.mxu0 %v4116_v33  ;;  %3857 = vmatprep.subr.bf16.mxu1 %v4116_v33 }
 0x282   : > { %v3796_v37 = vpop.f32.mrb[24].mxu1 }
 0x283   : > { %v2146_v53 = vadd.f32 %v3796_v37, %v5237_v44  ;;  %v2137_v54 = vpop.f32.mrb[25].mxu1  ;;  %v3983_v37 = vld [vmem:[%s5813_s7 + $0x174] ss:$8 sps:$4 sm:$0xff]  }
 0x284   : > { %v2138_v60 = vadd.f32 %v5237_v44, %v2137_v54  ;;  %v3797_v11 = vpop.f32.mrb[26].mxu1  ;;  %v3986_v54 = vld [vmem:[%s5813_s7 + $0x170] ss:$8 sps:$4 sm:$0xff]  }
 0x285   : > { %v2194_v34 = vmax.f32 %v2146_v53, 0.0  ;;  %v2149_v62 = vadd.f32 %v3797_v11, %v5237_v44  ;;  %v2140_v5 = vpop.f32.mrb[27].mxu1  ;;  %v3985_v53 = vld [vmem:[%s5813_s7 + $0x70] ss:$8 sps:$4 sm:$0xff]   ;;  %v3989_v11 = vld [vmem:[%s5813_s7 + $0x184] ss:$8 sps:$4 sm:$0xff]  }
 0x286   : > { %v2192_v6 = vmax.f32 %v2138_v60, 0.0  ;;  %v2141_v12 = vadd.f32 %v5237_v44, %v2140_v5  ;;  %v3987_v60 = vld [vmem:[%s5813_s7 + $0x84] ss:$8 sps:$4 sm:$0xff]   ;;  %v3993_v5 = vld [vmem:[%s5813_s7 + $0x94] ss:$8 sps:$4 sm:$0xff]  }
 0x287   : > { %v2195_v49 = vmax.f32 %v2149_v62, 0.0  ;;  %v2226_v4 = vmin.f32 %v2194_v34, 6.0  ;;  %v3991_v34 = vld [vmem:[%s5813_s7 + $0x80] ss:$8 sps:$4 sm:$0xff]  }
 0x288   : > { %v2193_v61 = vmax.f32 %v2141_v12, 0.0  ;;  %v2224_v50 = vmin.f32 %v2192_v6, 6.0  ;;  %v3992_v62 = vld [vmem:[%s5813_s7 + $0x180] ss:$8 sps:$4 sm:$0xff]   ;;  %v3995_v6 = vld [vmem:[%s5813_s7 + $0x194] ss:$8 sps:$4 sm:$0xff]  }
 0x289   : > { %v2227_v38 = vmin.f32 %v2195_v49, 6.0  ;;  %v3997_v12 = vld [vmem:[%s5813_s7 + $0x90] ss:$8 sps:$4 sm:$0xff]  }
 0x28a   : > { %v2225_v17 = vmin.f32 %v2193_v61, 6.0  ;;  %v3998_v49 = vld [vmem:[%s5813_s7 + $0x190] ss:$8 sps:$4 sm:$0xff]   ;;  %v3999_v61 = vld [vmem:[%s5813_s7 + $0xa4] ss:$8 sps:$4 sm:$0xff]  }
 0x28b   : > { %v2317_v0 = vpack.c.bf16 %v2227_v38, %v2226_v4  ;;  %v4001_v4 = vld [vmem:[%s5813_s7 + $0x1a4] ss:$8 sps:$4 sm:$0xff]   ;;  %v4003_v38 = vld [vmem:[%s5813_s7 + $0xa0] ss:$8 sps:$4 sm:$0xff]  }
 0x28c   : > { %v2316_v28 = vpack.c.bf16 %v2225_v17, %v2224_v50  ;;  %v4004_v50 = vld [vmem:[%s5813_s7 + $0x1a0] ss:$8 sps:$4 sm:$0xff]   ;;  %v4005_v17 = vld [vmem:[%s5813_s7 + $0xb4] ss:$8 sps:$4 sm:$0xff]  }
 0x28e   : > { %2705 = vmatpush1.bf16.msra.mxu0 %v2316_v28  ;;  %3873 = vmatpush1.bf16.msra.mxu1 %v2316_v28  ;;  %v4009_v28 = vld [vmem:[%s5813_s7 + $0xb0] ss:$8 sps:$4 sm:$0xff]  }
 0x28f   : > { %2706 = vmatprep.subr.bf16.mxu0 %v4116_v33  ;;  %3858 = vmatprep.subr.bf16.mxu1 %v4116_v33 }
 0x292   : > { %2707 = vmatpush1.bf16.msra.mxu0 %v2317_v0  ;;  %3874 = vmatpush1.bf16.msra.mxu1 %v2317_v0  ;;  %v4007_v0 = vld [vmem:[%s5813_s7 + $0x1b4] ss:$8 sps:$4 sm:$0xff]  }
 0x293   : > { %2708 = vmatprep.subr.bf16.mxu0 %v4116_v33  ;;  %3859 = vmatprep.subr.bf16.mxu1 %v4116_v33 }
 0x296   : > { %v3800_v2 = vpop.f32.mrb[28].mxu1 }
 0x297   : > { %v2162_v55 = vadd.f32 %v3800_v2, %v5237_v44  ;;  %v2153_v27 = vpop.f32.mrb[29].mxu1  ;;  %v4010_v2 = vld [vmem:[%s5813_s7 + $0x1b0] ss:$8 sps:$4 sm:$0xff]  }
 0x298   : > { %v2154_v39 = vadd.f32 %v5237_v44, %v2153_v27  ;;  %v3801_v35 = vpop.f32.mrb[30].mxu1  ;;  %v4013_v27 = vld [vmem:[%s5813_s7 + $0x1c4] ss:$8 sps:$4 sm:$0xff]  }
 0x299   : > { %v2198_v41 = vmax.f32 %v2162_v55, 0.0  ;;  %v2165_v25 = vadd.f32 %v3801_v35, %v5237_v44  ;;  %v2156_v32 = vpop.f32.mrb[31].mxu1  ;;  %v4011_v55 = vld [vmem:[%s5813_s7 + $0xc4] ss:$8 sps:$4 sm:$0xff]   ;;  %v4016_v35 = vld [vmem:[%s5813_s7 + $0x1c0] ss:$8 sps:$4 sm:$0xff]  }
 0x29a   : > { %v2196_v31 = vmax.f32 %v2154_v39, 0.0  ;;  %v2157_v43 = vadd.f32 %v5237_v44, %v2156_v32  ;;  %v3942_v44 = vld [vmem:[%s5813_s7 + $0x100] ss:$8 sps:$4 sm:$0xff]   ;;  %v4021_v32 = vld [vmem:[%s5813_s7 + $0xd0] ss:$8 sps:$4 sm:$0xff]  }
 0x29b   : > { %v2199_v30 = vmax.f32 %v2165_v25, 0.0  ;;  %v2230_v56 = vmin.f32 %v2198_v41, 6.0  ;;  %v4015_v39 = vld [vmem:[%s5813_s7 + $0xc0] ss:$8 sps:$4 sm:$0xff]   ;;  %v4017_v41 = vld [vmem:[%s5813_s7 + $0xd4] ss:$8 sps:$4 sm:$0xff]  }
 0x29c   : > { %v2197_v47 = vmax.f32 %v2157_v43, 0.0  ;;  %v2228_v59 = vmin.f32 %v2196_v31, 6.0  ;;  %v4019_v25 = vld [vmem:[%s5813_s7 + $0x1d4] ss:$8 sps:$4 sm:$0xff]   ;;  %v4022_v31 = vld [vmem:[%s5813_s7 + $0x1d0] ss:$8 sps:$4 sm:$0xff]  }
 0x29d   : > { %v2231_v16 = vmin.f32 %v2199_v30, 6.0  ;;  %v4023_v43 = vld [vmem:[%s5813_s7 + $0xe4] ss:$8 sps:$4 sm:$0xff]  }
 0x29e   : > { %v2229_v9 = vmin.f32 %v2197_v47, 6.0  ;;  %v4025_v30 = vld [vmem:[%s5813_s7 + $0x1e4] ss:$8 sps:$4 sm:$0xff]   ;;  %v4027_v47 = vld [vmem:[%s5813_s7 + $0xe0] ss:$8 sps:$4 sm:$0xff]  }
 0x29f   : > { %v2319_v48 = vpack.c.bf16 %v2231_v16, %v2230_v56  ;;  %v4028_v56 = vld [vmem:[%s5813_s7 + $0x1e0] ss:$8 sps:$4 sm:$0xff]   ;;  %v4029_v16 = vld [vmem:[%s5813_s7 + $0xf4] ss:$8 sps:$4 sm:$0xff]  }
 0x2a0   : > { %v2318_v29 = vpack.c.bf16 %v2229_v9, %v2228_v59  ;;  %v4031_v59 = vld [vmem:[%s5813_s7 + $0x1f4] ss:$8 sps:$4 sm:$0xff]   ;;  %v4047_v9 = vld [vmem:[%s5816_s10] sm:$0xff]  }
 0x2a2   : > { %2709 = vmatpush1.bf16.msra.mxu0 %v2318_v29  ;;  %3875 = vmatpush1.bf16.msra.mxu1 %v2318_v29  ;;  %v4034_v29 = vld [vmem:[%s5813_s7 + $0x1f0] ss:$8 sps:$4 sm:$0xff]  }
 0x2a3   : > { %2710 = vmatprep.subr.bf16.mxu0 %v4116_v33  ;;  %3860 = vmatprep.subr.bf16.mxu1 %v4116_v33  ;;  %v3949_v33 = vld [vmem:[%s5813_s7 + $0x10] ss:$8 sps:$4 sm:$0xff]  }
 0x2a6   : > { %2711 = vmatpush1.bf16.msra.mxu0 %v2319_v48  ;;  %3876 = vmatpush1.bf16.msra.mxu1 %v2319_v48  ;;  %v4033_v48 = vld [vmem:[%s5813_s7 + $0xf0] ss:$8 sps:$4 sm:$0xff]  }
 0x2a7   : > { %3802 = vmatprep.subr.bf16.mxu0 %v4047_v9 }
 0x2a9   : > { %2713 = vmatmul.mubr.bf16.vlgmr.msra.gmra.mrb[32].mxu0 %v3939_v58  ;;  %2841 = vmatmul.mubr.bf16.vlgmr.msra.gmra.mrb[32].mxu1 %v3942_v44  ;;  %v4035_v58 = vld [vmem:[%s5813_s7 + $0x204] ss:$8 sps:$4 sm:$0xff]   ;;  %v4037_v44 = vld [vmem:[%s5813_s7 + $0x200] ss:$8 sps:$4 sm:$0xff]  }
 0x2aa   : > { %2720 = vmatprep.mubr.bf16.mxu0 %v3945_v63  ;;  %2848 = vmatprep.mubr.bf16.mxu1 %v3947_v7  ;;  %v4038_v63 = vld [vmem:[%s5813_s7 + $0x214] ss:$8 sps:$4 sm:$0xff]   ;;  %v4040_v7 = vld [vmem:[%s5813_s7 + $0x210] ss:$8 sps:$4 sm:$0xff]  }
 0x2ab   : > { %3803 = vmatpush3.bf16.msra.mxu0 %v4047_v9 }
 0x2b1   : > { %2721 = vmatmul.mubr.bf16.gmra.mrb[36].mxu0 %v3949_v33  ;;  %2849 = vmatmul.mubr.bf16.gmra.mrb[36].mxu1 %v3950_v40  ;;  %v4041_v33 = vld [vmem:[%s5813_s7 + $0x224] ss:$8 sps:$4 sm:$0xff]   ;;  %v4043_v40 = vld [vmem:[%s5813_s7 + $0x220] ss:$8 sps:$4 sm:$0xff]  }
 0x2b2   : > { %2728 = vmatprep.mubr.bf16.mxu0 %v3951_v52  ;;  %2856 = vmatprep.mubr.bf16.mxu1 %v3953_v1  ;;  %v4044_v52 = vld [vmem:[%s5813_s7 + $0x234] ss:$8 sps:$4 sm:$0xff]   ;;  %v4046_v1 = vld [vmem:[%s5813_s7 + $0x230] ss:$8 sps:$4 sm:$0xff]  }
 0x2b9   : > { %2729 = vmatmul.mubr.bf16.gmra.mrb[40].mxu0 %v3955_v21  ;;  %2857 = vmatmul.mubr.bf16.gmra.mrb[40].mxu1 %v3956_v57  ;;  %v4048_v21 = vld [vmem:[%s5816_s10 + $0x8] sm:$0xff]  }
 0x2ba   : > { %2736 = vmatprep.mubr.bf16.mxu0 %v3957_v51  ;;  %2864 = vmatprep.mubr.bf16.mxu1 %v3959_v45 }
 0x2bb   : > { %3804 = vmatprep.subr.bf16.mxu0 %v4048_v21 }
 0x2bc   : > { %3805 = vmatpush3.bf16.msra.mxu0 %v4048_v21 }
 0x2c1   : > { %2737 = vmatmul.mubr.bf16.gmra.mrb[44].mxu0 %v3961_v42  ;;  %2865 = vmatmul.mubr.bf16.gmra.mrb[44].mxu1 %v3962_v46 }
 0x2c2   : > { %2744 = vmatprep.mubr.bf16.mxu0 %v3963_v36  ;;  %2872 = vmatprep.mubr.bf16.mxu1 %v3965_v26 }
 0x2c9   : > { %2745 = vmatmul.mubr.bf16.gmra.mrb[48].mxu0 %v3967_v14  ;;  %2873 = vmatmul.mubr.bf16.gmra.mrb[48].mxu1 %v3968_v8 }
 0x2ca   : > { %2752 = vmatprep.mubr.bf16.mxu0 %v3969_v3  ;;  %2880 = vmatprep.mubr.bf16.mxu1 %v3971_v15 }
 0x2d1   : > { %2753 = vmatmul.mubr.bf16.gmra.mrb[52].mxu0 %v3973_v22  ;;  %2881 = vmatmul.mubr.bf16.gmra.mrb[52].mxu1 %v3974_v23 }
 0x2d2   : > { %2760 = vmatprep.mubr.bf16.mxu0 %v3975_v24  ;;  %2888 = vmatprep.mubr.bf16.mxu1 %v3977_v13 }
 0x2d9   : > { %2761 = vmatmul.mubr.bf16.gmra.mrb[56].mxu0 %v3979_v10  ;;  %2889 = vmatmul.mubr.bf16.gmra.mrb[56].mxu1 %v3980_v20 }
 0x2da   : > { %2768 = vmatprep.mubr.bf16.mxu0 %v3981_v19  ;;  %2896 = vmatprep.mubr.bf16.mxu1 %v3983_v37 }
 0x2e1   : > { %2769 = vmatmul.mubr.bf16.gmra.mrb[60].mxu0 %v3985_v53  ;;  %2897 = vmatmul.mubr.bf16.gmra.mrb[60].mxu1 %v3986_v54 }
 0x2e2   : > { %2776 = vmatprep.mubr.bf16.mxu0 %v3987_v60  ;;  %2904 = vmatprep.mubr.bf16.mxu1 %v3989_v11 }
 0x2e9   : > { %2777 = vmatmul.mubr.bf16.gmra.mrb[64].mxu0 %v3991_v34  ;;  %2905 = vmatmul.mubr.bf16.gmra.mrb[64].mxu1 %v3992_v62 }
 0x2ea   : > { %2784 = vmatprep.mubr.bf16.mxu0 %v3993_v5  ;;  %2912 = vmatprep.mubr.bf16.mxu1 %v3995_v6 }
 0x2f1   : > { %2785 = vmatmul.mubr.bf16.gmra.mrb[68].mxu0 %v3997_v12  ;;  %2913 = vmatmul.mubr.bf16.gmra.mrb[68].mxu1 %v3998_v49 }
 0x2f2   : > { %2792 = vmatprep.mubr.bf16.mxu0 %v3999_v61  ;;  %2920 = vmatprep.mubr.bf16.mxu1 %v4001_v4 }
 0x2f9   : > { %2793 = vmatmul.mubr.bf16.gmra.mrb[72].mxu0 %v4003_v38  ;;  %2921 = vmatmul.mubr.bf16.gmra.mrb[72].mxu1 %v4004_v50  ;;  %v3660_v50 = vld [vmem:[%s5814_s8] ss:$0 sm:$0xff] }
 0x2fa   : > { %2800 = vmatprep.mubr.bf16.mxu0 %v4005_v17  ;;  %2928 = vmatprep.mubr.bf16.mxu1 %v4007_v0  ;;  %v3661_v17 = vld [vmem:[%s5814_s8 + $0x1] ss:$0 sm:$0xff] }
 0x301   : > { %2801 = vmatmul.mubr.bf16.gmra.mrb[76].mxu0 %v4009_v28  ;;  %2929 = vmatmul.mubr.bf16.gmra.mrb[76].mxu1 %v4010_v2 }
 0x302   : > { %2808 = vmatprep.mubr.bf16.mxu0 %v4011_v55  ;;  %2936 = vmatprep.mubr.bf16.mxu1 %v4013_v27 }
 0x309   : > { %2809 = vmatmul.mubr.bf16.gmra.mrb[80].mxu0 %v4015_v39  ;;  %2937 = vmatmul.mubr.bf16.gmra.mrb[80].mxu1 %v4016_v35 }
 0x30a   : > { %2816 = vmatprep.mubr.bf16.mxu0 %v4017_v41  ;;  %2944 = vmatprep.mubr.bf16.mxu1 %v4019_v25 }
 0x311   : > { %2817 = vmatmul.mubr.bf16.gmra.mrb[84].mxu0 %v4021_v32  ;;  %2945 = vmatmul.mubr.bf16.gmra.mrb[84].mxu1 %v4022_v31 }
 0x312   : > { %2824 = vmatprep.mubr.bf16.mxu0 %v4023_v43  ;;  %2952 = vmatprep.mubr.bf16.mxu1 %v4025_v30 }
 0x319   : > { %2825 = vmatmul.mubr.bf16.gmra.mrb[88].mxu0 %v4027_v47  ;;  %2953 = vmatmul.mubr.bf16.gmra.mrb[88].mxu1 %v4028_v56 }
 0x31a   : > { %2832 = vmatprep.mubr.bf16.mxu0 %v4029_v16  ;;  %2960 = vmatprep.mubr.bf16.mxu1 %v4031_v59 }
 0x321   : > { %2833 = vmatmul.mubr.bf16.gmra.mrb[92].mxu0 %v4033_v48  ;;  %2961 = vmatmul.mubr.bf16.gmra.mrb[92].mxu1 %v4034_v29 }
 0x322   : > { %2968 = vmatprep.mubr.bf16.mxu1 %v4035_v58 }
 0x329   : > { %2969 = vmatmul.mubr.bf16.gmra.mrb[96].mxu1 %v4037_v44 }
 0x32a   : > { %2976 = vmatprep.mubr.bf16.mxu1 %v4038_v63 }
 0x331   : > { %2977 = vmatmul.mubr.bf16.gmra.mrb[100].mxu1 %v4040_v7 }
 0x332   : > { %2984 = vmatprep.mubr.bf16.mxu1 %v4041_v33 }
 0x339   : > { %2985 = vmatmul.mubr.bf16.gmra.mrb[104].mxu1 %v4043_v40 }
 0x33a   : > { %2992 = vmatprep.mubr.bf16.mxu1 %v4044_v52 }
 0x341   : > { %2993 = vmatmul.mubr.bf16.gmra.mrb[108].mxu1 %v4046_v1 }
 0x37c   : > { %v5523_v57 = vpop.f32.mrb[32].mxu1  ;;  %v2714_v51 = vpop.f32.mrb[32].mxu0 }
 0x37d   : > { %v2844_v45 = vpop.f32.mrb[33].mxu1  ;;  %v2716_v42 = vpop.f32.mrb[33].mxu0  ;;  %v3016_v2 = vmul.f32 %v3660_v50, %v2714_v51 }
 0x37e   : > { %v5525_v46 = vpop.f32.mrb[34].mxu1  ;;  %v2717_v36 = vpop.f32.mrb[34].mxu0 }
 0x37f   : > { %v2847_v26 = vpop.f32.mrb[35].mxu1  ;;  %v2719_v14 = vpop.f32.mrb[35].mxu0  ;;  %v3017_v25 = vmul.f32 %v3660_v50, %v2717_v36 }
 0x384   : > { %v5527_v8 = vpop.f32.mrb[36].mxu1  ;;  %v2722_v3 = vpop.f32.mrb[36].mxu0 }
 0x385   : > { %v2852_v15 = vpop.f32.mrb[37].mxu1  ;;  %v2724_v22 = vpop.f32.mrb[37].mxu0  ;;  %v3018_v59 = vmul.f32 %v3660_v50, %v2722_v3 }
 0x386   : > { %v5529_v23 = vpop.f32.mrb[38].mxu1  ;;  %v2725_v24 = vpop.f32.mrb[38].mxu0 }
 0x387   : > { %v2855_v13 = vpop.f32.mrb[39].mxu1  ;;  %v2727_v10 = vpop.f32.mrb[39].mxu0  ;;  %v3019_v63 = vmul.f32 %v3660_v50, %v2725_v24 }
 0x38c   : > { %v5531_v20 = vpop.f32.mrb[40].mxu1  ;;  %v2730_v19 = vpop.f32.mrb[40].mxu0 }
 0x38d   : > { %v2860_v37 = vpop.f32.mrb[41].mxu1  ;;  %v2732_v53 = vpop.f32.mrb[41].mxu0  ;;  %v3020_v45 = vmul.f32 %v3660_v50, %v2730_v19 }
 0x38e   : > { %v5533_v54 = vpop.f32.mrb[42].mxu1  ;;  %v2733_v60 = vpop.f32.mrb[42].mxu0 }
 0x38f   : > { %v2863_v11 = vpop.f32.mrb[43].mxu1  ;;  %v2735_v34 = vpop.f32.mrb[43].mxu0  ;;  %v3021_v15 = vmul.f32 %v3660_v50, %v2733_v60 }
 0x394   : > { %v5535_v62 = vpop.f32.mrb[44].mxu1  ;;  %v2738_v5 = vpop.f32.mrb[44].mxu0 }
 0x395   : > { %v2868_v6 = vpop.f32.mrb[45].mxu1  ;;  %v2740_v12 = vpop.f32.mrb[45].mxu0  ;;  %v3022_v34 = vmul.f32 %v3660_v50, %v2738_v5 }
 0x396   : > { %v5537_v49 = vpop.f32.mrb[46].mxu1  ;;  %v2741_v61 = vpop.f32.mrb[46].mxu0 }
 0x397   : > { %v2871_v4 = vpop.f32.mrb[47].mxu1  ;;  %v2743_v38 = vpop.f32.mrb[47].mxu0 }
 0x39c   : > { %v2746_v0 = vpop.f32.mrb[48].mxu0  ;;  %v5545_v28 = vpop.f32.mrb[48].mxu1 }
 0x39d   : > { %v3030_v55 = vmul.f32 %v3661_v17, %v2746_v0  ;;  %v2748_v27 = vpop.f32.mrb[49].mxu0  ;;  %v2876_v39 = vpop.f32.mrb[49].mxu1  ;;  %v3023_v0 = vmul.f32 %v3660_v50, %v2741_v61 }
 0x39e   : > { %v2749_v35 = vpop.f32.mrb[50].mxu0  ;;  %v5547_v41 = vpop.f32.mrb[50].mxu1 }
 0x39f   : > { %v3038_v32 = vadd.f32 %v3030_v55, %v3016_v2  ;;  %v3031_v31 = vmul.f32 %v3661_v17, %v2749_v35  ;;  %v2879_v43 = vpop.f32.mrb[51].mxu1  ;;  %v2751_v30 = vpop.f32.mrb[51].mxu0  ;;  %v3662_v35 = vld [vmem:[%s5814_s8 + $0x2] ss:$0 sm:$0xff] }
 0x3a1   : > { %v3039_v47 = vadd.f32 %v3031_v31, %v3017_v25 }
 0x3a4   : > { %v2754_v56 = vpop.f32.mrb[52].mxu0  ;;  %v5549_v16 = vpop.f32.mrb[52].mxu1 }
 0x3a5   : > { %v3032_v9 = vmul.f32 %v3661_v17, %v2754_v56  ;;  %v2756_v48 = vpop.f32.mrb[53].mxu0  ;;  %v2884_v29 = vpop.f32.mrb[53].mxu1 }
 0x3a6   : > { %v2757_v58 = vpop.f32.mrb[54].mxu0  ;;  %v5551_v44 = vpop.f32.mrb[54].mxu1 }
 0x3a7   : > { %v3040_v7 = vadd.f32 %v3032_v9, %v3018_v59  ;;  %v3033_v33 = vmul.f32 %v3661_v17, %v2757_v58  ;;  %v2887_v40 = vpop.f32.mrb[55].mxu1  ;;  %v2759_v52 = vpop.f32.mrb[55].mxu0 }
 0x3a9   : > { %v3041_v1 = vadd.f32 %v3033_v33, %v3019_v63 }
 0x3ac   : > { %v2762_v21 = vpop.f32.mrb[56].mxu0  ;;  %v5553_v51 = vpop.f32.mrb[56].mxu1 }
 0x3ad   : > { %v3034_v42 = vmul.f32 %v3661_v17, %v2762_v21  ;;  %v2764_v36 = vpop.f32.mrb[57].mxu0  ;;  %v2892_v26 = vpop.f32.mrb[57].mxu1 }
 0x3ae   : > { %v2765_v14 = vpop.f32.mrb[58].mxu0  ;;  %v5555_v3 = vpop.f32.mrb[58].mxu1 }
 0x3af   : > { %v3042_v22 = vadd.f32 %v3034_v42, %v3020_v45  ;;  %v3035_v13 = vmul.f32 %v3661_v17, %v2765_v14  ;;  %v2895_v10 = vpop.f32.mrb[59].mxu1  ;;  %v2767_v24 = vpop.f32.mrb[59].mxu0 }
 0x3b1   : > { %v3043_v37 = vadd.f32 %v3035_v13, %v3021_v15 }
 0x3b4   : > { %v2770_v53 = vpop.f32.mrb[60].mxu0  ;;  %v5557_v11 = vpop.f32.mrb[60].mxu1 }
 0x3b5   : > { %v3036_v6 = vmul.f32 %v3661_v17, %v2770_v53  ;;  %v2772_v12 = vpop.f32.mrb[61].mxu0  ;;  %v2900_v4 = vpop.f32.mrb[61].mxu1 }
 0x3b6   : > { %v2773_v19 = vpop.f32.mrb[62].mxu0  ;;  %v5559_v38 = vpop.f32.mrb[62].mxu1 }
 0x3b7   : > { %v3044_v2 = vadd.f32 %v3036_v6, %v3022_v34  ;;  %v3037_v55 = vmul.f32 %v3661_v17, %v2773_v19  ;;  %v2903_v27 = vpop.f32.mrb[63].mxu1  ;;  %v2775_v60 = vpop.f32.mrb[63].mxu0 }
 0x3b9   : > { %v3045_v39 = vadd.f32 %v3037_v55, %v3023_v0 }
 0x3bc   : > { %v2778_v25 = vpop.f32.mrb[64].mxu0  ;;  %v5564_v31 = vpop.f32.mrb[64].mxu1 }
 0x3bd   : > { %v3052_v5 = vmul.f32 %v3662_v35, %v2778_v25  ;;  %v2780_v43 = vpop.f32.mrb[65].mxu0  ;;  %v2908_v30 = vpop.f32.mrb[65].mxu1 }
 0x3be   : > { %v2781_v56 = vpop.f32.mrb[66].mxu0  ;;  %v5566_v59 = vpop.f32.mrb[66].mxu1 }
 0x3bf   : > { %v3060_v9 = vadd.f32 %v3052_v5, %v3038_v32  ;;  %v3053_v61 = vmul.f32 %v3662_v35, %v2781_v56  ;;  %v2911_v50 = vpop.f32.mrb[67].mxu1  ;;  %v2783_v17 = vpop.f32.mrb[67].mxu0 }
 0x3c1   : > { %v3061_v48 = vadd.f32 %v3053_v61, %v3039_v47  ;;  %v5600_v61 = vld [vmem:[%s5814_s8 + $0x4] ss:$0 sm:$0xff] }
 0x3c4   : > { %v2786_v29 = vpop.f32.mrb[68].mxu0  ;;  %v5568_v58 = vpop.f32.mrb[68].mxu1 }
 0x3c5   : > { %v3054_v63 = vmul.f32 %v3662_v35, %v2786_v29  ;;  %v2788_v33 = vpop.f32.mrb[69].mxu0  ;;  %v2916_v40 = vpop.f32.mrb[69].mxu1 }
 0x3c6   : > { %v2789_v52 = vpop.f32.mrb[70].mxu0  ;;  %v5570_v21 = vpop.f32.mrb[70].mxu1  ;;  %v3096_v40 = vmul.f32 %v5600_v61, %v5523_v57  ;;  %v5623_v57 = vld [vmem:[%s5814_s8 + $0x7] ss:$0 sm:$0xff] }
 0x3c7   : > { %v5572_v45 = vadd.f32 %v3054_v63, %v3040_v7  ;;  %v3055_v42 = vmul.f32 %v3662_v35, %v2789_v52  ;;  %v2919_v36 = vpop.f32.mrb[71].mxu1  ;;  %v2791_v26 = vpop.f32.mrb[71].mxu0 }
 0x3c9   : > { %v5574_v14 = vadd.f32 %v3055_v42, %v3041_v1 }
 0x3cc   : > { %v2794_v32 = vpop.f32.mrb[72].mxu0  ;;  %v5576_v15 = vpop.f32.mrb[72].mxu1 }
 0x3cd   : > { %v3056_v47 = vmul.f32 %v3662_v35, %v2794_v32  ;;  %v2796_v13 = vpop.f32.mrb[73].mxu0  ;;  %v2924_v10 = vpop.f32.mrb[73].mxu1  ;;  %v5614_v32 = vld [vmem:[%s5814_s8 + $0x6] ss:$0 sm:$0xff] }
 0x3ce   : > { %v2797_v24 = vpop.f32.mrb[74].mxu0  ;;  %v5578_v53 = vpop.f32.mrb[74].mxu1 }
 0x3cf   : > { %v5580_v34 = vadd.f32 %v3056_v47, %v3042_v22  ;;  %v3057_v6 = vmul.f32 %v3662_v35, %v2797_v24  ;;  %v2927_v12 = vpop.f32.mrb[75].mxu1  ;;  %v2799_v7 = vpop.f32.mrb[75].mxu0  ;;  %v3097_v47 = vmul.f32 %v5600_v61, %v5525_v46  ;;  %v3141_v46 = vmul.f32 %v5614_v32, %v5566_v59 }
 0x3d1   : > { %v5582_v4 = vadd.f32 %v3057_v6, %v3043_v37  ;;  %v5595_v37 = vld [vmem:[%s5814_s8 + $0x3] ss:$0 sm:$0xff]  ;;  %v3140_v6 = vmul.f32 %v5614_v32, %v5564_v31 }
 0x3d4   : > { %v2802_v19 = vpop.f32.mrb[76].mxu0  ;;  %v5584_v0 = vpop.f32.mrb[76].mxu1 }
 0x3d5   : > { %v3058_v1 = vmul.f32 %v3662_v35, %v2802_v19  ;;  %v2804_v55 = vpop.f32.mrb[77].mxu0  ;;  %v2932_v27 = vpop.f32.mrb[77].mxu1 }
 0x3d6   : > { %v2805_v60 = vpop.f32.mrb[78].mxu0  ;;  %v5586_v25 = vpop.f32.mrb[78].mxu1 }
 0x3d7   : > { %v5588_v5 = vadd.f32 %v3058_v1, %v3044_v2  ;;  %v3059_v43 = vmul.f32 %v3662_v35, %v2805_v60  ;;  %v2935_v30 = vpop.f32.mrb[79].mxu1  ;;  %v2807_v22 = vpop.f32.mrb[79].mxu0 }
 0x3d9   : > { %v5590_v56 = vadd.f32 %v3059_v43, %v3045_v39  ;;  %v5606_v39 = vld [vmem:[%s5814_s8 + $0x5] ss:$0 sm:$0xff] }
 0x3da   : > { %v3118_v13 = vmul.f32 %v5606_v39, %v5545_v28 }
 0x3dc   : > { %v2810_v50 = vpop.f32.mrb[80].mxu0  ;;  %v2938_v17 = vpop.f32.mrb[80].mxu1 }
 0x3dd   : > { %v3074_v2 = vmul.f32 %v5595_v37, %v2810_v50  ;;  %v2812_v29 = vpop.f32.mrb[81].mxu0  ;;  %v2940_v35 = vpop.f32.mrb[81].mxu1 }
 0x3de   : > { %v2813_v63 = vpop.f32.mrb[82].mxu0  ;;  %v2941_v33 = vpop.f32.mrb[82].mxu1 }
 0x3df   : > { %v3082_v52 = vadd.f32 %v3074_v2, %v3060_v9  ;;  %v3075_v42 = vmul.f32 %v5595_v37, %v2813_v63  ;;  %v2943_v36 = vpop.f32.mrb[83].mxu1  ;;  %v2815_v26 = vpop.f32.mrb[83].mxu0  ;;  %v3119_v9 = vmul.f32 %v5606_v39, %v5547_v41  ;;  %v3098_v41 = vmul.f32 %v5600_v61, %v5527_v8 }
 0x3e0   : > { %v3163_v31 = vmul.f32 %v5623_v57, %v2941_v33  ;;  %v3099_v63 = vmul.f32 %v5600_v61, %v5529_v23 }
 0x3e1   : > { %v3104_v10 = vadd.f32 %v3096_v40, %v3082_v52  ;;  %v3083_v24 = vadd.f32 %v3075_v42, %v3061_v48  ;;  %v3162_v48 = vmul.f32 %v5623_v57, %v2938_v17  ;;  %v3120_v40 = vmul.f32 %v5606_v39, %v5549_v16 }
 0x3e2   : > { %v3121_v42 = vmul.f32 %v5606_v39, %v5551_v44  ;;  %v3100_v44 = vmul.f32 %v5600_v61, %v5531_v20 }
 0x3e3   : > { %v3126_v12 = vadd.f32 %v3118_v13, %v3104_v10  ;;  %v3105_v7 = vadd.f32 %v3097_v47, %v3083_v24  ;;  %v3143_v47 = vmul.f32 %v5614_v32, %v5570_v21 }
 0x3e4   : > { %v2818_v19 = vpop.f32.mrb[84].mxu0  ;;  %v2946_v28 = vpop.f32.mrb[84].mxu1 }
 0x3e5   : > { %v3148_v1 = vadd.f32 %v3140_v6, %v3126_v12  ;;  %v3127_v55 = vadd.f32 %v3119_v9, %v3105_v7  ;;  %v3076_v27 = vmul.f32 %v5595_v37, %v2818_v19  ;;  %v2820_v60 = vpop.f32.mrb[85].mxu0  ;;  %v2948_v43 = vpop.f32.mrb[85].mxu1  ;;  %v3164_v16 = vmul.f32 %v5623_v57, %v2946_v28 }
 0x3e6   : > { %v2821_v30 = vpop.f32.mrb[86].mxu0  ;;  %v2949_v22 = vpop.f32.mrb[86].mxu1 }
 0x3e7   : > { %v5636_v50 = vadd.f32 %v3162_v48, %v3148_v1  ;;  %v3149_v59 = vadd.f32 %v3141_v46, %v3127_v55  ;;  %v3084_v2 = vadd.f32 %v3076_v27, %v5572_v45  ;;  %v3077_v29 = vmul.f32 %v5595_v37, %v2821_v30  ;;  %v2951_v17 = vpop.f32.mrb[87].mxu1  ;;  %v2823_v35 = vpop.f32.mrb[87].mxu0 }
 0x3e8   : > { %v3142_v45 = vmul.f32 %v5614_v32, %v5568_v58  ;;  %v3165_v58 = vmul.f32 %v5623_v57, %v2949_v22  ;;  %v3101_v55 = vmul.f32 %v5600_v61, %v5533_v54  ;;  %v3122_v27 = vmul.f32 %v5606_v39, %v5553_v51 }
 0x3e9   : > { %v5644_v8 = vadd.f32 %v3163_v31, %v3149_v59  ;;  %v3106_v33 = vadd.f32 %v3098_v41, %v3084_v2  ;;  %v3085_v52 = vadd.f32 %v3077_v29, %v5574_v14  ;;  %v3123_v41 = vmul.f32 %v5606_v39, %v5555_v3 }
 0x3ea   : > { %v3145_v22 = vmul.f32 %v5614_v32, %v5578_v53  ;;  %v3102_v3 = vmul.f32 %v5600_v61, %v5535_v62 }
 0x3eb   : > { %v3128_v36 = vadd.f32 %v3120_v40, %v3106_v33  ;;  %v3107_v26 = vadd.f32 %v3099_v63, %v3085_v52 }
 0x3ec   : > { %v2826_v23 = vpop.f32.mrb[88].mxu0  ;;  %v2954_v13 = vpop.f32.mrb[88].mxu1 }
 0x3ed   : > { %v3150_v10 = vadd.f32 %v3142_v45, %v3128_v36  ;;  %v3129_v24 = vadd.f32 %v3121_v42, %v3107_v26  ;;  %v3078_v9 = vmul.f32 %v5595_v37, %v2826_v23  ;;  %v2828_v14 = vpop.f32.mrb[89].mxu0  ;;  %v2956_v6 = vpop.f32.mrb[89].mxu1  ;;  %v3166_v51 = vmul.f32 %v5623_v57, %v2954_v13 }
 0x3ee   : > { %v2829_v12 = vpop.f32.mrb[90].mxu0  ;;  %v2957_v7 = vpop.f32.mrb[90].mxu1  ;;  %v3103_v26 = vmul.f32 %v5600_v61, %v5537_v49 }
 0x3ef   : > { %v5658_v46 = vadd.f32 %v3164_v16, %v3150_v10  ;;  %v3151_v21 = vadd.f32 %v3143_v47, %v3129_v24  ;;  %v3086_v19 = vadd.f32 %v3078_v9, %v5580_v34  ;;  %v3079_v1 = vmul.f32 %v5595_v37, %v2829_v12  ;;  %v2959_v28 = vpop.f32.mrb[91].mxu1  ;;  %v2831_v48 = vpop.f32.mrb[91].mxu0  ;;  %v5690_v10 = vld [vmem:[%s5814_s8 + $0x8] ss:$0 sm:$0xff] }
 0x3f0   : > { %v3144_v34 = vmul.f32 %v5614_v32, %v5576_v15  ;;  %v3167_v15 = vmul.f32 %v5623_v57, %v2957_v7  ;;  %v3124_v47 = vmul.f32 %v5606_v39, %v5557_v11  ;;  %v3147_v11 = vmul.f32 %v5614_v32, %v5586_v25 }
 0x3f1   : > { %v5666_v20 = vadd.f32 %v3165_v58, %v3151_v21  ;;  %v3108_v60 = vadd.f32 %v3100_v44, %v3086_v19  ;;  %v3087_v43 = vadd.f32 %v3079_v1, %v5582_v4 }
 0x3f3   : > { %v3130_v31 = vadd.f32 %v3122_v27, %v3108_v60  ;;  %v3109_v30 = vadd.f32 %v3101_v55, %v3087_v43 }
 0x3f4   : > { %v2834_v54 = vpop.f32.mrb[92].mxu0  ;;  %v2962_v59 = vpop.f32.mrb[92].mxu1 }
 0x3f5   : > { %v3152_v2 = vadd.f32 %v3144_v34, %v3130_v31  ;;  %v3131_v29 = vadd.f32 %v3123_v41, %v3109_v30  ;;  %v3080_v17 = vmul.f32 %v5595_v37, %v2834_v54  ;;  %v2836_v4 = vpop.f32.mrb[93].mxu0  ;;  %v2964_v35 = vpop.f32.mrb[93].mxu1 }
 0x3f6   : > { %v2837_v63 = vpop.f32.mrb[94].mxu0  ;;  %v2965_v40 = vpop.f32.mrb[94].mxu1 }
 0x3f7   : > { %v3174_v33 = vadd.f32 %v3166_v51, %v3152_v2  ;;  %v3153_v52 = vadd.f32 %v3145_v22, %v3131_v29  ;;  %v3088_v53 = vadd.f32 %v3080_v17, %v5588_v5  ;;  %v3081_v42 = vmul.f32 %v5595_v37, %v2837_v63  ;;  %v2967_v45 = vpop.f32.mrb[95].mxu1  ;;  %v2839_v36 = vpop.f32.mrb[95].mxu0 }
 0x3f8   : > { %v3125_v5 = vmul.f32 %v5606_v39, %v5559_v38  ;;  %v3146_v37 = vmul.f32 %v5614_v32, %v5584_v0  ;;  %v3169_v44 = vmul.f32 %v5623_v57, %v2965_v40  ;;  %v3669_v38 = vld [vmem:[%s5815_s9] ss:$0 sm:$0xff] }
 0x3f9   : > { %v3175_v23 = vadd.f32 %v3167_v15, %v3153_v52  ;;  %v3110_v62 = vadd.f32 %v3102_v3, %v3088_v53  ;;  %v3089_v13 = vadd.f32 %v3081_v42, %v5590_v56  ;;  %v3168_v56 = vmul.f32 %v5623_v57, %v2962_v59 }
 0x3fb   : > { %v3132_v16 = vadd.f32 %v3124_v47, %v3110_v62  ;;  %v3111_v49 = vadd.f32 %v3103_v26, %v3089_v13 }
 0x3fc   : > { %v2970_v61 = vpop.f32.mrb[96].mxu1 }
 0x3fd   : > { %v3154_v24 = vadd.f32 %v3146_v37, %v3132_v16  ;;  %v3133_v9 = vadd.f32 %v3125_v5, %v3111_v49  ;;  %v3184_v14 = vmul.f32 %v5690_v10, %v2970_v61  ;;  %v2972_v6 = vpop.f32.mrb[97].mxu1 }
 0x3fe   : > { %v2973_v0 = vpop.f32.mrb[98].mxu1 }
 0x3ff   : > { %v3176_v39 = vadd.f32 %v3168_v56, %v3154_v24  ;;  %v3155_v58 = vadd.f32 %v3147_v11, %v3133_v9  ;;  %v3192_v12 = vadd.f32 %v3184_v14, %v5636_v50  ;;  %v3185_v25 = vmul.f32 %v5690_v10, %v2973_v0  ;;  %v2975_v32 = vpop.f32.mrb[99].mxu1 }
 0x400   : > { %v3380_v32 = vld [vmem:[%s5818_s12 + $0x28] sm:$0xff] }
 0x401   : > { %v3177_v7 = vadd.f32 %v3169_v44, %v3155_v58  ;;  %v3207_v21 = vadd.f32 %v3669_v38, %v3192_v12  ;;  %v3193_v19 = vadd.f32 %v3185_v25, %v5644_v8  ;;  %v3375_v44 = vld [vmem:[%s5818_s12] sm:$0xff]  ;;  %v3378_v58 = vld [vmem:[%s5818_s12 + $0x18] sm:$0xff] }
 0x402   : > { %v3379_v25 = vld [vmem:[%s5818_s12 + $0x20] sm:$0xff] }
 0x403   : > { %v3215_v1 = vmax.f32 %v3207_v21, 0.0  ;;  %v3208_v28 = vadd.f32 %v3669_v38, %v3193_v19  ;;  %v3381_v21 = vld [vmem:[%s5818_s12 + $0x30] sm:$0xff]  ;;  %v3382_v19 = vld [vmem:[%s5818_s12 + $0x38] sm:$0xff] }
 0x404   : > { %v2978_v48 = vpop.f32.mrb[100].mxu1 }
 0x405   : > { %v3216_v57 = vmax.f32 %v3208_v28, 0.0  ;;  %v3186_v55 = vmul.f32 %v5690_v10, %v2978_v48  ;;  %v2980_v27 = vpop.f32.mrb[101].mxu1  ;;  %v3223_v43 = vmin.f32 %v3215_v1, 6.0  ;;  %v3843_v1 = vpack.c.bf16 %v3382_v19, %v3381_v21  ;;  %v3670_v28 = vld [vmem:[%s5817_s11] ss:$0 sm:$0xff] }
 0x406   : > { %v2981_v60 = vpop.f32.mrb[102].mxu1 }
 0x407   : > { %v3224_v41 = vmin.f32 %v3216_v57, 6.0  ;;  %v3194_v34 = vadd.f32 %v3186_v55, %v5658_v46  ;;  %v3187_v50 = vmul.f32 %v5690_v10, %v2981_v60  ;;  %v2983_v31 = vpop.f32.mrb[103].mxu1 }
 0x409   : > { %v3209_v30 = vadd.f32 %v3669_v38, %v3194_v34  ;;  %v3195_v22 = vadd.f32 %v3187_v50, %v5666_v20  ;;  %v3231_v54 = vpack.c.bf16 %v3224_v41, %v3223_v43 }
 0x40b   : > { %v3217_v8 = vmax.f32 %v3209_v30, 0.0  ;;  %v3210_v59 = vadd.f32 %v3669_v38, %v3195_v22  ;;  %3806 = vmatprep.mubr.msk.bf16.mxu0 %vm601_vm0, %v3231_v54 }
 0x40c   : > { %v2986_v2 = vpop.f32.mrb[104].mxu1 }
 0x40d   : > { %v3218_v51 = vmax.f32 %v3210_v59, 0.0  ;;  %v3188_v29 = vmul.f32 %v5690_v10, %v2986_v2  ;;  %v2988_v17 = vpop.f32.mrb[105].mxu1  ;;  %v3225_v35 = vmin.f32 %v3217_v8, 6.0 }
 0x40e   : > { %v2989_v4 = vpop.f32.mrb[106].mxu1 }
 0x40f   : > { %v3226_v3 = vmin.f32 %v3218_v51, 6.0  ;;  %v3196_v46 = vadd.f32 %v3188_v29, %v3174_v33  ;;  %v3189_v15 = vmul.f32 %v5690_v10, %v2989_v4  ;;  %v2991_v63 = vpop.f32.mrb[107].mxu1 }
 0x411   : > { %v3232_v40 = vpack.c.bf16 %v3226_v3, %v3225_v35  ;;  %v3211_v52 = vadd.f32 %v3669_v38, %v3196_v46  ;;  %v3197_v20 = vadd.f32 %v3189_v15, %v3175_v23 }
 0x413   : > { %v3219_v53 = vmax.f32 %v3211_v52, 0.0  ;;  %v3212_v42 = vadd.f32 %v3669_v38, %v3197_v20  ;;  %3807 = vmatmul.mubr.msk.bf16.vlgmr.msra.gmra.mrb[96].mxu0 %vm601_vm0, %v3232_v40 }
 0x414   : > { %v2994_v45 = vpop.f32.mrb[108].mxu1 }
 0x415   : > { %v3220_v36 = vmax.f32 %v3212_v42, 0.0  ;;  %v3190_v26 = vmul.f32 %v5690_v10, %v2994_v45  ;;  %v2996_v47 = vpop.f32.mrb[109].mxu1  ;;  %v3227_v13 = vmin.f32 %v3219_v53, 6.0 }
 0x416   : > { %v2997_v62 = vpop.f32.mrb[110].mxu1 }
 0x417   : > { %v3228_v5 = vmin.f32 %v3220_v36, 6.0  ;;  %v3198_v37 = vadd.f32 %v3190_v26, %v3176_v39  ;;  %v3191_v33 = vmul.f32 %v5690_v10, %v2997_v62  ;;  %v2999_v16 = vpop.f32.mrb[111].mxu1  ;;  %v3376_v10 = vld [vmem:[%s5818_s12 + $0x8] sm:$0xff]  ;;  %v4117_v39 = vmov 0.0|0.0  }
 0x418   : > { %v3834_v0 = vpack.c.bf16 %v3376_v10, %v3375_v44  ;;  %3833 = vmatprep.subr.bf16.mxu0 %v4117_v39 }
 0x419   : > { %v3213_v49 = vadd.f32 %v3669_v38, %v3198_v37  ;;  %v3199_v11 = vadd.f32 %v3191_v33, %v3177_v7  ;;  %v3233_v61 = vpack.c.bf16 %v3228_v5, %v3227_v13  ;;  %v3840_v7 = vpack.c.bf16 %v3380_v32, %v3379_v25 }
 0x41a   : > { %3835 = vmatpush3.bf16.msra.mxu0 %v3834_v0 }
 0x41b   : > { %v3221_v23 = vmax.f32 %v3213_v49, 0.0  ;;  %v3214_v24 = vadd.f32 %v3669_v38, %v3199_v11  ;;  %3810 = vmatprep.mubr.msk.bf16.mxu0 %vm601_vm0, %v3233_v61  ;;  %3836 = vmatprep.subr.bf16.mxu0 %v4117_v39  ;;  %v3377_v38 = vld [vmem:[%s5818_s12 + $0x10] sm:$0xff] }
 0x41c   : > { %v3837_v12 = vpack.c.bf16 %v3378_v58, %v3377_v38  ;;  %v3383_v38 = vld [vmem:[%s5819_s13] sm:$0x1] }
 0x41d   : > { %v3222_v56 = vmax.f32 %v3214_v24, 0.0  ;;  %v3229_v9 = vmin.f32 %v3221_v23, 6.0 }
 0x41e   : > { %3838 = vmatpush3.bf16.msra.mxu0 %v3837_v12 }
 0x41f   : > { %v3230_v14 = vmin.f32 %v3222_v56, 6.0  ;;  %3839 = vmatprep.subr.bf16.mxu0 %v4117_v39 }
 0x421   : > { %v3234_v6 = vpack.c.bf16 %v3230_v14, %v3229_v9 }
 0x422   : > { %3841 = vmatpush3.bf16.msra.mxu0 %v3840_v7 }
 0x423   : > { %3811 = vmatmul.mubr.msk.bf16.gmra.mrb[100].mxu0 %vm601_vm0, %v3234_v6  ;;  %3842 = vmatprep.subr.bf16.mxu0 %v4117_v39 }
 0x424   : > { %3830 = vmatprep.mubr.msk.f32.mxu0 %vm4118_vm4, %v4115_v18 }
 0x426   : > { %3844 = vmatpush3.bf16.msra.mxu0 %v3843_v1 }
 0x4e6   : > { %v3808_v48 = vpop.f32.mrb[96].mxu0 }
 0x4e7   : > { %v3313_v57 = vadd.f32 %v3808_v48, %v3670_v28  ;;  %v3304_v55 = vpop.f32.mrb[97].mxu0 }
 0x4e8   : > { %v3305_v27 = vadd.f32 %v3670_v28, %v3304_v55  ;;  %v3809_v60 = vpop.f32.mrb[98].mxu0 }
 0x4e9   : > { %v3316_v43 = vadd.f32 %v3809_v60, %v3670_v28  ;;  %v3307_v41 = vpop.f32.mrb[99].mxu0  ;;  %v3337_v34 = vmax.f32 %v3313_v57, 0.0 }
 0x4ea   : > { %v3335_v50 = vmax.f32 %v3305_v27, 0.0  ;;  %v3308_v31 = vadd.f32 %v3670_v28, %v3307_v41 }
 0x4eb   : > { %v3338_v22 = vmax.f32 %v3316_v43, 0.0  ;;  %v3345_v18 = vmin.f32 %v3337_v34, 6.0 }
 0x4ec   : > { %v3343_v30 = vmin.f32 %v3335_v50, 6.0  ;;  %v3336_v54 = vmax.f32 %v3308_v31, 0.0 }
 0x4ed   : > { %v3346_v2 = vmin.f32 %v3338_v22, 6.0  ;;  %v3355_v17 = vsel %vm3351_vm5, %v3345_v18, 0.0 }
 0x4ee   : > { %v3344_v8 = vmin.f32 %v3336_v54, 6.0  ;;  %v3352_v59 = vsel %vm3351_vm5, %v3343_v30, 0.0 }
 0x4ef   : > { %v3357_v35 = vsel %vm3351_vm5, %v3346_v2, 0.0 }
 0x4f0   : > { %v3353_v51 = vsel %vm3351_vm5, %v3344_v8, 0.0 }
 0x4f1   : > { %v3354_v29 = vadd.f32 %v3353_v51, %v3352_v59 }
 0x4f3   : > { %v3356_v4 = vadd.f32 %v3355_v17, %v3354_v29 }
 0x4f5   : > { %v3358_v3 = vadd.f32 %v3357_v35, %v3356_v4 }
 0x4f6   : > { %v3812_v46 = vpop.f32.mrb[100].mxu0 }
 0x4f7   : > { %v3329_v15 = vadd.f32 %v3812_v46, %v3670_v28  ;;  %v3320_v63 = vpop.f32.mrb[101].mxu0 }
 0x4f8   : > { %v3321_v40 = vadd.f32 %v3670_v28, %v3320_v63  ;;  %v3813_v52 = vpop.f32.mrb[102].mxu0 }
 0x4f9   : > { %v3332_v20 = vadd.f32 %v3813_v52, %v3670_v28  ;;  %v3323_v53 = vpop.f32.mrb[103].mxu0  ;;  %v3341_v42 = vmax.f32 %v3329_v15, 0.0 }
 0x4fa   : > { %v3339_v45 = vmax.f32 %v3321_v40, 0.0  ;;  %v3324_v36 = vadd.f32 %v3670_v28, %v3323_v53 }
 0x4fb   : > { %v3342_v47 = vmax.f32 %v3332_v20, 0.0  ;;  %v3349_v13 = vmin.f32 %v3341_v42, 6.0 }
 0x4fc   : > { %v3347_v26 = vmin.f32 %v3339_v45, 6.0  ;;  %v3340_v62 = vmax.f32 %v3324_v36, 0.0 }
 0x4fd   : > { %v3350_v16 = vmin.f32 %v3342_v47, 6.0  ;;  %v3363_v61 = vsel %vm3351_vm5, %v3349_v13, 0.0 }
 0x4fe   : > { %v3359_v5 = vsel %vm3351_vm5, %v3347_v26, 0.0  ;;  %v3348_v37 = vmin.f32 %v3340_v62, 6.0 }
 0x4ff   : > { %v3360_v33 = vadd.f32 %v3359_v5, %v3358_v3  ;;  %v3365_v24 = vsel %vm3351_vm5, %v3350_v16, 0.0 }
 0x500   : > { %v3361_v49 = vsel %vm3351_vm5, %v3348_v37, 0.0 }
 0x501   : > { %v3362_v11 = vadd.f32 %v3361_v49, %v3360_v33 }
 0x503   : > { %v3364_v23 = vadd.f32 %v3363_v61, %v3362_v11 }
 0x505   : > { %v3366_v56 = vadd.f32 %v3365_v24, %v3364_v23 }
 0x507   : > { %v3367_v9 = vrot.slane %v3366_v56, 4 }
 0x509   : > { %v3368_v14 = vadd.f32 %v3367_v9, %v3366_v56 }
 0x50b   : > { %v3369_v6 = vrot.slane %v3368_v14, 2 }
 0x50d   : > { %v3370_v44 = vadd.f32 %v3369_v6, %v3368_v14 }
 0x50f   : > { %v3371_v10 = vrot.slane %v3370_v44, 1 }
 0x511   : > { %v3372_v0 = vadd.f32 %v3371_v10, %v3370_v44 }
 0x513   : > { %v3374_v39 = vmul.f32 0.015625, %v3372_v0 }
 0x515   : > { %3831 = vmatmul.mubr.msk.f32.vlgmr.msra.gmra.mrb[104].mxu0 %vm3351_vm5, %v3374_v39 }
 0x5e8   : > { %v3453_v58 = vpop.f32.mrb[104].mxu0 }
 0x5e9   : > { %v3454_v12 = vadd.f32 %v3453_v58, %v3383_v38  ;;  %v3832_v25 = vpop.f32.mrb[105].mxu0 }
 0x5eb   : > { %3458 = vst.msk [vmem:[%s459_s21] sm:$0x1] %vm3457_vm6, %v3454_v12 }
 0x5ec   : > { %4064 = shalt.err (!%p4061_p3)
}
 0x5ed   : > { %s4065_s0 = scalar_lea.hbm %s5764_s26, 16  ;;  %s4069_s22 = scalar_lea.hbm %s5820_s14, 32 }
 0x5ee   : > { %p4066_p4 = scmp.ne.s32.totalorder %s5764_s26, %s4065_s0  ;;  %p4070_p9 = scmp.lt.u32.totalorder %s5764_s26, %s5820_s14 }
 0x5ef   : > { %p4071_p10 = scmp.lt.u32.totalorder %s4069_s22, %s4065_s0  ;;  %p4073_p12 = scmp.lt.u32.totalorder %s4065_s0, %s5764_s26 }
 0x5f0   : > { %p4067_p7 = pnand %p4066_p4, %p4233_p5 }
 0x5f1   : > { %p4072_p11 = por %p4071_p10, %p4070_p9 }
 0x5f2   : > { %p4068_p8 = pneg %p4067_p7 }
 0x5f3   : > { %p4074_p13 = por %p4073_p12, %p4072_p11 }
 0x5f5   : > { %p4075_p0 = pnand %p4074_p13, %p4068_p8 }
 0x5f7   : > { %4078 = shalt.err (!%p4075_p0)
}
 0x5f8   : > { %3877 = dma.vmem_to_hbm [thread:$0]  (%p4233_p5), %s5766_s15, 16, %s5764_s26, %s3460_s27  }
 0x5f9 PF: > { %p3883_p1 = scmp.ge.s32.totalorder %s4113_s16, 2  ;;  %s3484_s1 = sand.u32 1, %s4101_s29  }
 0x5fa   : > { %s3485_s28 = scalar_lea.sflag [#allocation4], %s3484_s1 }
 0x5fb   : > { %p3880_p2 = pnand %p3883_p1, %p4237_p6 }
 0x5fd   : > { %4096 = dma.done.wait (!%p3880_p2), %s3485_s28, 16  }
 0x5fe   : > { %4098 = vsyncadd (!%p3880_p2), %s3485_s28, 4294967280  ;;  %s5830_s18 = sld [smem:[#allocation6_spill]]  ;;  %s5831_s15 = sld [smem:[#allocation7_spill]] }
 0x5ff   : > { %p24_p3 = scmp.ge.s32.totalorder %s4220_s19, 4   ;;  %s5832_s29 = smov %s4105_s30 }
 0x600   : > { %s5834_s16 = smov %s4220_s19 }
 0x601   :  { %26 = sbr.rel (!%p24_p3) target bundleno = 6 (0x6), region = 114 }
 0x604   : > { %s5833_s30 = smov %s5830_s18 }
 0x608   :  { %3489 = vsyncpa [#allocation4], 1 }
 0x609   :  { %3491 = vsyncpa [#allocation4 + $0x1], 1 }

</bundles_post_ra>
